<compile_context>
chip_gen: v7x
topology: tpu7x:2x2x1
jax: 0.10.0
libtpu: 0.0.40
codegen_flags: <defaults>
</compile_context>

<pallas_src>
import numpy as np

import jax
import jax.numpy as jnp
from jax.experimental import pallas as pl
from jax.experimental.pallas import tpu as pltpu

COMPUTE_DTYPE = jnp.bfloat16   # matmul operand dtype (accumulation stays f32)

_VMEM_SPEC = pl.BlockSpec(memory_space=pltpu.MemorySpace.VMEM)

# LeNet static geometry
_H0, _W0 = 32, 32            # input spatial
_K = 5                       # conv kernel size
_C1, _H1, _W1 = 16, 28, 28   # conv1 output
_P1H, _P1W = 14, 14          # pool1 output
_C2, _H2, _W2 = 32, 10, 10   # conv2 output
_P2H, _P2W = 5, 5            # pool2 output
_FPAD = 128                  # padded fc feature width (lane-dense)


# ---------------------------------------------------------------------------
# Fused Pallas kernel (one grid step == one sample, everything in VMEM)
# ---------------------------------------------------------------------------
def _lenet_fused_kernel(x_ref, k1_ref, b1_ref, sv1_ref, sh1_ref,
                        k2_ref, b2_ref, sv2_ref, sh2_ref,
                        wf1_ref, bf1_ref, wf2_ref, bf2_ref, wf3_ref, bf3_ref,
                        out_ref, p1_ref, p2_ref):
    f32 = jnp.float32
    dt = k1_ref.dtype

    # ---- conv1 + bias + ReLU : (32, 32) -> (28, 16*28) ---------------------
    acc = jnp.zeros((_H1, _C1 * _W1), f32)
    for i in range(_K):                                        # static unroll
        a_i = x_ref[pl.ds(i, _H1), :]                          # (28, 32)
        acc = acc + jnp.dot(a_i, k1_ref[i], preferred_element_type=f32)
    y = jnp.maximum(acc + b1_ref[...], 0.0).astype(dt)         # (28, 448)

    # ---- pool1 (2x2 max) via 0/1 selection matmuls -> (14, 16*14) ----------
    v = jnp.maximum(jnp.dot(sv1_ref[0], y, preferred_element_type=f32),
                    jnp.dot(sv1_ref[1], y, preferred_element_type=f32)).astype(dt)
    p1 = jnp.maximum(jnp.dot(v, sh1_ref[0], preferred_element_type=f32),
                     jnp.dot(v, sh1_ref[1], preferred_element_type=f32))
    p1_ref[...] = p1.astype(dt)                                # (14, 224)

    # ---- conv2 + bias + ReLU : (14, 224) -> (10, 32*10) --------------------
    acc = jnp.zeros((_H2, _C2 * _W2), f32)
    for i in range(_K):
        a_i = p1_ref[pl.ds(i, _H2), :]                         # (10, 224)
        acc = acc + jnp.dot(a_i, k2_ref[i], preferred_element_type=f32)
    y = jnp.maximum(acc + b2_ref[...], 0.0).astype(dt)         # (10, 320)

    # ---- pool2 -> (5, 32*5) -------------------------------------------------
    v = jnp.maximum(jnp.dot(sv2_ref[0], y, preferred_element_type=f32),
                    jnp.dot(sv2_ref[1], y, preferred_element_type=f32)).astype(dt)
    p2 = jnp.maximum(jnp.dot(v, sh2_ref[0], preferred_element_type=f32),
                     jnp.dot(v, sh2_ref[1], preferred_element_type=f32))
    p2_ref[...] = p2.astype(dt)                                # (5, 160)

    # ---- fc1 + ReLU : (5,160) . (5,160,128) -> (1, 128) ---------------------
    acc = jnp.zeros((1, _FPAD), f32)
    for h in range(_P2H):
        acc = acc + jnp.dot(p2_ref[pl.ds(h, 1), :], wf1_ref[h],
                            preferred_element_type=f32)
    z = jnp.maximum(acc + bf1_ref[...], 0.0).astype(dt)

    # ---- fc2 + ReLU : (1, 128) -> (1, 128) ----------------------------------
    z = jnp.maximum(jnp.dot(z, wf2_ref[...], preferred_element_type=f32)
                    + bf2_ref[...], 0.0).astype(dt)

    # ---- fc (logits, 128 padded lanes; valid lanes 0..9) --------------------
    out_ref[...] = (jnp.dot(z, wf3_ref[...], preferred_element_type=f32)
                    + bf3_ref[...])


# ---------------------------------------------------------------------------
# One-time weight preprocessing (plain JAX / numpy, outside the kernel)
# ---------------------------------------------------------------------------
def _conv_band_matrices(w, w_in, w_out):
    """(Cout, Cin, kh, kw) -> (kh, Cin*w_in, Cout*w_out) banded matmul weights.

    K[i][c*w_in + x, o*w_out + wo] = w[o, c, i, x - wo] for 0 <= x - wo < kw,
    so conv(x,w)[o,ho,wo] = sum_i (A[ho+i, :] @ K[i])[o*w_out + wo] for
    activations laid out as A[h, c*w_in + x].
    """
    cout, cin, kh, kw = w.shape
    band = np.zeros((kw, w_in, w_out), np.float32)
    for j in range(kw):
        band[j, np.arange(w_out) + j, np.arange(w_out)] = 1.0
    k = jnp.einsum("ocij,jxw->icxow", w, jnp.asarray(band))
    return k.reshape(kh, cin * w_in, cout * w_out)


def _pool_selectors(c, h, w):
    """0/1 selection matrices implementing 2x2/stride-2 max pool as matmuls."""
    hp, wp = h // 2, w // 2
    sv = np.zeros((2, hp, h), np.float32)            # left: even / odd rows
    sv[0, np.arange(hp), 2 * np.arange(hp)] = 1.0
    sv[1, np.arange(hp), 2 * np.arange(hp) + 1] = 1.0
    sh = np.zeros((2, c * w, c * wp), np.float32)    # right: even / odd cols per channel
    for ch in range(c):
        sh[0, ch * w + 2 * np.arange(wp), ch * wp + np.arange(wp)] = 1.0
        sh[1, ch * w + 2 * np.arange(wp) + 1, ch * wp + np.arange(wp)] = 1.0
    return sv, sh


def _pad_bias(b, n):
    return jnp.pad(b, (0, n - b.shape[0])).reshape(1, n).astype(jnp.float32)


def preprocess_params(params, dtype=COMPUTE_DTYPE):
    """One-time reshaping/padding of weights into lane-dense MXU operands."""
    sv1, sh1 = _pool_selectors(_C1, _H1, _W1)
    sv2, sh2 = _pool_selectors(_C2, _H2, _W2)

    # fc1 weight reordered to the kernel's (h, c*5+w) activation layout,
    # output dim zero-padded to 128 lanes.
    wf1 = params["fc1_w"].reshape(120, _C2, _P2H, _P2W)          # (k, c, h, w)
    wf1 = jnp.transpose(wf1, (2, 1, 3, 0)).reshape(_P2H, _C2 * _P2W, 120)
    wf1 = jnp.pad(wf1, ((0, 0), (0, 0), (0, _FPAD - 120)))

    def fc_pad(w):                                               # (out,in) -> (128,128)
        wt = w.T
        return jnp.pad(wt, ((0, _FPAD - wt.shape[0]), (0, _FPAD - wt.shape[1])))

    return (
        _conv_band_matrices(params["conv1_w"], _W0, _W1).astype(dtype),
        jnp.repeat(params["conv1_b"], _W1).reshape(1, _C1 * _W1).astype(jnp.float32),
        jnp.asarray(sv1, dtype), jnp.asarray(sh1, dtype),
        _conv_band_matrices(params["conv2_w"], _P1W, _W2).astype(dtype),
        jnp.repeat(params["conv2_b"], _W2).reshape(1, _C2 * _W2).astype(jnp.float32),
        jnp.asarray(sv2, dtype), jnp.asarray(sh2, dtype),
        wf1.astype(dtype), _pad_bias(params["fc1_b"], _FPAD),
        fc_pad(params["fc2_w"]).astype(dtype), _pad_bias(params["fc2_b"], _FPAD),
        fc_pad(params["fc_w"]).astype(dtype), _pad_bias(params["fc_b"], _FPAD),
    )


# ---------------------------------------------------------------------------
# Forward pass: one pallas_call, grid over the batch, minimal boundary glue
# ---------------------------------------------------------------------------
def lenet_forward(prep, x):
    """x: (N, 1, 32, 32) float32 NCHW -> (N, 10) logits."""
    n = x.shape[0]
    assert x.shape[1:] == (1, _H0, _W0), x.shape
    xk = x.reshape(n, _H0, _W0).astype(COMPUTE_DTYPE)
    out = pl.pallas_call(
        _lenet_fused_kernel,
        out_shape=jax.ShapeDtypeStruct((n, 1, _FPAD), jnp.float32),
        grid=(n,),
        in_specs=[pl.BlockSpec((None, _H0, _W0), lambda i: (i, 0, 0))]
                 + [_VMEM_SPEC] * len(prep),
        out_specs=pl.BlockSpec((None, 1, _FPAD), lambda i: (i, 0, 0)),
        scratch_shapes=[
            pltpu.VMEM((_P1H, _C1 * _P1W), COMPUTE_DTYPE),   # pool1 activations
            pltpu.VMEM((_P2H, _C2 * _P2W), COMPUTE_DTYPE),   # pool2 activations
        ],
        compiler_params=pltpu.CompilerParams(
            dimension_semantics=("parallel",)),
    )(xk, *prep)
    return out.reshape(n, _FPAD)[:, :10]


# ---------------------------------------------------------------------------
# Parameters + pure-JAX reference
# ---------------------------------------------------------------------------
def init_params(key):
    """PyTorch default U(-1/sqrt(fan_in), 1/sqrt(fan_in)) init."""
    def uni(k, shape, fan_in):
        bound = 1.0 / float(fan_in) ** 0.5
        return jax.random.uniform(k, shape, jnp.float32, -bound, bound)

    ks = jax.random.split(key, 10)
    return {
        "conv1_w": uni(ks[0], (16, 1, 5, 5), 1 * 5 * 5),
        "conv1_b": uni(ks[1], (16,), 1 * 5 * 5),
        "conv2_w": uni(ks[2], (32, 16, 5, 5), 16 * 5 * 5),
        "conv2_b": uni(ks[3], (32,), 16 * 5 * 5),
        "fc1_w":   uni(ks[4], (120, 32 * 5 * 5), 32 * 5 * 5),
        "fc1_b":   uni(ks[5], (120,), 32 * 5 * 5),
        "fc2_w":   uni(ks[6], (84, 120), 120),
        "fc2_b":   uni(ks[7], (84,), 120),
        "fc_w":    uni(ks[8], (10, 84), 84),
        "fc_b":    uni(ks[9], (10,), 84),
    }


def _reference_forward(params, x):
    dn = ("NCHW", "OIHW", "NCHW")
    y = jax.lax.conv_general_dilated(x, params["conv1_w"], (1, 1), "VALID",
                                     dimension_numbers=dn)
    y = jax.nn.relu(y + params["conv1_b"][None, :, None, None])
    n, c, h, w = y.shape
    y = y.reshape(n, c, h // 2, 2, w // 2, 2).max(axis=(3, 5))
    y = jax.lax.conv_general_dilated(y, params["conv2_w"], (1, 1), "VALID",
                                     dimension_numbers=dn)
    y = jax.nn.relu(y + params["conv2_b"][None, :, None, None])
    n, c, h, w = y.shape
    y = y.reshape(n, c, h // 2, 2, w // 2, 2).max(axis=(3, 5))
    y = y.reshape(n, _C2 * _P2H * _P2W)
    y = jax.nn.relu(y @ params["fc1_w"].T + params["fc1_b"])
    y = jax.nn.relu(y @ params["fc2_w"].T + params["fc2_b"])
    return y @ params["fc_w"].T + params["fc_b"]


if __name__ == "__main__":
    key = jax.random.PRNGKey(0)
    k_param, k_x = jax.random.split(key)
    params = init_params(k_param)
    x = jax.random.normal(k_x, (2, 1, 32, 32), dtype=jnp.float32)

    prep = preprocess_params(params)              # one-time weight preprocessing
    logits = jax.jit(lenet_forward)(prep, x)
    jax.block_until_ready(logits)
    assert logits.shape == (2, 10), logits.shape

    # sanity check the fused kernel against a pure-JAX reference (bf16-tolerant)
    ref = _reference_forward(params, x)
    max_err = float(jnp.max(jnp.abs(logits - ref)))
    assert max_err < 5e-2, f"kernel/reference mismatch: {max_err}"

    print("KERNEL_OK")
</pallas_src>

<mosaic_0001>
module attributes {stable_mosaic.version = 11 : i64} {
  func.func @_lenet_fused_kernel(%arg0: i32, %arg1: memref<1x32x32xbf16, #tpu.memory_space<vmem>>, %arg2: memref<5x32x448xbf16, #tpu.memory_space<vmem>>, %arg3: memref<1x448xf32, #tpu.memory_space<vmem>>, %arg4: memref<2x14x28xbf16, #tpu.memory_space<vmem>>, %arg5: memref<2x448x224xbf16, #tpu.memory_space<vmem>>, %arg6: memref<5x224x320xbf16, #tpu.memory_space<vmem>>, %arg7: memref<1x320xf32, #tpu.memory_space<vmem>>, %arg8: memref<2x5x10xbf16, #tpu.memory_space<vmem>>, %arg9: memref<2x320x160xbf16, #tpu.memory_space<vmem>>, %arg10: memref<5x160x128xbf16, #tpu.memory_space<vmem>>, %arg11: memref<1x128xf32, #tpu.memory_space<vmem>>, %arg12: memref<128x128xbf16, #tpu.memory_space<vmem>>, %arg13: memref<1x128xf32, #tpu.memory_space<vmem>>, %arg14: memref<128x128xbf16, #tpu.memory_space<vmem>>, %arg15: memref<1x128xf32, #tpu.memory_space<vmem>>, %arg16: memref<1x1x128xf32, #tpu.memory_space<vmem>>, %arg17: memref<14x224xbf16, #tpu.memory_space<vmem>>, %arg18: memref<5x160xbf16, #tpu.memory_space<vmem>>) attributes {dimension_semantics = [#tpu.dimension_semantics<parallel>], iteration_bounds = array<i64: 2>, scalar_prefetch = 0 : i64, scratch_operands = 2 : i64, tpu.core_type = #tpu.core_type<tc>, window_params = [{transform_indices = @transform_0, window_bounds = array<i64: 1, 32, 32>}, {pipeline_mode = #tpu.pipeline_mode<synchronous>, transform_indices = @transform_1, window_bounds = array<i64: 5, 32, 448>}, {pipeline_mode = #tpu.pipeline_mode<synchronous>, transform_indices = @transform_2, window_bounds = array<i64: 1, 448>}, {pipeline_mode = #tpu.pipeline_mode<synchronous>, transform_indices = @transform_3, window_bounds = array<i64: 2, 14, 28>}, {pipeline_mode = #tpu.pipeline_mode<synchronous>, transform_indices = @transform_4, window_bounds = array<i64: 2, 448, 224>}, {pipeline_mode = #tpu.pipeline_mode<synchronous>, transform_indices = @transform_5, window_bounds = array<i64: 5, 224, 320>}, {pipeline_mode = #tpu.pipeline_mode<synchronous>, transform_indices = @transform_6, window_bounds = array<i64: 1, 320>}, {pipeline_mode = #tpu.pipeline_mode<synchronous>, transform_indices = @transform_7, window_bounds = array<i64: 2, 5, 10>}, {pipeline_mode = #tpu.pipeline_mode<synchronous>, transform_indices = @transform_8, window_bounds = array<i64: 2, 320, 160>}, {pipeline_mode = #tpu.pipeline_mode<synchronous>, transform_indices = @transform_9, window_bounds = array<i64: 5, 160, 128>}, {pipeline_mode = #tpu.pipeline_mode<synchronous>, transform_indices = @transform_10, window_bounds = array<i64: 1, 128>}, {pipeline_mode = #tpu.pipeline_mode<synchronous>, transform_indices = @transform_11, window_bounds = array<i64: 128, 128>}, {pipeline_mode = #tpu.pipeline_mode<synchronous>, transform_indices = @transform_12, window_bounds = array<i64: 1, 128>}, {pipeline_mode = #tpu.pipeline_mode<synchronous>, transform_indices = @transform_13, window_bounds = array<i64: 128, 128>}, {pipeline_mode = #tpu.pipeline_mode<synchronous>, transform_indices = @transform_14, window_bounds = array<i64: 1, 128>}, {transform_indices = @transform_15, window_bounds = array<i64: 1, 1, 128>}]} {
    %cst = arith.constant 0.000000e+00 : f32
    %0 = vector.broadcast %cst : f32 to vector<28x448xf32>
    %c0 = arith.constant 0 : index
    %c0_0 = arith.constant 0 : index
    %c0_1 = arith.constant 0 : index
    %1 = vector.load %arg1[%c0, %c0_0, %c0_1] : memref<1x32x32xbf16, #tpu.memory_space<vmem>>, vector<1x28x32xbf16>
    %2 = vector.shape_cast %1 : vector<1x28x32xbf16> to vector<28x32xbf16>
    %c0_2 = arith.constant 0 : index
    %c0_3 = arith.constant 0 : index
    %c0_4 = arith.constant 0 : index
    %3 = vector.load %arg2[%c0_2, %c0_3, %c0_4] : memref<5x32x448xbf16, #tpu.memory_space<vmem>>, vector<1x32x448xbf16>
    %4 = vector.shape_cast %3 : vector<1x32x448xbf16> to vector<32x448xbf16>
    %cst_5 = arith.constant dense<0.000000e+00> : vector<28x448xf32>
    %5 = tpu.matmul %2, %4, %cst_5 {dimension_numbers = #tpu.dot_dimension_numbers<[1], [0], [0], [1], [0, 0, 1, 1], [], []>} : vector<28x32xbf16>, vector<32x448xbf16>, vector<28x448xf32> -> vector<28x448xf32>
    %6 = arith.addf %0, %5 : vector<28x448xf32>
    %c0_6 = arith.constant 0 : index
    %c1 = arith.constant 1 : index
    %c0_7 = arith.constant 0 : index
    %7 = vector.load %arg1[%c0_6, %c1, %c0_7] : memref<1x32x32xbf16, #tpu.memory_space<vmem>>, vector<1x28x32xbf16>
    %8 = vector.shape_cast %7 : vector<1x28x32xbf16> to vector<28x32xbf16>
    %c1_8 = arith.constant 1 : index
    %c0_9 = arith.constant 0 : index
    %c0_10 = arith.constant 0 : index
    %9 = vector.load %arg2[%c1_8, %c0_9, %c0_10] : memref<5x32x448xbf16, #tpu.memory_space<vmem>>, vector<1x32x448xbf16>
    %10 = vector.shape_cast %9 : vector<1x32x448xbf16> to vector<32x448xbf16>
    %cst_11 = arith.constant dense<0.000000e+00> : vector<28x448xf32>
    %11 = tpu.matmul %8, %10, %cst_11 {dimension_numbers = #tpu.dot_dimension_numbers<[1], [0], [0], [1], [0, 0, 1, 1], [], []>} : vector<28x32xbf16>, vector<32x448xbf16>, vector<28x448xf32> -> vector<28x448xf32>
    %12 = arith.addf %6, %11 : vector<28x448xf32>
    %c0_12 = arith.constant 0 : index
    %c2 = arith.constant 2 : index
    %c0_13 = arith.constant 0 : index
    %13 = vector.load %arg1[%c0_12, %c2, %c0_13] : memref<1x32x32xbf16, #tpu.memory_space<vmem>>, vector<1x28x32xbf16>
    %14 = vector.shape_cast %13 : vector<1x28x32xbf16> to vector<28x32xbf16>
    %c2_14 = arith.constant 2 : index
    %c0_15 = arith.constant 0 : index
    %c0_16 = arith.constant 0 : index
    %15 = vector.load %arg2[%c2_14, %c0_15, %c0_16] : memref<5x32x448xbf16, #tpu.memory_space<vmem>>, vector<1x32x448xbf16>
    %16 = vector.shape_cast %15 : vector<1x32x448xbf16> to vector<32x448xbf16>
    %cst_17 = arith.constant dense<0.000000e+00> : vector<28x448xf32>
    %17 = tpu.matmul %14, %16, %cst_17 {dimension_numbers = #tpu.dot_dimension_numbers<[1], [0], [0], [1], [0, 0, 1, 1], [], []>} : vector<28x32xbf16>, vector<32x448xbf16>, vector<28x448xf32> -> vector<28x448xf32>
    %18 = arith.addf %12, %17 : vector<28x448xf32>
    %c0_18 = arith.constant 0 : index
    %c3 = arith.constant 3 : index
    %c0_19 = arith.constant 0 : index
    %19 = vector.load %arg1[%c0_18, %c3, %c0_19] : memref<1x32x32xbf16, #tpu.memory_space<vmem>>, vector<1x28x32xbf16>
    %20 = vector.shape_cast %19 : vector<1x28x32xbf16> to vector<28x32xbf16>
    %c3_20 = arith.constant 3 : index
    %c0_21 = arith.constant 0 : index
    %c0_22 = arith.constant 0 : index
    %21 = vector.load %arg2[%c3_20, %c0_21, %c0_22] : memref<5x32x448xbf16, #tpu.memory_space<vmem>>, vector<1x32x448xbf16>
    %22 = vector.shape_cast %21 : vector<1x32x448xbf16> to vector<32x448xbf16>
    %cst_23 = arith.constant dense<0.000000e+00> : vector<28x448xf32>
    %23 = tpu.matmul %20, %22, %cst_23 {dimension_numbers = #tpu.dot_dimension_numbers<[1], [0], [0], [1], [0, 0, 1, 1], [], []>} : vector<28x32xbf16>, vector<32x448xbf16>, vector<28x448xf32> -> vector<28x448xf32>
    %24 = arith.addf %18, %23 : vector<28x448xf32>
    %c0_24 = arith.constant 0 : index
    %c4 = arith.constant 4 : index
    %c0_25 = arith.constant 0 : index
    %25 = vector.load %arg1[%c0_24, %c4, %c0_25] : memref<1x32x32xbf16, #tpu.memory_space<vmem>>, vector<1x28x32xbf16>
    %26 = vector.shape_cast %25 : vector<1x28x32xbf16> to vector<28x32xbf16>
    %c4_26 = arith.constant 4 : index
    %c0_27 = arith.constant 0 : index
    %c0_28 = arith.constant 0 : index
    %27 = vector.load %arg2[%c4_26, %c0_27, %c0_28] : memref<5x32x448xbf16, #tpu.memory_space<vmem>>, vector<1x32x448xbf16>
    %28 = vector.shape_cast %27 : vector<1x32x448xbf16> to vector<32x448xbf16>
    %cst_29 = arith.constant dense<0.000000e+00> : vector<28x448xf32>
    %29 = tpu.matmul %26, %28, %cst_29 {dimension_numbers = #tpu.dot_dimension_numbers<[1], [0], [0], [1], [0, 0, 1, 1], [], []>} : vector<28x32xbf16>, vector<32x448xbf16>, vector<28x448xf32> -> vector<28x448xf32>
    %30 = arith.addf %24, %29 : vector<28x448xf32>
    %c0_30 = arith.constant 0 : index
    %c0_31 = arith.constant 0 : index
    %31 = vector.load %arg3[%c0_30, %c0_31] : memref<1x448xf32, #tpu.memory_space<vmem>>, vector<1x448xf32>
    %32 = vector.broadcast %31 : vector<1x448xf32> to vector<28x448xf32>
    %33 = arith.addf %30, %32 : vector<28x448xf32>
    %cst_32 = arith.constant 0.000000e+00 : f32
    %34 = vector.broadcast %cst_32 : f32 to vector<28x448xf32>
    %35 = arith.maximumf %33, %34 : vector<28x448xf32>
    %36 = arith.truncf %35 : vector<28x448xf32> to vector<28x448xbf16>
    %c0_33 = arith.constant 0 : index
    %c0_34 = arith.constant 0 : index
    %c0_35 = arith.constant 0 : index
    %37 = vector.load %arg4[%c0_33, %c0_34, %c0_35] : memref<2x14x28xbf16, #tpu.memory_space<vmem>>, vector<1x14x28xbf16>
    %38 = vector.shape_cast %37 : vector<1x14x28xbf16> to vector<14x28xbf16>
    %cst_36 = arith.constant dense<0.000000e+00> : vector<14x448xf32>
    %39 = tpu.matmul %38, %36, %cst_36 {dimension_numbers = #tpu.dot_dimension_numbers<[1], [0], [0], [1], [0, 0, 1, 1], [], []>} : vector<14x28xbf16>, vector<28x448xbf16>, vector<14x448xf32> -> vector<14x448xf32>
    %c1_37 = arith.constant 1 : index
    %c0_38 = arith.constant 0 : index
    %c0_39 = arith.constant 0 : index
    %40 = vector.load %arg4[%c1_37, %c0_38, %c0_39] : memref<2x14x28xbf16, #tpu.memory_space<vmem>>, vector<1x14x28xbf16>
    %41 = vector.shape_cast %40 : vector<1x14x28xbf16> to vector<14x28xbf16>
    %cst_40 = arith.constant dense<0.000000e+00> : vector<14x448xf32>
    %42 = tpu.matmul %41, %36, %cst_40 {dimension_numbers = #tpu.dot_dimension_numbers<[1], [0], [0], [1], [0, 0, 1, 1], [], []>} : vector<14x28xbf16>, vector<28x448xbf16>, vector<14x448xf32> -> vector<14x448xf32>
    %43 = arith.maximumf %39, %42 : vector<14x448xf32>
    %44 = arith.truncf %43 : vector<14x448xf32> to vector<14x448xbf16>
    %c0_41 = arith.constant 0 : index
    %c0_42 = arith.constant 0 : index
    %c0_43 = arith.constant 0 : index
    %45 = vector.load %arg5[%c0_41, %c0_42, %c0_43] : memref<2x448x224xbf16, #tpu.memory_space<vmem>>, vector<1x448x224xbf16>
    %46 = vector.shape_cast %45 : vector<1x448x224xbf16> to vector<448x224xbf16>
    %cst_44 = arith.constant dense<0.000000e+00> : vector<14x224xf32>
    %47 = tpu.matmul %44, %46, %cst_44 {dimension_numbers = #tpu.dot_dimension_numbers<[1], [0], [0], [1], [0, 0, 1, 1], [], []>} : vector<14x448xbf16>, vector<448x224xbf16>, vector<14x224xf32> -> vector<14x224xf32>
    %c1_45 = arith.constant 1 : index
    %c0_46 = arith.constant 0 : index
    %c0_47 = arith.constant 0 : index
    %48 = vector.load %arg5[%c1_45, %c0_46, %c0_47] : memref<2x448x224xbf16, #tpu.memory_space<vmem>>, vector<1x448x224xbf16>
    %49 = vector.shape_cast %48 : vector<1x448x224xbf16> to vector<448x224xbf16>
    %cst_48 = arith.constant dense<0.000000e+00> : vector<14x224xf32>
    %50 = tpu.matmul %44, %49, %cst_48 {dimension_numbers = #tpu.dot_dimension_numbers<[1], [0], [0], [1], [0, 0, 1, 1], [], []>} : vector<14x448xbf16>, vector<448x224xbf16>, vector<14x224xf32> -> vector<14x224xf32>
    %51 = arith.maximumf %47, %50 : vector<14x224xf32>
    %52 = arith.truncf %51 : vector<14x224xf32> to vector<14x224xbf16>
    %c0_49 = arith.constant 0 : index
    %c0_50 = arith.constant 0 : index
    %53 = vector.load %arg17[%c0_49, %c0_50] : memref<14x224xbf16, #tpu.memory_space<vmem>>, vector<14x224xbf16>
    tpu.vector_store %arg17[%c0_49, %c0_50], %52 {strides = array<i32>} : memref<14x224xbf16, #tpu.memory_space<vmem>>, vector<14x224xbf16>,
    %cst_51 = arith.constant 0.000000e+00 : f32
    %54 = vector.broadcast %cst_51 : f32 to vector<10x320xf32>
    %c0_52 = arith.constant 0 : index
    %c0_53 = arith.constant 0 : index
    %55 = vector.load %arg17[%c0_52, %c0_53] : memref<14x224xbf16, #tpu.memory_space<vmem>>, vector<10x224xbf16>
    %c0_54 = arith.constant 0 : index
    %c0_55 = arith.constant 0 : index
    %c0_56 = arith.constant 0 : index
    %56 = vector.load %arg6[%c0_54, %c0_55, %c0_56] : memref<5x224x320xbf16, #tpu.memory_space<vmem>>, vector<1x224x320xbf16>
    %57 = vector.shape_cast %56 : vector<1x224x320xbf16> to vector<224x320xbf16>
    %cst_57 = arith.constant dense<0.000000e+00> : vector<10x320xf32>
    %58 = tpu.matmul %55, %57, %cst_57 {dimension_numbers = #tpu.dot_dimension_numbers<[1], [0], [0], [1], [0, 0, 1, 1], [], []>} : vector<10x224xbf16>, vector<224x320xbf16>, vector<10x320xf32> -> vector<10x320xf32>
    %59 = arith.addf %54, %58 : vector<10x320xf32>
    %c1_58 = arith.constant 1 : index
    %c0_59 = arith.constant 0 : index
    %60 = vector.load %arg17[%c1_58, %c0_59] : memref<14x224xbf16, #tpu.memory_space<vmem>>, vector<10x224xbf16>
    %c1_60 = arith.constant 1 : index
    %c0_61 = arith.constant 0 : index
    %c0_62 = arith.constant 0 : index
    %61 = vector.load %arg6[%c1_60, %c0_61, %c0_62] : memref<5x224x320xbf16, #tpu.memory_space<vmem>>, vector<1x224x320xbf16>
    %62 = vector.shape_cast %61 : vector<1x224x320xbf16> to vector<224x320xbf16>
    %cst_63 = arith.constant dense<0.000000e+00> : vector<10x320xf32>
    %63 = tpu.matmul %60, %62, %cst_63 {dimension_numbers = #tpu.dot_dimension_numbers<[1], [0], [0], [1], [0, 0, 1, 1], [], []>} : vector<10x224xbf16>, vector<224x320xbf16>, vector<10x320xf32> -> vector<10x320xf32>
    %64 = arith.addf %59, %63 : vector<10x320xf32>
    %c2_64 = arith.constant 2 : index
    %c0_65 = arith.constant 0 : index
    %65 = vector.load %arg17[%c2_64, %c0_65] : memref<14x224xbf16, #tpu.memory_space<vmem>>, vector<10x224xbf16>
    %c2_66 = arith.constant 2 : index
    %c0_67 = arith.constant 0 : index
    %c0_68 = arith.constant 0 : index
    %66 = vector.load %arg6[%c2_66, %c0_67, %c0_68] : memref<5x224x320xbf16, #tpu.memory_space<vmem>>, vector<1x224x320xbf16>
    %67 = vector.shape_cast %66 : vector<1x224x320xbf16> to vector<224x320xbf16>
    %cst_69 = arith.constant dense<0.000000e+00> : vector<10x320xf32>
    %68 = tpu.matmul %65, %67, %cst_69 {dimension_numbers = #tpu.dot_dimension_numbers<[1], [0], [0], [1], [0, 0, 1, 1], [], []>} : vector<10x224xbf16>, vector<224x320xbf16>, vector<10x320xf32> -> vector<10x320xf32>
    %69 = arith.addf %64, %68 : vector<10x320xf32>
    %c3_70 = arith.constant 3 : index
    %c0_71 = arith.constant 0 : index
    %70 = vector.load %arg17[%c3_70, %c0_71] : memref<14x224xbf16, #tpu.memory_space<vmem>>, vector<10x224xbf16>
    %c3_72 = arith.constant 3 : index
    %c0_73 = arith.constant 0 : index
    %c0_74 = arith.constant 0 : index
    %71 = vector.load %arg6[%c3_72, %c0_73, %c0_74] : memref<5x224x320xbf16, #tpu.memory_space<vmem>>, vector<1x224x320xbf16>
    %72 = vector.shape_cast %71 : vector<1x224x320xbf16> to vector<224x320xbf16>
    %cst_75 = arith.constant dense<0.000000e+00> : vector<10x320xf32>
    %73 = tpu.matmul %70, %72, %cst_75 {dimension_numbers = #tpu.dot_dimension_numbers<[1], [0], [0], [1], [0, 0, 1, 1], [], []>} : vector<10x224xbf16>, vector<224x320xbf16>, vector<10x320xf32> -> vector<10x320xf32>
    %74 = arith.addf %69, %73 : vector<10x320xf32>
    %c4_76 = arith.constant 4 : index
    %c0_77 = arith.constant 0 : index
    %75 = vector.load %arg17[%c4_76, %c0_77] : memref<14x224xbf16, #tpu.memory_space<vmem>>, vector<10x224xbf16>
    %c4_78 = arith.constant 4 : index
    %c0_79 = arith.constant 0 : index
    %c0_80 = arith.constant 0 : index
    %76 = vector.load %arg6[%c4_78, %c0_79, %c0_80] : memref<5x224x320xbf16, #tpu.memory_space<vmem>>, vector<1x224x320xbf16>
    %77 = vector.shape_cast %76 : vector<1x224x320xbf16> to vector<224x320xbf16>
    %cst_81 = arith.constant dense<0.000000e+00> : vector<10x320xf32>
    %78 = tpu.matmul %75, %77, %cst_81 {dimension_numbers = #tpu.dot_dimension_numbers<[1], [0], [0], [1], [0, 0, 1, 1], [], []>} : vector<10x224xbf16>, vector<224x320xbf16>, vector<10x320xf32> -> vector<10x320xf32>
    %79 = arith.addf %74, %78 : vector<10x320xf32>
    %c0_82 = arith.constant 0 : index
    %c0_83 = arith.constant 0 : index
    %80 = vector.load %arg7[%c0_82, %c0_83] : memref<1x320xf32, #tpu.memory_space<vmem>>, vector<1x320xf32>
    %81 = vector.broadcast %80 : vector<1x320xf32> to vector<10x320xf32>
    %82 = arith.addf %79, %81 : vector<10x320xf32>
    %cst_84 = arith.constant 0.000000e+00 : f32
    %83 = vector.broadcast %cst_84 : f32 to vector<10x320xf32>
    %84 = arith.maximumf %82, %83 : vector<10x320xf32>
    %85 = arith.truncf %84 : vector<10x320xf32> to vector<10x320xbf16>
    %c0_85 = arith.constant 0 : index
    %c0_86 = arith.constant 0 : index
    %c0_87 = arith.constant 0 : index
    %86 = vector.load %arg8[%c0_85, %c0_86, %c0_87] : memref<2x5x10xbf16, #tpu.memory_space<vmem>>, vector<1x5x10xbf16>
    %87 = vector.shape_cast %86 : vector<1x5x10xbf16> to vector<5x10xbf16>
    %cst_88 = arith.constant dense<0.000000e+00> : vector<5x320xf32>
    %88 = tpu.matmul %87, %85, %cst_88 {dimension_numbers = #tpu.dot_dimension_numbers<[1], [0], [0], [1], [0, 0, 1, 1], [], []>} : vector<5x10xbf16>, vector<10x320xbf16>, vector<5x320xf32> -> vector<5x320xf32>
    %c1_89 = arith.constant 1 : index
    %c0_90 = arith.constant 0 : index
    %c0_91 = arith.constant 0 : index
    %89 = vector.load %arg8[%c1_89, %c0_90, %c0_91] : memref<2x5x10xbf16, #tpu.memory_space<vmem>>, vector<1x5x10xbf16>
    %90 = vector.shape_cast %89 : vector<1x5x10xbf16> to vector<5x10xbf16>
    %cst_92 = arith.constant dense<0.000000e+00> : vector<5x320xf32>
    %91 = tpu.matmul %90, %85, %cst_92 {dimension_numbers = #tpu.dot_dimension_numbers<[1], [0], [0], [1], [0, 0, 1, 1], [], []>} : vector<5x10xbf16>, vector<10x320xbf16>, vector<5x320xf32> -> vector<5x320xf32>
    %92 = arith.maximumf %88, %91 : vector<5x320xf32>
    %93 = arith.truncf %92 : vector<5x320xf32> to vector<5x320xbf16>
    %c0_93 = arith.constant 0 : index
    %c0_94 = arith.constant 0 : index
    %c0_95 = arith.constant 0 : index
    %94 = vector.load %arg9[%c0_93, %c0_94, %c0_95] : memref<2x320x160xbf16, #tpu.memory_space<vmem>>, vector<1x320x160xbf16>
    %95 = vector.shape_cast %94 : vector<1x320x160xbf16> to vector<320x160xbf16>
    %cst_96 = arith.constant dense<0.000000e+00> : vector<5x160xf32>
    %96 = tpu.matmul %93, %95, %cst_96 {dimension_numbers = #tpu.dot_dimension_numbers<[1], [0], [0], [1], [0, 0, 1, 1], [], []>} : vector<5x320xbf16>, vector<320x160xbf16>, vector<5x160xf32> -> vector<5x160xf32>
    %c1_97 = arith.constant 1 : index
    %c0_98 = arith.constant 0 : index
    %c0_99 = arith.constant 0 : index
    %97 = vector.load %arg9[%c1_97, %c0_98, %c0_99] : memref<2x320x160xbf16, #tpu.memory_space<vmem>>, vector<1x320x160xbf16>
    %98 = vector.shape_cast %97 : vector<1x320x160xbf16> to vector<320x160xbf16>
    %cst_100 = arith.constant dense<0.000000e+00> : vector<5x160xf32>
    %99 = tpu.matmul %93, %98, %cst_100 {dimension_numbers = #tpu.dot_dimension_numbers<[1], [0], [0], [1], [0, 0, 1, 1], [], []>} : vector<5x320xbf16>, vector<320x160xbf16>, vector<5x160xf32> -> vector<5x160xf32>
    %100 = arith.maximumf %96, %99 : vector<5x160xf32>
    %101 = arith.truncf %100 : vector<5x160xf32> to vector<5x160xbf16>
    %c0_101 = arith.constant 0 : index
    %c0_102 = arith.constant 0 : index
    %102 = vector.load %arg18[%c0_101, %c0_102] : memref<5x160xbf16, #tpu.memory_space<vmem>>, vector<5x160xbf16>
    tpu.vector_store %arg18[%c0_101, %c0_102], %101 {strides = array<i32>} : memref<5x160xbf16, #tpu.memory_space<vmem>>, vector<5x160xbf16>,
    %cst_103 = arith.constant 0.000000e+00 : f32
    %103 = vector.broadcast %cst_103 : f32 to vector<1x128xf32>
    %c0_104 = arith.constant 0 : index
    %c0_105 = arith.constant 0 : index
    %104 = vector.load %arg18[%c0_104, %c0_105] : memref<5x160xbf16, #tpu.memory_space<vmem>>, vector<1x160xbf16>
    %c0_106 = arith.constant 0 : index
    %c0_107 = arith.constant 0 : index
    %c0_108 = arith.constant 0 : index
    %105 = vector.load %arg10[%c0_106, %c0_107, %c0_108] : memref<5x160x128xbf16, #tpu.memory_space<vmem>>, vector<1x160x128xbf16>
    %106 = vector.shape_cast %105 : vector<1x160x128xbf16> to vector<160x128xbf16>
    %cst_109 = arith.constant dense<0.000000e+00> : vector<1x128xf32>
    %107 = tpu.matmul %104, %106, %cst_109 {dimension_numbers = #tpu.dot_dimension_numbers<[1], [0], [0], [1], [0, 0, 1, 1], [], []>} : vector<1x160xbf16>, vector<160x128xbf16>, vector<1x128xf32> -> vector<1x128xf32>
    %108 = arith.addf %103, %107 : vector<1x128xf32>
    %c1_110 = arith.constant 1 : index
    %c0_111 = arith.constant 0 : index
    %109 = vector.load %arg18[%c1_110, %c0_111] : memref<5x160xbf16, #tpu.memory_space<vmem>>, vector<1x160xbf16>
    %c1_112 = arith.constant 1 : index
    %c0_113 = arith.constant 0 : index
    %c0_114 = arith.constant 0 : index
    %110 = vector.load %arg10[%c1_112, %c0_113, %c0_114] : memref<5x160x128xbf16, #tpu.memory_space<vmem>>, vector<1x160x128xbf16>
    %111 = vector.shape_cast %110 : vector<1x160x128xbf16> to vector<160x128xbf16>
    %cst_115 = arith.constant dense<0.000000e+00> : vector<1x128xf32>
    %112 = tpu.matmul %109, %111, %cst_115 {dimension_numbers = #tpu.dot_dimension_numbers<[1], [0], [0], [1], [0, 0, 1, 1], [], []>} : vector<1x160xbf16>, vector<160x128xbf16>, vector<1x128xf32> -> vector<1x128xf32>
    %113 = arith.addf %108, %112 : vector<1x128xf32>
    %c2_116 = arith.constant 2 : index
    %c0_117 = arith.constant 0 : index
    %114 = vector.load %arg18[%c2_116, %c0_117] : memref<5x160xbf16, #tpu.memory_space<vmem>>, vector<1x160xbf16>
    %c2_118 = arith.constant 2 : index
    %c0_119 = arith.constant 0 : index
    %c0_120 = arith.constant 0 : index
    %115 = vector.load %arg10[%c2_118, %c0_119, %c0_120] : memref<5x160x128xbf16, #tpu.memory_space<vmem>>, vector<1x160x128xbf16>
    %116 = vector.shape_cast %115 : vector<1x160x128xbf16> to vector<160x128xbf16>
    %cst_121 = arith.constant dense<0.000000e+00> : vector<1x128xf32>
    %117 = tpu.matmul %114, %116, %cst_121 {dimension_numbers = #tpu.dot_dimension_numbers<[1], [0], [0], [1], [0, 0, 1, 1], [], []>} : vector<1x160xbf16>, vector<160x128xbf16>, vector<1x128xf32> -> vector<1x128xf32>
    %118 = arith.addf %113, %117 : vector<1x128xf32>
    %c3_122 = arith.constant 3 : index
    %c0_123 = arith.constant 0 : index
    %119 = vector.load %arg18[%c3_122, %c0_123] : memref<5x160xbf16, #tpu.memory_space<vmem>>, vector<1x160xbf16>
    %c3_124 = arith.constant 3 : index
    %c0_125 = arith.constant 0 : index
    %c0_126 = arith.constant 0 : index
    %120 = vector.load %arg10[%c3_124, %c0_125, %c0_126] : memref<5x160x128xbf16, #tpu.memory_space<vmem>>, vector<1x160x128xbf16>
    %121 = vector.shape_cast %120 : vector<1x160x128xbf16> to vector<160x128xbf16>
    %cst_127 = arith.constant dense<0.000000e+00> : vector<1x128xf32>
    %122 = tpu.matmul %119, %121, %cst_127 {dimension_numbers = #tpu.dot_dimension_numbers<[1], [0], [0], [1], [0, 0, 1, 1], [], []>} : vector<1x160xbf16>, vector<160x128xbf16>, vector<1x128xf32> -> vector<1x128xf32>
    %123 = arith.addf %118, %122 : vector<1x128xf32>
    %c4_128 = arith.constant 4 : index
    %c0_129 = arith.constant 0 : index
    %124 = vector.load %arg18[%c4_128, %c0_129] : memref<5x160xbf16, #tpu.memory_space<vmem>>, vector<1x160xbf16>
    %c4_130 = arith.constant 4 : index
    %c0_131 = arith.constant 0 : index
    %c0_132 = arith.constant 0 : index
    %125 = vector.load %arg10[%c4_130, %c0_131, %c0_132] : memref<5x160x128xbf16, #tpu.memory_space<vmem>>, vector<1x160x128xbf16>
    %126 = vector.shape_cast %125 : vector<1x160x128xbf16> to vector<160x128xbf16>
    %cst_133 = arith.constant dense<0.000000e+00> : vector<1x128xf32>
    %127 = tpu.matmul %124, %126, %cst_133 {dimension_numbers = #tpu.dot_dimension_numbers<[1], [0], [0], [1], [0, 0, 1, 1], [], []>} : vector<1x160xbf16>, vector<160x128xbf16>, vector<1x128xf32> -> vector<1x128xf32>
    %128 = arith.addf %123, %127 : vector<1x128xf32>
    %c0_134 = arith.constant 0 : index
    %c0_135 = arith.constant 0 : index
    %129 = vector.load %arg11[%c0_134, %c0_135] : memref<1x128xf32, #tpu.memory_space<vmem>>, vector<1x128xf32>
    %130 = arith.addf %128, %129 : vector<1x128xf32>
    %cst_136 = arith.constant 0.000000e+00 : f32
    %131 = vector.broadcast %cst_136 : f32 to vector<1x128xf32>
    %132 = arith.maximumf %130, %131 : vector<1x128xf32>
    %133 = arith.truncf %132 : vector<1x128xf32> to vector<1x128xbf16>
    %c0_137 = arith.constant 0 : index
    %c0_138 = arith.constant 0 : index
    %134 = vector.load %arg12[%c0_137, %c0_138] : memref<128x128xbf16, #tpu.memory_space<vmem>>, vector<128x128xbf16>
    %cst_139 = arith.constant dense<0.000000e+00> : vector<1x128xf32>
    %135 = tpu.matmul %133, %134, %cst_139 {dimension_numbers = #tpu.dot_dimension_numbers<[1], [0], [0], [1], [0, 0, 1, 1], [], []>} : vector<1x128xbf16>, vector<128x128xbf16>, vector<1x128xf32> -> vector<1x128xf32>
    %c0_140 = arith.constant 0 : index
    %c0_141 = arith.constant 0 : index
    %136 = vector.load %arg13[%c0_140, %c0_141] : memref<1x128xf32, #tpu.memory_space<vmem>>, vector<1x128xf32>
    %137 = arith.addf %135, %136 : vector<1x128xf32>
    %cst_142 = arith.constant 0.000000e+00 : f32
    %138 = vector.broadcast %cst_142 : f32 to vector<1x128xf32>
    %139 = arith.maximumf %137, %138 : vector<1x128xf32>
    %140 = arith.truncf %139 : vector<1x128xf32> to vector<1x128xbf16>
    %c0_143 = arith.constant 0 : index
    %c0_144 = arith.constant 0 : index
    %141 = vector.load %arg14[%c0_143, %c0_144] : memref<128x128xbf16, #tpu.memory_space<vmem>>, vector<128x128xbf16>
    %cst_145 = arith.constant dense<0.000000e+00> : vector<1x128xf32>
    %142 = tpu.matmul %140, %141, %cst_145 {dimension_numbers = #tpu.dot_dimension_numbers<[1], [0], [0], [1], [0, 0, 1, 1], [], []>} : vector<1x128xbf16>, vector<128x128xbf16>, vector<1x128xf32> -> vector<1x128xf32>
    %c0_146 = arith.constant 0 : index
    %c0_147 = arith.constant 0 : index
    %143 = vector.load %arg15[%c0_146, %c0_147] : memref<1x128xf32, #tpu.memory_space<vmem>>, vector<1x128xf32>
    %144 = arith.addf %142, %143 : vector<1x128xf32>
    %c0_148 = arith.constant 0 : index
    %c0_149 = arith.constant 0 : index
    %c0_150 = arith.constant 0 : index
    %145 = vector.load %arg16[%c0_148, %c0_149, %c0_150] : memref<1x1x128xf32, #tpu.memory_space<vmem>>, vector<1x1x128xf32>
    %146 = vector.shape_cast %145 : vector<1x1x128xf32> to vector<1x128xf32>
    %147 = vector.shape_cast %144 : vector<1x128xf32> to vector<1x1x128xf32>
    tpu.vector_store %arg16[%c0_148, %c0_149, %c0_150], %147 {strides = array<i32>} : memref<1x1x128xf32, #tpu.memory_space<vmem>>, vector<1x1x128xf32>,
    return
  }
  func.func @transform_0(%arg0: i32) -> (i32, i32, i32) {
    %c0_i32 = arith.constant 0 : i32
    %c0_i32_0 = arith.constant 0 : i32
    %c0_i32_1 = arith.constant 0 : i32
    return %arg0, %c0_i32, %c0_i32_0 : i32, i32, i32
  }
  func.func @transform_1(%arg0: i32) -> (i32, i32, i32) {
    %c0_i32 = arith.constant 0 : i32
    %c0_i32_0 = arith.constant 0 : i32
    %c0_i32_1 = arith.constant 0 : i32
    %c0_i32_2 = arith.constant 0 : i32
    return %c0_i32, %c0_i32_0, %c0_i32_1 : i32, i32, i32
  }
  func.func @transform_2(%arg0: i32) -> (i32, i32) {
    %c0_i32 = arith.constant 0 : i32
    %c0_i32_0 = arith.constant 0 : i32
    %c0_i32_1 = arith.constant 0 : i32
    return %c0_i32, %c0_i32_0 : i32, i32
  }
  func.func @transform_3(%arg0: i32) -> (i32, i32, i32) {
    %c0_i32 = arith.constant 0 : i32
    %c0_i32_0 = arith.constant 0 : i32
    %c0_i32_1 = arith.constant 0 : i32
    %c0_i32_2 = arith.constant 0 : i32
    return %c0_i32, %c0_i32_0, %c0_i32_1 : i32, i32, i32
  }
  func.func @transform_4(%arg0: i32) -> (i32, i32, i32) {
    %c0_i32 = arith.constant 0 : i32
    %c0_i32_0 = arith.constant 0 : i32
    %c0_i32_1 = arith.constant 0 : i32
    %c0_i32_2 = arith.constant 0 : i32
    return %c0_i32, %c0_i32_0, %c0_i32_1 : i32, i32, i32
  }
  func.func @transform_5(%arg0: i32) -> (i32, i32, i32) {
    %c0_i32 = arith.constant 0 : i32
    %c0_i32_0 = arith.constant 0 : i32
    %c0_i32_1 = arith.constant 0 : i32
    %c0_i32_2 = arith.constant 0 : i32
    return %c0_i32, %c0_i32_0, %c0_i32_1 : i32, i32, i32
  }
  func.func @transform_6(%arg0: i32) -> (i32, i32) {
    %c0_i32 = arith.constant 0 : i32
    %c0_i32_0 = arith.constant 0 : i32
    %c0_i32_1 = arith.constant 0 : i32
    return %c0_i32, %c0_i32_0 : i32, i32
  }
  func.func @transform_7(%arg0: i32) -> (i32, i32, i32) {
    %c0_i32 = arith.constant 0 : i32
    %c0_i32_0 = arith.constant 0 : i32
    %c0_i32_1 = arith.constant 0 : i32
    %c0_i32_2 = arith.constant 0 : i32
    return %c0_i32, %c0_i32_0, %c0_i32_1 : i32, i32, i32
  }
  func.func @transform_8(%arg0: i32) -> (i32, i32, i32) {
    %c0_i32 = arith.constant 0 : i32
    %c0_i32_0 = arith.constant 0 : i32
    %c0_i32_1 = arith.constant 0 : i32
    %c0_i32_2 = arith.constant 0 : i32
    return %c0_i32, %c0_i32_0, %c0_i32_1 : i32, i32, i32
  }
  func.func @transform_9(%arg0: i32) -> (i32, i32, i32) {
    %c0_i32 = arith.constant 0 : i32
    %c0_i32_0 = arith.constant 0 : i32
    %c0_i32_1 = arith.constant 0 : i32
    %c0_i32_2 = arith.constant 0 : i32
    return %c0_i32, %c0_i32_0, %c0_i32_1 : i32, i32, i32
  }
  func.func @transform_10(%arg0: i32) -> (i32, i32) {
    %c0_i32 = arith.constant 0 : i32
    %c0_i32_0 = arith.constant 0 : i32
    %c0_i32_1 = arith.constant 0 : i32
    return %c0_i32, %c0_i32_0 : i32, i32
  }
  func.func @transform_11(%arg0: i32) -> (i32, i32) {
    %c0_i32 = arith.constant 0 : i32
    %c0_i32_0 = arith.constant 0 : i32
    %c0_i32_1 = arith.constant 0 : i32
    return %c0_i32, %c0_i32_0 : i32, i32
  }
  func.func @transform_12(%arg0: i32) -> (i32, i32) {
    %c0_i32 = arith.constant 0 : i32
    %c0_i32_0 = arith.constant 0 : i32
    %c0_i32_1 = arith.constant 0 : i32
    return %c0_i32, %c0_i32_0 : i32, i32
  }
  func.func @transform_13(%arg0: i32) -> (i32, i32) {
    %c0_i32 = arith.constant 0 : i32
    %c0_i32_0 = arith.constant 0 : i32
    %c0_i32_1 = arith.constant 0 : i32
    return %c0_i32, %c0_i32_0 : i32, i32
  }
  func.func @transform_14(%arg0: i32) -> (i32, i32) {
    %c0_i32 = arith.constant 0 : i32
    %c0_i32_0 = arith.constant 0 : i32
    %c0_i32_1 = arith.constant 0 : i32
    return %c0_i32, %c0_i32_0 : i32, i32
  }
  func.func @transform_15(%arg0: i32) -> (i32, i32, i32) {
    %c0_i32 = arith.constant 0 : i32
    %c0_i32_0 = arith.constant 0 : i32
    %c0_i32_1 = arith.constant 0 : i32
    return %arg0, %c0_i32, %c0_i32_0 : i32, i32, i32
  }
}

</mosaic_0001>

<bundles_post_ra>
// kernel: lenet_forward.1
= control target key start
LH: loop header
LB: loop body
LE: loop exit
PB: predicated region body
PF: predicated region fallthrough
CT: control target
= control target key end

     0   :  { %20 = vsyncpa [#allocation5], 0  ;;  %s10442_s0 = inlined_call_operand.vmem [shape: bf16[2,32,32], index: 0, kind: input, shape index: {}]   ;;  %s10443_s1 = inlined_call_operand.vmem [shape: bf16[5,32,448], index: 1, kind: input, shape index: {}]   ;;  %s10444_s2 = inlined_call_operand.vmem [shape: f32[1,448], index: 2, kind: input, shape index: {}]   ;;  %s10445_s3 = inlined_call_operand.vmem [shape: bf16[2,14,28], index: 3, kind: input, shape index: {}]   ;;  %s10446_s4 = inlined_call_operand.vmem [shape: bf16[2,448,224], index: 4, kind: input, shape index: {}]   ;;  %s10447_s5 = inlined_call_operand.vmem [shape: bf16[5,224,320], index: 5, kind: input, shape index: {}]   ;;  %s10448_s6 = inlined_call_operand.vmem [shape: f32[1,320], index: 6, kind: input, shape index: {}]   ;;  %s10449_s7 = inlined_call_operand.vmem [shape: bf16[2,5,10], index: 7, kind: input, shape index: {}]   ;;  %s10450_s8 = inlined_call_operand.vmem [shape: bf16[2,320,160], index: 8, kind: input, shape index: {}]   ;;  %s10451_s9 = inlined_call_operand.vmem [shape: bf16[5,160,128], index: 9, kind: input, shape index: {}]   ;;  %s10452_s10 = inlined_call_operand.vmem [shape: f32[1,128], index: 10, kind: input, shape index: {}]   ;;  %s10453_s11 = inlined_call_operand.vmem [shape: bf16[128,128], index: 11, kind: input, shape index: {}]   ;;  %s10454_s12 = inlined_call_operand.vmem [shape: f32[1,128], index: 12, kind: input, shape index: {}]   ;;  %s10455_s13 = inlined_call_operand.vmem [shape: bf16[128,128], index: 13, kind: input, shape index: {}]   ;;  %s10456_s14 = inlined_call_operand.vmem [shape: f32[1,128], index: 14, kind: input, shape index: {}]   ;;  %s10457_s15 = inlined_call_operand.hbm [shape: f32[2,1,128], index: 15, kind: output, shape index: {}]  }
   0x1   :  { %22 = vsyncpa [#allocation5 + $0x1], 0  ;;  %s8450_s18 = smov 0   ;;  %s8452_s19 = smov 0  }
   0x2   :  { %s8454_s20 = smov 0   ;;  %s8456_s21 = smov 0  }
   0x3 LB: > { %10464 = sst [smem:[#allocation7_spill]] %s8352_s18  ;;  %s8471_s22 = sadd.s32 4294967295, %s8364_s21   ;;  %s8364_s21 = sphi %s8456_s21, %s10477_s21   ;;  %s8360_s20 = sphi %s8454_s20, %s10479_s20   ;;  %s8356_s19 = sphi %s8452_s19, %s10481_s19   ;;  %s8352_s18 = sphi %s8450_s18, %s10480_s18  }
   0x4   : > { %10465 = sst [smem:[#allocation8_spill]] %s8360_s20  ;;  %s6336_s23 = sadd.s32 4294967294, %s8364_s21  }
   0x5   : > { %10466 = sst [smem:[#allocation9_spill]] %s8364_s21  ;;  %s8475_s24 = sadd.s32 1, %s8364_s21  }
   0x6   : > { %10467 = sst [smem:[#allocation10_spill]] %s8475_s24  ;;  %s355_s25 = sadd.s32 1, %s8360_s20 }
   0x7   : > { %s352_s26 = ssub.s32 %s8364_s21, %s8475_s24  ;;  %p365_p0 = scmp.ne.s32.totalorder %s8360_s20, %s8356_s19 }
   0x8   : > { %p353_p1 = scmp.eq.s32.totalorder %s352_s26, 0  ;;  %p366_p2 = scmp.eq.s32.totalorder %s8471_s22, 1 }
   0x9   : > { %p371_p3 = scmp.ne.s32.totalorder %s8356_s19, %s8352_s18  ;;  %p372_p4 = scmp.eq.s32.totalorder %s6336_s23, 1 }
   0xa   : > { %s8486_s27 = scalar_select %p353_p1, %s8360_s20, %s355_s25  }
   0xb   : > { %p8488_p5 = por %p366_p2, %p365_p0  ;;  %p8492_p6 = por %p372_p4, %p371_p3 }
   0xc   : > { %10468 = sst [smem:[#allocation11_spill]] %s8486_s27  ;;  %p6339_p7 = scmp.ge.s32.totalorder %s8364_s21, 1 }
   0xd   : > { %s10470_s29 = scalar_select %p8492_p6, 1, 0 }
   0xe   : > { %p440_p8 = scmp.lt.s32.totalorder %s8364_s21, 3 }
   0xf   : > { %10471 = sst [smem:[#allocation12_spill]] %s10470_s29 }
  0x10   : > { %p441_p9 = pnand %p6339_p7, %p440_p8 }
  0x11   : > { %v7584_v0 = vld [vmem:[%s10443_s1 + $0xc] ss:$16 sps:$4 sm:$0xff] (!%p441_p9)   ;;  %p487_p10 = scmp.lt.s32.totalorder (!%p441_p9), %s8471_s22, 1  ;;  %v7586_v1 = vld [vmem:[%s10443_s1 + $0x8] ss:$16 sps:$4 sm:$0xff] (!%p441_p9)   ;;  %v8366_v2 = vmov (!%p441_p9), 0  }
  0x12   : > { %444 = sbr.rel (%p441_p9) target bundleno = 2532 (0x9e4), region = 80  ;;  %827 = vmatprep.mubr.bf16.mxu1 (!%p441_p9), %v8366_v2  ;;  %620 = vmatprep.mubr.bf16.mxu0 (!%p441_p9), %v8366_v2  ;;  %v7587_v3 = vld [vmem:[%s10443_s1 + $0x2c] ss:$16 sps:$4 sm:$0xff] (!%p441_p9)   ;;  %v7589_v4 = vld [vmem:[%s10443_s1 + $0x44] ss:$16 sps:$4 sm:$0xff] (!%p441_p9)   ;;  %vm581_vm0 = vcmask (!%p441_p9), 261120  }
  0x13   : > { %795 = vmatprep.subr.bf16.mxu1 (!%p441_p9), %v7584_v0  ;;  %v7591_v5 = vld [vmem:[%s10443_s1 + $0x28] ss:$16 sps:$4 sm:$0xff] (!%p441_p9)   ;;  %v7592_v6 = vld [vmem:[%s10443_s1 + $0x40] ss:$16 sps:$4 sm:$0xff] (!%p441_p9)   ;;  %v7596_v7 = vld [vmem:[%s10443_s1 + $0x64] ss:$16 sps:$4 sm:$0xff] (!%p441_p9)   ;;  %588 = vmatprep.subr.bf16.mxu0 (!%p441_p9), %v7589_v4 }
  0x14   : > { %796 = vmatpush1.bf16.msra.mxu1 (!%p441_p9), %v7586_v1  ;;  %589 = vmatpush1.bf16.msra.mxu0 (!%p441_p9), %v7592_v6  ;;  %v7598_v10 = vld [vmem:[%s10443_s1 + $0x60] ss:$16 sps:$4 sm:$0xff] (!%p441_p9)   ;;  %vm525_vm1 = vsmask.f32 (!%p441_p9), 7424  ;;  %v7602_v15 = vld [vmem:[%s10443_s1 + $0x88] ss:$16 sps:$4 sm:$0xff] (!%p441_p9)  }
  0x15   : > { %797 = vmatprep.subr.bf16.mxu1 (!%p441_p9), %v7587_v3  ;;  %590 = vmatprep.subr.bf16.mxu0 (!%p441_p9), %v7596_v7  ;;  %v7604_v18 = vld [vmem:[%s10443_s1 + $0x8c] ss:$16 sps:$4 sm:$0xff] (!%p441_p9)   ;;  %v7608_v25 = vld [vmem:[%s10443_s1 + $0xa8] ss:$16 sps:$4 sm:$0xff] (!%p441_p9)   ;;  %v7619_v36 = vld [vmem:[%s10443_s1 + $0x4] ss:$16 sps:$4 sm:$0xff] (!%p441_p9)  }
  0x16   : > { %v7607_v21 = vld [vmem:[%s10443_s1 + $0x4c] ss:$16 sps:$4 sm:$0xff] (!%p441_p9)   ;;  %v7605_v28 = vld [vmem:[%s10443_s1 + $0x48] ss:$16 sps:$4 sm:$0xff] (!%p441_p9)   ;;  %vm861_vm2 = vcmask (!%p441_p9), 1046528   ;;  %vm1245_vm4 = vcmask (!%p441_p9), 1045504  }
  0x17   : > { %v7610_v26 = vld [vmem:[%s10443_s1 + $0xac] ss:$16 sps:$4 sm:$0xff] (!%p441_p9)   ;;  %v7611_v35 = vld [vmem:[%s10443_s1 + $0x68] ss:$16 sps:$4 sm:$0xff] (!%p441_p9)   ;;  %v7617_v52 = vld [vmem:[%s10443_s1] ss:$16 sps:$4 sm:$0xff] (!%p441_p9)  }
  0x18   : > { %798 = vmatpush1.bf16.msra.mxu1 (!%p441_p9), %v7591_v5  ;;  %591 = vmatpush1.bf16.msra.mxu0 (!%p441_p9), %v7598_v10  ;;  %v7613_v30 = vld [vmem:[%s10443_s1 + $0x6c] ss:$16 sps:$4 sm:$0xff] (!%p441_p9)   ;;  %v7614_v43 = vld [vmem:[%s10443_s1 + $0xc8] ss:$16 sps:$4 sm:$0xff] (!%p441_p9)   ;;  %v7625_v54 = vld [vmem:[%s10443_s1 + $0x24] ss:$16 sps:$4 sm:$0xff] (!%p441_p9)  }
  0x19   : > { %s488_s27 = scalar_select %p487_p10, %s8471_s22, 1  ;;  %964 = vmatprep.subr.bf16.mxu1 %v7604_v18  ;;  %641 = vmatprep.subr.bf16.mxu0 %v7607_v21  ;;  %v7616_v33 = vld [vmem:[%s10443_s1 + $0xcc] ss:$16 sps:$4 sm:$0xff]   ;;  %v7620_v47 = vld [vmem:[%s10443_s1 + $0xe8] ss:$16 sps:$4 sm:$0xff]   ;;  %vm1486_vm5 = vcmask 228352  }
  0x1a   : > { %v7622_v44 = vld [vmem:[%s10443_s1 + $0xec] ss:$16 sps:$4 sm:$0xff]   ;;  %v7623_v57 = vld [vmem:[%s10443_s1 + $0x20] ss:$16 sps:$4 sm:$0xff]   ;;  %v7631_v58 = vld [vmem:[%s10443_s1 + $0x84] ss:$16 sps:$4 sm:$0xff]  }
  0x1b   : > { %s7368_s29 = sshll.u32 %s488_s27, 4  ;;  %v7628_v51 = vld [vmem:[%s10443_s1 + $0x10c] ss:$16 sps:$4 sm:$0xff]   ;;  %vm1046_vm3 = vsmask.f32 6400  ;;  %vm2034_vm6 = vcmask 523264  }
  0x1c   : > { %s8526_s30 = scalar_lea.vmem %s10442_s0, %s7368_s29  ;;  %v7626_v61 = vld [vmem:[%s10443_s1 + $0x108] ss:$16 sps:$4 sm:$0xff]   ;;  %v7634_v62 = vld [vmem:[%s10443_s1 + $0x12c] ss:$16 sps:$4 sm:$0xff]   ;;  %v7629_v3 = vld [vmem:[%s10443_s1 + $0x80] ss:$16 sps:$4 sm:$0xff]  }
  0x1d   : > { %v493_v8 = vld [vmem:[%s8526_s30] sm:$0xf]  ;;  %v8530_v9 = vld [vmem:[%s8526_s30 + $0x4] sm:$0xf]  ;;  %v495_v12 = vld [vmem:[%s8526_s30 + $0x8] sm:$0xf] }
  0x1e   : > { %v8536_v11 = vcombine.low %v493_v8, %v8530_v9  ;;  %v505_v13 = vld [vmem:[%s8526_s30 + $0xc] sm:$0x7]  ;;  %v848_v19 = vld [vmem:[%s8526_s30] sm:$0xe]  ;;  %v7632_v0 = vld [vmem:[%s10443_s1 + $0x128] ss:$16 sps:$4 sm:$0xff]  }
  0x1f   : > { %v6351_v14 = vcombine.low %v495_v12, %v505_v13  ;;  %v496_v23 = vld [vmem:[%s8526_s30 + $0xc] sm:$0x3]  ;;  %v6385_v31 = vcombine.low %v848_v19, %v8530_v9  ;;  %v1232_v1 = vld [vmem:[%s8526_s30] sm:$0xc]  ;;  %v7637_v4 = vld [vmem:[%s10443_s1 + $0xa4] ss:$16 sps:$4 sm:$0xff]  }
  0x20   : > { %v527_v16 = vshrl.u32 %v8536_v11, 16  ;;  %v529_v17 = vshll.u32 %v8536_v11, 16  ;;  %6375 = vmatmul.mubr.msk.bf16.vlgmr.msra.gmra.mrb[0].mxu1 %vm581_vm0, %v8536_v11  ;;  %v8565_v29 = vcombine.low %v495_v12, %v496_v23  ;;  %v1033_v39 = vld [vmem:[%s8526_s30 + $0xc] sm:$0xf]  ;;  %v6427_v5 = vcombine.low %v1232_v1, %v8530_v9  ;;  %v7635_v6 = vld [vmem:[%s10443_s1 + $0xa0] ss:$16 sps:$4 sm:$0xff]  }
  0x21   : > { %v534_v20 = vshll.u32 %v6351_v14, 16  ;;  %837 = vmatprep.mubr.bf16.mxu1 %v8366_v2  ;;  %965 = vmatpush1.bf16.msra.mxu1 %v7602_v15  ;;  %v538_v34 = vshrl.u32 %v6351_v14, 16  ;;  %v862_v37 = vrot.slane %v6385_v31, 1  ;;  %v8586_v38 = vrot.slane %v6351_v14, 1  ;;  %v7640_v7 = vld [vmem:[%s10443_s1 + $0xc4] ss:$16 sps:$4 sm:$0xff]  }
  0x22   : > { %v531_v22 = vrot.slane %v529_v17, 1  ;;  %966 = vmatprep.subr.bf16.mxu1 %v7610_v26  ;;  %v6406_v41 = vcombine.low %v495_v12, %v1033_v39  ;;  %v1048_v45 = vshrl.u32 %v6385_v31, 16  ;;  %v1051_v46 = vshll.u32 %v6385_v31, 16  ;;  %v7643_v12 = vld [vmem:[%s10443_s1 + $0xe4] ss:$16 sps:$4 sm:$0xff]   ;;  %s485_s18 = sand.u32 1, %s8356_s19  }
  0x23   : > { %v536_v24 = vrot.slane %v534_v20, 1  ;;  %v8590_v42 = vsel %vm861_vm2, %v862_v37, %v8586_v38  ;;  %v1246_v8 = vrot.slane %v6427_v5, 2  ;;  %v7641_v13 = vld [vmem:[%s10443_s1 + $0xe0] ss:$16 sps:$4 sm:$0xff]   ;;  %v7646_v14 = vld [vmem:[%s10443_s1 + $0x104] ss:$16 sps:$4 sm:$0xff]   ;;  %v1419_v26 = vlaneseq }
  0x24   : > { %v532_v27 = vor.u32 %v531_v22, %v527_v16  ;;  %v1056_v48 = vshrl.u32 %v6406_v41, 16  ;;  %v1059_v49 = vshll.u32 %v6406_v41, 16  ;;  %v1050_v50 = vrot.slane %v1048_v45, 1  ;;  %v7644_v15 = vld [vmem:[%s10443_s1 + $0x100] ss:$16 sps:$4 sm:$0xff]   ;;  %s7365_s29 = sshll.u32 %s8471_s22, 4 }
  0x25   : > { %967 = vmatpush1.bf16.msra.mxu1 %v7608_v25  ;;  %v540_v40 = vor.u32 %v538_v34, %v536_v24  ;;  %v1053_v53 = vrot.slane %v1051_v46, 2  ;;  %v1247_v9 = vrot.slane %v6406_v41, 2  ;;  %v7649_v16 = vld [vmem:[%s10443_s1 + $0x124] ss:$16 sps:$4 sm:$0xff]   ;;  %v7647_v17 = vld [vmem:[%s10443_s1 + $0x120] ss:$16 sps:$4 sm:$0xff]   ;;  %s10400_s25 = scalar_lea.hbm %s10457_s15, %s7365_s29 }
  0x26   : > { %v537_v32 = vsel %vm525_vm1, %v532_v27, %v536_v24  ;;  %1163 = vmatprep.subr.bf16.mxu1 %v7616_v33  ;;  %v1058_v55 = vrot.slane %v1056_v48, 1  ;;  %v1061_v56 = vrot.slane %v1059_v49, 2  ;;  %v8702_v27 = vshrl.u32 %v1419_v26, 7  ;;  %s486_s30 = scalar_lea.vmem [#allocation4], %s485_s18  ;;  %s6269_s26 = scalar_lea.sflag [#allocation5], %s485_s18 }
  0x27   : > { %6360 = vmatmul.mubr.msk.bf16.vlgmr.msra.gmra.mrb[0].mxu0 %vm581_vm0, %v537_v32  ;;  %v1054_v59 = vor.u32 %v1053_v53, %v1050_v50  ;;  %v1248_v10 = vsel %vm1245_vm4, %v1246_v8, %v1247_v9  ;;  %v7657_v8 = vld [vmem:[%s10446_s4 + $0x1c4] ss:$8 sps:$4 sm:$0xff]   ;;  %vm2563_vm7 = vcmask 1043456   ;;  %vm2564_vm8 = vcmask 785412   ;;  %s6281_s16 = sshll.u32 %s486_s30, 4  ;;  %s8369_s20 = smov [#allocation4]   ;;  %s10402_s16 = int_to_ptr.vmem [resolvable:$true] %s6281_s16 }
  0x28   : > { %642 = vmatpush1.bf16.msra.mxu0 %v7605_v28  ;;  %630 = vmatprep.mubr.bf16.mxu0 %v8366_v2  ;;  %v1062_v60 = vor.u32 %v1061_v56, %v1058_v55  ;;  %v1429_v28 = vsub.s32 2, %v8702_v27  ;;  %vm2567_vm9 = vcmask 1042432   ;;  %vm2568_vm10 = vcmask 784388   ;;  %vm2565_vm11 = vmor %vm2564_vm8, %vm2563_vm7  ;;  %s8302_s22 = scalar_lea.vmem %s10402_s16, 16  ;;  %s8306_s24 = sshll.u32 %s8369_s20, 4  ;;  %s8307_s24 = int_to_ptr.vmem [resolvable:$false] %s8306_s24 }
  0x29   : > { %6376 = vmatmul.mubr.msk.bf16.gmra.mrb[4].mxu1 %vm581_vm0, %v8565_v29  ;;  %643 = vmatprep.subr.bf16.mxu0 %v7613_v30  ;;  %v1433_v30 = vsub.s32 3, %v8702_v27  ;;  %vm2569_vm12 = vmor %vm2568_vm10, %vm2567_vm9  ;;  %vm2934_vm13 = vcmask 785408   ;;  %vm8368_vm14 = vmmov 0   ;;  %vm4539_vm15 = vcmask 1044480   ;;  %p8303_p11 = scmp.ne.s32.totalorder %s10402_s16, %s8302_s22  ;;  %s8308_s21 = scalar_lea.vmem %s8307_s24, 32 }
  0x2a   : > { %996 = vmatprep.mubr.bf16.mxu1 %v8366_v2  ;;  %v1063_v63 = vsel %vm1046_vm3, %v1054_v59, %v1062_v60  ;;  %vm4535_vm1 = vcmask 80896   ;;  %vm5381_vm2 = vsmask.f32 2304  ;;  %p8309_p0 = scmp.lt.s32.totalorder %s10402_s16, %s8307_s24  ;;  %p8310_p1 = scmp.lt.s32.totalorder %s8308_s21, %s8302_s22 }
  0x2b   : > { %p8304_p12 = pnand %p8303_p11, %p8488_p5 }
  0x2c   : > { %644 = vmatpush1.bf16.msra.mxu0 %v7611_v35  ;;  %p8311_p2 = por %p8310_p1, %p8309_p0 }
  0x2d   : > { %742 = vmatprep.subr.bf16.mxu0 %v7619_v36  ;;  %p8305_p13 = pneg %p8304_p12 }
  0x2f   : > { %6361 = vmatmul.mubr.msk.bf16.gmra.mrb[4].mxu0 %vm581_vm0, %v540_v40  ;;  %p8312_p3 = pnand %p8311_p2, %p8305_p13 }
  0x30   : > { %673 = vmatprep.mubr.bf16.mxu0 %v8366_v2 }
  0x31   : > { %6396 = vmatmul.mubr.msk.bf16.vlgmr.msra.gmra.mrb[0].mxu1 %vm581_vm0, %v8590_v42 }
  0x32   : > { %1006 = vmatprep.mubr.bf16.mxu1 %v8366_v2  ;;  %1164 = vmatpush1.bf16.msra.mxu1 %v7614_v43 }
  0x33   : > { %1165 = vmatprep.subr.bf16.mxu1 %v7622_v44 }
  0x36   : > { %1166 = vmatpush1.bf16.msra.mxu1 %v7620_v47 }
  0x37   : > { %6362 = vmatmul.mubr.msk.bf16.vlgmr.msra.gmra.mrb[8].mxu0 %vm581_vm0, %v537_v32  ;;  %1348 = vmatprep.subr.bf16.mxu1 %v7628_v51 }
  0x38   : > { %743 = vmatpush1.bf16.msra.mxu0 %v7617_v52  ;;  %683 = vmatprep.mubr.bf16.mxu0 %v8366_v2 }
  0x39   : > { %6397 = vmatmul.mubr.msk.bf16.gmra.mrb[4].mxu1 %vm581_vm0, %v8586_v38  ;;  %744 = vmatprep.subr.bf16.mxu0 %v7625_v54 }
  0x3a   : > { %1195 = vmatprep.mubr.bf16.mxu1 %v8366_v2 }
  0x3c   : > { %745 = vmatpush1.bf16.msra.mxu0 %v7623_v57 }
  0x3d   : > { %911 = vmatprep.subr.bf16.mxu0 %v7631_v58 }
  0x3f   : > { %6363 = vmatmul.mubr.msk.bf16.gmra.mrb[12].mxu0 %vm581_vm0, %v540_v40 }
  0x40   : > { %774 = vmatprep.mubr.bf16.mxu0 %v8366_v2 }
  0x41   : > { %6417 = vmatmul.mubr.msk.bf16.vlgmr.msra.gmra.mrb[0].mxu1 %vm581_vm0, %v1063_v63 }
  0x42   : > { %1205 = vmatprep.mubr.bf16.mxu1 %v8366_v2  ;;  %1349 = vmatpush1.bf16.msra.mxu1 %v7626_v61 }
  0x43   : > { %1350 = vmatprep.subr.bf16.mxu1 %v7634_v62 }
  0x46   : > { %1351 = vmatpush1.bf16.msra.mxu1 %v7632_v0 }
  0x47   : > { %6373 = vmatmul.mubr.msk.bf16.vlgmr.msra.gmra.mrb[0].mxu0 %vm581_vm0, %v8536_v11  ;;  %v7638_v11 = vld [vmem:[%s10443_s1 + $0xc0] ss:$16 sps:$4 sm:$0xff]  }
  0x48   : > { %912 = vmatpush1.bf16.msra.mxu0 %v7629_v3  ;;  %784 = vmatprep.mubr.bf16.mxu0 %v8366_v2 }
  0x49   : > { %6418 = vmatmul.mubr.msk.bf16.gmra.mrb[4].mxu1 %vm581_vm0, %v1062_v60  ;;  %913 = vmatprep.subr.bf16.mxu0 %v7637_v4 }
  0x4a   : > { %1380 = vmatprep.mubr.bf16.mxu1 %v8366_v2 }
  0x4c   : > { %914 = vmatpush1.bf16.msra.mxu0 %v7635_v6 }
  0x4d   : > { %1110 = vmatprep.subr.bf16.mxu0 %v7640_v7  ;;  %v8720_v7 = vld [vmem:[%s10445_s3] sm:$0x7f]  }
  0x4f   : > { %6374 = vmatmul.mubr.msk.bf16.gmra.mrb[4].mxu0 %vm581_vm0, %v8565_v29  ;;  %v8708_v29 = vld [vmem:[%s10444_s2] sm:$0xf] }
  0x50   : > { %943 = vmatprep.mubr.bf16.mxu0 %v8366_v2  ;;  %v1430_v31 = vrot.slane %v8708_v29, %v1429_v28  ;;  %v1434_v33 = vrot.slane %v8708_v29, %v1433_v30 }
  0x51   : > { %6438 = vmatmul.mubr.msk.bf16.vlgmr.msra.gmra.mrb[0].mxu1 %vm581_vm0, %v1248_v10 }
  0x52   : > { %1390 = vmatprep.mubr.bf16.mxu1 %v8366_v2 }
  0x57   : > { %6394 = vmatmul.mubr.msk.bf16.vlgmr.msra.gmra.mrb[0].mxu0 %vm581_vm0, %v8590_v42 }
  0x58   : > { %1111 = vmatpush1.bf16.msra.mxu0 %v7638_v11  ;;  %953 = vmatprep.mubr.bf16.mxu0 %v8366_v2  ;;  %v7663_v11 = vld [vmem:[%s10446_s4 + $0x1d4] ss:$8 sps:$4 sm:$0xff]  }
  0x59   : > { %6439 = vmatmul.mubr.msk.bf16.gmra.mrb[4].mxu1 %vm581_vm0, %v1247_v9  ;;  %1112 = vmatprep.subr.bf16.mxu0 %v7643_v12  ;;  %v1421_v12 = vsub.s32 0, %v8702_v27 }
  0x5a   : > { %1578 = vmatprep.mubr.bf16.mxu1 %v8366_v2 }
  0x5c   : > { %1113 = vmatpush1.bf16.msra.mxu0 %v7641_v13  ;;  %v1425_v13 = vsub.s32 1, %v8702_v27 }
  0x5d   : > { %1295 = vmatprep.subr.bf16.mxu0 %v7646_v14  ;;  %v7661_v14 = vld [vmem:[%s10446_s4 + $0x1d0] ss:$8 sps:$4 sm:$0xff]  }
  0x5f   : > { %6395 = vmatmul.mubr.msk.bf16.gmra.mrb[4].mxu0 %vm581_vm0, %v8586_v38 }
  0x60   : > { %1142 = vmatprep.mubr.bf16.mxu0 %v8366_v2 }
  0x67   : > { %6415 = vmatmul.mubr.msk.bf16.vlgmr.msra.gmra.mrb[0].mxu0 %vm581_vm0, %v1063_v63 }
  0x68   : > { %1296 = vmatpush1.bf16.msra.mxu0 %v7644_v15  ;;  %1152 = vmatprep.mubr.bf16.mxu0 %v8366_v2  ;;  %v7669_v15 = vld [vmem:[%s10446_s4 + $0x1e4] ss:$8 sps:$4 sm:$0xff]  }
  0x69   : > { %1297 = vmatprep.subr.bf16.mxu0 %v7649_v16  ;;  %v1422_v16 = vrot.slane %v8708_v29, %v1421_v12 }
  0x6c   : > { %1298 = vmatpush1.bf16.msra.mxu0 %v7647_v17  ;;  %v1426_v17 = vrot.slane %v8708_v29, %v1425_v13  ;;  %v7673_v29 = vld [vmem:[%s10446_s4 + $0x1f0] ss:$8 sps:$4 sm:$0xff]  }
  0x6f   : > { %6416 = vmatmul.mubr.msk.bf16.gmra.mrb[4].mxu0 %vm581_vm0, %v1062_v60 }
  0x70   : > { %1327 = vmatprep.mubr.bf16.mxu0 %v8366_v2 }
  0x77   : > { %6436 = vmatmul.mubr.msk.bf16.vlgmr.msra.gmra.mrb[0].mxu0 %vm581_vm0, %v1248_v10  ;;  %v8735_v10 = vld [vmem:[%s10445_s3 + $0x8] sm:$0x7f]  }
  0x78   : > { %1337 = vmatprep.mubr.bf16.mxu0 %v8366_v2 }
  0x7f   : > { %6437 = vmatmul.mubr.msk.bf16.gmra.mrb[4].mxu0 %vm581_vm0, %v1247_v9  ;;  %v7655_v9 = vld [vmem:[%s10446_s4 + $0x1c0] ss:$8 sps:$4 sm:$0xff]  }
  0x80   : > { %1535 = vmatprep.mubr.bf16.mxu0 %v8366_v2 }
 0x10a   : > { %v675_v18 = vpop.f32.mrb[8].mxu0 }
 0x10b   : > { %v677_v19 = vpop.f32.mrb[9].mxu0 }
 0x10c   : > { %v679_v20 = vpop.f32.mrb[10].mxu0 }
 0x10d   : > { %v681_v21 = vpop.f32.mrb[11].mxu0 }
 0x112   : > { %v685_v22 = vpop.f32.mrb[12].mxu0 }
 0x113   : > { %v687_v23 = vpop.f32.mrb[13].mxu0 }
 0x114   : > { %v689_v24 = vpop.f32.mrb[14].mxu0 }
 0x115   : > { %v691_v25 = vpop.f32.mrb[15].mxu0 }
 0x124   : > { %v1382_v32 = vpop.f32.mrb[0].mxu1 }
 0x125   : > { %v7446_v34 = vadd.f32 %v1382_v32, %v675_v18  ;;  %v1384_v35 = vpop.f32.mrb[1].mxu1  ;;  %v7667_v18 = vld [vmem:[%s10446_s4 + $0x1e0] ss:$8 sps:$4 sm:$0xff]  }
 0x126   : > { %v7447_v36 = vadd.f32 %v1384_v35, %v677_v19  ;;  %v1386_v37 = vpop.f32.mrb[2].mxu1 }
 0x127   : > { %v1441_v38 = vadd.f32 %v7446_v34, %v1430_v31  ;;  %v7448_v39 = vadd.f32 %v1386_v37, %v679_v20  ;;  %v1388_v40 = vpop.f32.mrb[3].mxu1  ;;  %v7675_v20 = vld [vmem:[%s10446_s4 + $0x1f4] ss:$8 sps:$4 sm:$0xff]   ;;  %v7679_v37 = vld [vmem:[%s10446_s4 + $0x200] ss:$8 sps:$4 sm:$0xff]  }
 0x128   : > { %v1442_v41 = vadd.f32 %v7447_v36, %v1434_v33  ;;  %v7449_v42 = vadd.f32 %v1388_v40, %v681_v21  ;;  %v7687_v40 = vld [vmem:[%s10446_s4 + $0x214] ss:$8 sps:$4 sm:$0xff]  }
 0x129   : > { %v1445_v43 = vadd.f32 %v7448_v39, %v1430_v31  ;;  %v1457_v45 = vmax.f32 %v1441_v38, 0.0 }
 0x12a   : > { %v1446_v44 = vadd.f32 %v7449_v42, %v1434_v33  ;;  %v1458_v47 = vmax.f32 %v1442_v41, 0.0 }
 0x12b   : > { %v1461_v46 = vmax.f32 %v1445_v43, 0.0 }
 0x12c   : > { %v1462_v48 = vmax.f32 %v1446_v44, 0.0  ;;  %v1392_v49 = vpop.f32.mrb[4].mxu1 }
 0x12d   : > { %v1473_v50 = vpack.c.bf16 %v1461_v46, %v1457_v45  ;;  %v7450_v51 = vadd.f32 %v1392_v49, %v685_v22  ;;  %v1394_v52 = vpop.f32.mrb[5].mxu1  ;;  %v7693_v49 = vld [vmem:[%s10446_s4 + $0x224] ss:$8 sps:$4 sm:$0xff]  }
 0x12e   : > { %v7451_v53 = vadd.f32 %v1394_v52, %v687_v23  ;;  %v1396_v54 = vpop.f32.mrb[6].mxu1  ;;  %v1474_v55 = vpack.c.bf16 %v1462_v48, %v1458_v47  ;;  %v7685_v47 = vld [vmem:[%s10446_s4 + $0x210] ss:$8 sps:$4 sm:$0xff]  }
 0x12f   : > { %v1449_v56 = vadd.f32 %v7450_v51, %v1430_v31  ;;  %v7452_v57 = vadd.f32 %v1396_v54, %v689_v24  ;;  %v1398_v58 = vpop.f32.mrb[7].mxu1 }
 0x130   : > { %v1450_v59 = vadd.f32 %v7451_v53, %v1434_v33  ;;  %v7453_v60 = vadd.f32 %v1398_v58, %v691_v25  ;;  %1546 = vmatprep.subr.bf16.mxu1 %v1474_v55 }
 0x131   : > { %v1453_v61 = vadd.f32 %v7452_v57, %v1430_v31  ;;  %1547 = vmatpush1.bf16.msra.mxu1 %v1473_v50  ;;  %v1465_v63 = vmax.f32 %v1449_v56, 0.0  ;;  %v7681_v31 = vld [vmem:[%s10446_s4 + $0x204] ss:$8 sps:$4 sm:$0xff]   ;;  %v7699_v57 = vld [vmem:[%s10446_s4 + $0x234] ss:$8 sps:$4 sm:$0xff]  }
 0x132   : > { %v1454_v62 = vadd.f32 %v7453_v60, %v1434_v33  ;;  %v1466_v1 = vmax.f32 %v1450_v59, 0.0  ;;  %v7697_v59 = vld [vmem:[%s10446_s4 + $0x230] ss:$8 sps:$4 sm:$0xff]   ;;  %v7705_v60 = vld [vmem:[%s10446_s4 + $0x244] ss:$8 sps:$4 sm:$0xff]  }
 0x133   : > { %v1469_v0 = vmax.f32 %v1453_v61, 0.0  ;;  %v7654_v61 = vld [vmem:[%s10446_s4 + $0x4] ss:$8 sps:$4 sm:$0xff]  }
 0x134   : > { %v1470_v3 = vmax.f32 %v1454_v62, 0.0  ;;  %v7703_v62 = vld [vmem:[%s10446_s4 + $0x240] ss:$8 sps:$4 sm:$0xff]  }
 0x135   : > { %v1477_v4 = vpack.c.bf16 %v1469_v0, %v1465_v63  ;;  %v7711_v63 = vld [vmem:[%s10446_s4 + $0x254] ss:$8 sps:$4 sm:$0xff]   ;;  %v7652_v0 = vld [vmem:[%s10446_s4] ss:$8 sps:$4 sm:$0xff]  }
 0x136   : > { %v1478_v5 = vpack.c.bf16 %v1470_v3, %v1466_v1  ;;  %v7660_v1 = vld [vmem:[%s10446_s4 + $0x14] ss:$8 sps:$4 sm:$0xff]   ;;  %v7709_v3 = vld [vmem:[%s10446_s4 + $0x250] ss:$8 sps:$4 sm:$0xff]  }
 0x137   : > { %v1498_v6 = vsel %vm1245_vm4, %v1477_v4, 0  ;;  %v7717_v4 = vld [vmem:[%s10446_s4 + $0x264] ss:$8 sps:$4 sm:$0xff]  }
 0x138   : > { %6443 = vmatprep.subr.msk.bf16.mxu1 %vm1245_vm4, %v1478_v5 }
 0x139   : > { %1549 = vmatpush1.bf16.msra.mxu1 %v1498_v6 }
 0x13a   : > { %1643 = vmatprep.subr.bf16.mxu1 %v1474_v55  ;;  %v7691_v55 = vld [vmem:[%s10446_s4 + $0x220] ss:$8 sps:$4 sm:$0xff]  }
 0x13c   : > { %6444 = vmatmul.mubr.msk.bf16.vlgmr.msra.gmra.mrb[8].mxu1 %vm1486_vm5, %v8720_v7 }
 0x13d   : > { %1644 = vmatpush1.bf16.msra.mxu1 %v1473_v50  ;;  %1675 = vmatprep.mubr.bf16.mxu1 %v8366_v2 }
 0x13e   : > { %6450 = vmatprep.subr.msk.bf16.mxu1 %vm1245_vm4, %v1478_v5  ;;  %v7658_v5 = vld [vmem:[%s10446_s4 + $0x10] ss:$8 sps:$4 sm:$0xff]  }
 0x141   : > { %1646 = vmatpush1.bf16.msra.mxu1 %v1498_v6  ;;  %v7666_v6 = vld [vmem:[%s10446_s4 + $0x24] ss:$8 sps:$4 sm:$0xff]  }
 0x142   : > { %2461 = vmatprep.subr.bf16.mxu1 %v7657_v8  ;;  %v7723_v8 = vld [vmem:[%s10446_s4 + $0x274] ss:$8 sps:$4 sm:$0xff]  }
 0x144   : > { %6451 = vmatmul.mubr.msk.bf16.vlgmr.msra.gmra.mrb[12].mxu1 %vm1486_vm5, %v8735_v10 }
 0x145   : > { %2462 = vmatpush1.bf16.msra.mxu1 %v7655_v9  ;;  %v7664_v9 = vld [vmem:[%s10446_s4 + $0x20] ss:$8 sps:$4 sm:$0xff]  }
 0x146   : > { %2463 = vmatprep.subr.bf16.mxu1 %v7663_v11  ;;  %v7721_v11 = vld [vmem:[%s10446_s4 + $0x270] ss:$8 sps:$4 sm:$0xff]  }
 0x149   : > { %2464 = vmatpush1.bf16.msra.mxu1 %v7661_v14  ;;  %v7670_v14 = vld [vmem:[%s10446_s4 + $0x30] ss:$8 sps:$4 sm:$0xff]  }
 0x14a   : > { %v1329_v19 = vpop.f32.mrb[0].mxu0  ;;  %2465 = vmatprep.subr.bf16.mxu1 %v7669_v15  ;;  %v7678_v15 = vld [vmem:[%s10446_s4 + $0x44] ss:$8 sps:$4 sm:$0xff]  }
 0x14b   : > { %v1439_v21 = vadd.f32 %v1422_v16, %v1329_v19  ;;  %v1331_v22 = vpop.f32.mrb[1].mxu0  ;;  %v7690_v19 = vld [vmem:[%s10446_s4 + $0x64] ss:$8 sps:$4 sm:$0xff]  }
 0x14c   : > { %v1440_v23 = vadd.f32 %v1426_v17, %v1331_v22  ;;  %v1333_v24 = vpop.f32.mrb[2].mxu0  ;;  %v7694_v22 = vld [vmem:[%s10446_s4 + $0x70] ss:$8 sps:$4 sm:$0xff]  }
 0x14d   : > { %v1443_v25 = vadd.f32 %v1422_v16, %v1333_v24  ;;  %v1335_v26 = vpop.f32.mrb[3].mxu0  ;;  %2466 = vmatpush1.bf16.msra.mxu1 %v7667_v18  ;;  %v1455_v32 = vmax.f32 %v1439_v21, 0.0  ;;  %v7682_v18 = vld [vmem:[%s10446_s4 + $0x50] ss:$8 sps:$4 sm:$0xff]   ;;  %v7696_v21 = vld [vmem:[%s10446_s4 + $0x74] ss:$8 sps:$4 sm:$0xff]  }
 0x14e   : > { %v1444_v30 = vadd.f32 %v1426_v17, %v1335_v26  ;;  %2467 = vmatprep.subr.bf16.mxu1 %v7675_v20  ;;  %v1456_v34 = vmax.f32 %v1440_v23, 0.0  ;;  %v7688_v20 = vld [vmem:[%s10446_s4 + $0x60] ss:$8 sps:$4 sm:$0xff]   ;;  %v7702_v23 = vld [vmem:[%s10446_s4 + $0x84] ss:$8 sps:$4 sm:$0xff]  }
 0x14f   : > { %v1459_v33 = vmax.f32 %v1443_v25, 0.0  ;;  %v7700_v24 = vld [vmem:[%s10446_s4 + $0x80] ss:$8 sps:$4 sm:$0xff]   ;;  %v7708_v25 = vld [vmem:[%s10446_s4 + $0x94] ss:$8 sps:$4 sm:$0xff]  }
 0x150   : > { %v1460_v35 = vmax.f32 %v1444_v30, 0.0  ;;  %v7706_v26 = vld [vmem:[%s10446_s4 + $0x90] ss:$8 sps:$4 sm:$0xff]   ;;  %v7712_v30 = vld [vmem:[%s10446_s4 + $0xa0] ss:$8 sps:$4 sm:$0xff]  }
 0x151   : > { %v1471_v36 = vpack.c.bf16 %v1459_v33, %v1455_v32  ;;  %2468 = vmatpush1.bf16.msra.mxu1 %v7673_v29  ;;  %v7714_v29 = vld [vmem:[%s10446_s4 + $0xa4] ss:$8 sps:$4 sm:$0xff]   ;;  %v7718_v32 = vld [vmem:[%s10446_s4 + $0xb0] ss:$8 sps:$4 sm:$0xff]  }
 0x152   : > { %v1472_v38 = vpack.c.bf16 %v1460_v35, %v1456_v34  ;;  %v1339_v39 = vpop.f32.mrb[4].mxu0  ;;  %2469 = vmatprep.subr.bf16.mxu1 %v7681_v31  ;;  %v7720_v31 = vld [vmem:[%s10446_s4 + $0xb4] ss:$8 sps:$4 sm:$0xff]   ;;  %v7726_v33 = vld [vmem:[%s10446_s4 + $0xc4] ss:$8 sps:$4 sm:$0xff]  }
 0x153   : > { %v1447_v41 = vadd.f32 %v1422_v16, %v1339_v39  ;;  %v1341_v42 = vpop.f32.mrb[5].mxu0  ;;  %v7729_v34 = vld [vmem:[%s10446_s4 + $0x284] ss:$8 sps:$4 sm:$0xff]   ;;  %v7724_v35 = vld [vmem:[%s10446_s4 + $0xc0] ss:$8 sps:$4 sm:$0xff]  }
 0x154   : > { %v1448_v43 = vadd.f32 %v1426_v17, %v1341_v42  ;;  %v1343_v44 = vpop.f32.mrb[6].mxu0  ;;  %1503 = vmatprep.subr.bf16.mxu0 %v1472_v38  ;;  %v7730_v39 = vld [vmem:[%s10446_s4 + $0xd0] ss:$8 sps:$4 sm:$0xff]   ;;  %v7741_v42 = vld [vmem:[%s10446_s4 + $0x2a4] ss:$8 sps:$4 sm:$0xff]  }
 0x155   : > { %v1451_v45 = vadd.f32 %v1422_v16, %v1343_v44  ;;  %v1345_v46 = vpop.f32.mrb[7].mxu0  ;;  %1504 = vmatpush1.bf16.msra.mxu0 %v1471_v36  ;;  %2470 = vmatpush1.bf16.msra.mxu1 %v7679_v37  ;;  %v1463_v50 = vmax.f32 %v1447_v41, 0.0  ;;  %v7676_v16 = vld [vmem:[%s10446_s4 + $0x40] ss:$8 sps:$4 sm:$0xff]   ;;  %v7732_v37 = vld [vmem:[%s10446_s4 + $0xd4] ss:$8 sps:$4 sm:$0xff]  }
 0x156   : > { %v1452_v48 = vadd.f32 %v1426_v17, %v1345_v46  ;;  %2471 = vmatprep.subr.bf16.mxu1 %v7687_v40  ;;  %v1464_v52 = vmax.f32 %v1448_v43, 0.0  ;;  %v7684_v17 = vld [vmem:[%s10446_s4 + $0x54] ss:$8 sps:$4 sm:$0xff]   ;;  %v7733_v40 = vld [vmem:[%s10446_s4 + $0x290] ss:$8 sps:$4 sm:$0xff]  }
 0x157   : > { %v1467_v51 = vmax.f32 %v1451_v45, 0.0  ;;  %v7738_v41 = vld [vmem:[%s10446_s4 + $0xe4] ss:$8 sps:$4 sm:$0xff]   ;;  %v7736_v43 = vld [vmem:[%s10446_s4 + $0xe0] ss:$8 sps:$4 sm:$0xff]  }
 0x158   : > { %v1468_v53 = vmax.f32 %v1452_v48, 0.0  ;;  %v7739_v44 = vld [vmem:[%s10446_s4 + $0x2a0] ss:$8 sps:$4 sm:$0xff]   ;;  %v7744_v45 = vld [vmem:[%s10446_s4 + $0xf4] ss:$8 sps:$4 sm:$0xff]  }
 0x159   : > { %v1475_v54 = vpack.c.bf16 %v1467_v51, %v1463_v50  ;;  %2472 = vmatpush1.bf16.msra.mxu1 %v7685_v47  ;;  %v7747_v46 = vld [vmem:[%s10446_s4 + $0x2b4] ss:$8 sps:$4 sm:$0xff]   ;;  %v7742_v47 = vld [vmem:[%s10446_s4 + $0xf0] ss:$8 sps:$4 sm:$0xff]   ;;  %v7753_v50 = vld [vmem:[%s10446_s4 + $0x2c4] ss:$8 sps:$4 sm:$0xff]  }
 0x15a   : > { %v1476_v56 = vpack.c.bf16 %v1468_v53, %v1464_v52  ;;  %2473 = vmatprep.subr.bf16.mxu1 %v7693_v49  ;;  %v7745_v48 = vld [vmem:[%s10446_s4 + $0x2b0] ss:$8 sps:$4 sm:$0xff]   ;;  %v7750_v49 = vld [vmem:[%s10446_s4 + $0x104] ss:$8 sps:$4 sm:$0xff]  }
 0x15b   : > { %v1492_v58 = vsel %vm1245_vm4, %v1475_v54, 0 }
 0x15c   : > { %6441 = vmatprep.subr.msk.bf16.mxu0 %vm1245_vm4, %v1476_v56 }
 0x15d   : > { %1506 = vmatpush1.bf16.msra.mxu0 %v1492_v58  ;;  %2474 = vmatpush1.bf16.msra.mxu1 %v7691_v55 }
 0x15e   : > { %1600 = vmatprep.subr.bf16.mxu0 %v1472_v38  ;;  %2475 = vmatprep.subr.bf16.mxu1 %v7699_v57  ;;  %v7735_v38 = vld [vmem:[%s10446_s4 + $0x294] ss:$8 sps:$4 sm:$0xff]  }
 0x160   : > { %6442 = vmatmul.mubr.msk.bf16.vlgmr.msra.gmra.mrb[16].mxu0 %vm1486_vm5, %v8720_v7  ;;  %v7715_v7 = vld [vmem:[%s10446_s4 + $0x260] ss:$8 sps:$4 sm:$0xff]  }
 0x161   : > { %1601 = vmatpush1.bf16.msra.mxu0 %v1471_v36  ;;  %1632 = vmatprep.mubr.bf16.mxu0 %v8366_v2  ;;  %v7727_v36 = vld [vmem:[%s10446_s4 + $0x280] ss:$8 sps:$4 sm:$0xff]  }
 0x162   : > { %6448 = vmatprep.subr.msk.bf16.mxu0 %vm1245_vm4, %v1476_v56  ;;  %2476 = vmatpush1.bf16.msra.mxu1 %v7697_v59  ;;  %vm5383_vm4 = vcmask 260100  }
 0x163   : > { %2477 = vmatprep.subr.bf16.mxu1 %v7705_v60 }
 0x165   : > { %1603 = vmatpush1.bf16.msra.mxu0 %v1492_v58 }
 0x166   : > { %2038 = vmatprep.subr.bf16.mxu0 %v7654_v61  ;;  %2478 = vmatpush1.bf16.msra.mxu1 %v7703_v62 }
 0x167   : > { %2479 = vmatprep.subr.bf16.mxu1 %v7711_v63 }
 0x168   : > { %6449 = vmatmul.mubr.msk.bf16.vlgmr.msra.gmra.mrb[20].mxu0 %vm1486_vm5, %v8735_v10  ;;  %v7672_v10 = vld [vmem:[%s10446_s4 + $0x34] ss:$8 sps:$4 sm:$0xff]   ;;  %vm10188_vm5 = vmand %vm2567_vm9, %vm5381_vm2 }
 0x169   : > { %2039 = vmatpush1.bf16.msra.mxu0 %v7652_v0 }
 0x16a   : > { %2040 = vmatprep.subr.bf16.mxu0 %v7660_v1  ;;  %2480 = vmatpush1.bf16.msra.mxu1 %v7709_v3 }
 0x16b   : > { %2481 = vmatprep.subr.bf16.mxu1 %v7717_v4 }
 0x16d   : > { %2041 = vmatpush1.bf16.msra.mxu0 %v7658_v5 }
 0x16e   : > { %2042 = vmatprep.subr.bf16.mxu0 %v7666_v6  ;;  %2482 = vmatpush1.bf16.msra.mxu1 %v7715_v7 }
 0x16f   : > { %2483 = vmatprep.subr.bf16.mxu1 %v7723_v8 }
 0x171   : > { %2043 = vmatpush1.bf16.msra.mxu0 %v7664_v9 }
 0x172   : > { %2044 = vmatprep.subr.bf16.mxu0 %v7672_v10  ;;  %2484 = vmatpush1.bf16.msra.mxu1 %v7721_v11 }
 0x173   : > { %2485 = vmatprep.subr.bf16.mxu1 %v7729_v34  ;;  %v7774_v34 = vld [vmem:[%s10446_s4 + $0x144] ss:$8 sps:$4 sm:$0xff]  }
 0x175   : > { %2045 = vmatpush1.bf16.msra.mxu0 %v7670_v14 }
 0x176   : > { %2046 = vmatprep.subr.bf16.mxu0 %v7678_v15  ;;  %2486 = vmatpush1.bf16.msra.mxu1 %v7727_v36  ;;  %v7772_v36 = vld [vmem:[%s10446_s4 + $0x140] ss:$8 sps:$4 sm:$0xff]  }
 0x177   : > { %2487 = vmatprep.subr.bf16.mxu1 %v7735_v38  ;;  %v7780_v38 = vld [vmem:[%s10446_s4 + $0x154] ss:$8 sps:$4 sm:$0xff]  }
 0x179   : > { %2047 = vmatpush1.bf16.msra.mxu0 %v7676_v16 }
 0x17a   : > { %2048 = vmatprep.subr.bf16.mxu0 %v7684_v17  ;;  %2488 = vmatpush1.bf16.msra.mxu1 %v7733_v40  ;;  %v7778_v40 = vld [vmem:[%s10446_s4 + $0x150] ss:$8 sps:$4 sm:$0xff]  }
 0x17b   : > { %2489 = vmatprep.subr.bf16.mxu1 %v7741_v42  ;;  %v7786_v42 = vld [vmem:[%s10446_s4 + $0x164] ss:$8 sps:$4 sm:$0xff]  }
 0x17d   : > { %2049 = vmatpush1.bf16.msra.mxu0 %v7682_v18  ;;  %v7748_v18 = vld [vmem:[%s10446_s4 + $0x100] ss:$8 sps:$4 sm:$0xff]  }
 0x17e   : > { %2050 = vmatprep.subr.bf16.mxu0 %v7690_v19  ;;  %2490 = vmatpush1.bf16.msra.mxu1 %v7739_v44  ;;  %v7751_v19 = vld [vmem:[%s10446_s4 + $0x2c0] ss:$8 sps:$4 sm:$0xff]  }
 0x17f   : > { %2491 = vmatprep.subr.bf16.mxu1 %v7747_v46  ;;  %v7784_v44 = vld [vmem:[%s10446_s4 + $0x160] ss:$8 sps:$4 sm:$0xff]   ;;  %v7792_v46 = vld [vmem:[%s10446_s4 + $0x174] ss:$8 sps:$4 sm:$0xff]  }
 0x181   : > { %2051 = vmatpush1.bf16.msra.mxu0 %v7688_v20  ;;  %v7756_v20 = vld [vmem:[%s10446_s4 + $0x114] ss:$8 sps:$4 sm:$0xff]  }
 0x182   : > { %2052 = vmatprep.subr.bf16.mxu0 %v7696_v21  ;;  %2492 = vmatpush1.bf16.msra.mxu1 %v7745_v48  ;;  %v7759_v21 = vld [vmem:[%s10446_s4 + $0x2d4] ss:$8 sps:$4 sm:$0xff]   ;;  %v7790_v48 = vld [vmem:[%s10446_s4 + $0x170] ss:$8 sps:$4 sm:$0xff]  }
 0x183   : > { %2504 = vmatprep.subr.bf16.mxu1 %v7753_v50  ;;  %v7798_v50 = vld [vmem:[%s10446_s4 + $0x184] ss:$8 sps:$4 sm:$0xff]  }
 0x185   : > { %2053 = vmatpush1.bf16.msra.mxu0 %v7694_v22  ;;  %v7754_v22 = vld [vmem:[%s10446_s4 + $0x110] ss:$8 sps:$4 sm:$0xff]  }
 0x186   : > { %2054 = vmatprep.subr.bf16.mxu0 %v7702_v23  ;;  %v7757_v23 = vld [vmem:[%s10446_s4 + $0x2d0] ss:$8 sps:$4 sm:$0xff]  }
 0x189   : > { %2055 = vmatpush1.bf16.msra.mxu0 %v7700_v24  ;;  %v7762_v24 = vld [vmem:[%s10446_s4 + $0x124] ss:$8 sps:$4 sm:$0xff]  }
 0x18a   : > { %2056 = vmatprep.subr.bf16.mxu0 %v7708_v25  ;;  %v7765_v25 = vld [vmem:[%s10446_s4 + $0x2e4] ss:$8 sps:$4 sm:$0xff]  }
 0x18d   : > { %2057 = vmatpush1.bf16.msra.mxu0 %v7706_v26  ;;  %v7760_v26 = vld [vmem:[%s10446_s4 + $0x120] ss:$8 sps:$4 sm:$0xff]  }
 0x18e   : > { %2058 = vmatprep.subr.bf16.mxu0 %v7714_v29  ;;  %v7763_v29 = vld [vmem:[%s10446_s4 + $0x2e0] ss:$8 sps:$4 sm:$0xff]  }
 0x191   : > { %2059 = vmatpush1.bf16.msra.mxu0 %v7712_v30  ;;  %v7768_v30 = vld [vmem:[%s10446_s4 + $0x134] ss:$8 sps:$4 sm:$0xff]  }
 0x192   : > { %2060 = vmatprep.subr.bf16.mxu0 %v7720_v31  ;;  %v7771_v31 = vld [vmem:[%s10446_s4 + $0x2f4] ss:$8 sps:$4 sm:$0xff]  }
 0x195   : > { %2061 = vmatpush1.bf16.msra.mxu0 %v7718_v32  ;;  %v7766_v32 = vld [vmem:[%s10446_s4 + $0x130] ss:$8 sps:$4 sm:$0xff]  }
 0x196   : > { %2062 = vmatprep.subr.bf16.mxu0 %v7726_v33  ;;  %v7769_v33 = vld [vmem:[%s10446_s4 + $0x2f0] ss:$8 sps:$4 sm:$0xff]  }
 0x199   : > { %2063 = vmatpush1.bf16.msra.mxu0 %v7724_v35  ;;  %v7777_v35 = vld [vmem:[%s10446_s4 + $0x304] ss:$8 sps:$4 sm:$0xff]  }
 0x19a   : > { %2064 = vmatprep.subr.bf16.mxu0 %v7732_v37  ;;  %v7775_v37 = vld [vmem:[%s10446_s4 + $0x300] ss:$8 sps:$4 sm:$0xff]  }
 0x19d   : > { %2065 = vmatpush1.bf16.msra.mxu0 %v7730_v39  ;;  %v7783_v39 = vld [vmem:[%s10446_s4 + $0x314] ss:$8 sps:$4 sm:$0xff]  }
 0x19e   : > { %2066 = vmatprep.subr.bf16.mxu0 %v7738_v41  ;;  %v7781_v41 = vld [vmem:[%s10446_s4 + $0x310] ss:$8 sps:$4 sm:$0xff]  }
 0x1a1   : > { %2067 = vmatpush1.bf16.msra.mxu0 %v7736_v43  ;;  %v7789_v43 = vld [vmem:[%s10446_s4 + $0x324] ss:$8 sps:$4 sm:$0xff]  }
 0x1a2   : > { %2068 = vmatprep.subr.bf16.mxu0 %v7744_v45  ;;  %v7787_v45 = vld [vmem:[%s10446_s4 + $0x320] ss:$8 sps:$4 sm:$0xff]  }
 0x1a5   : > { %2069 = vmatpush1.bf16.msra.mxu0 %v7742_v47  ;;  %v7795_v47 = vld [vmem:[%s10446_s4 + $0x334] ss:$8 sps:$4 sm:$0xff]  }
 0x1a6   : > { %2081 = vmatprep.subr.bf16.mxu0 %v7750_v49  ;;  %v7793_v49 = vld [vmem:[%s10446_s4 + $0x330] ss:$8 sps:$4 sm:$0xff]  }
 0x20f   : > { %v1580_v51 = vpop.f32.mrb[8].mxu1 }
 0x210   : > { %v1582_v52 = vpop.f32.mrb[9].mxu1 }
 0x211   : > { %v1584_v53 = vpop.f32.mrb[10].mxu1 }
 0x212   : > { %v1586_v54 = vpop.f32.mrb[11].mxu1 }
 0x217   : > { %v1677_v55 = vpop.f32.mrb[12].mxu1 }
 0x218   : > { %v1688_v56 = vmax.f32 %v1580_v51, %v1677_v55  ;;  %v1679_v57 = vpop.f32.mrb[13].mxu1  ;;  %v7801_v51 = vld [vmem:[%s10446_s4 + $0x344] ss:$8 sps:$4 sm:$0xff]   ;;  %v7807_v55 = vld [vmem:[%s10446_s4 + $0x354] ss:$8 sps:$4 sm:$0xff]  }
 0x219   : > { %v1689_v58 = vmax.f32 %v1582_v52, %v1679_v57  ;;  %v1681_v59 = vpop.f32.mrb[14].mxu1  ;;  %v7796_v52 = vld [vmem:[%s10446_s4 + $0x180] ss:$8 sps:$4 sm:$0xff]   ;;  %v7805_v57 = vld [vmem:[%s10446_s4 + $0x350] ss:$8 sps:$4 sm:$0xff]  }
 0x21a   : > { %v1692_v60 = vmax.f32 %v1584_v53, %v1681_v59  ;;  %v1683_v61 = vpop.f32.mrb[15].mxu1  ;;  %v7799_v53 = vld [vmem:[%s10446_s4 + $0x340] ss:$8 sps:$4 sm:$0xff]   ;;  %v7813_v59 = vld [vmem:[%s10446_s4 + $0x364] ss:$8 sps:$4 sm:$0xff]  }
 0x21b   : > { %v1693_v62 = vmax.f32 %v1586_v54, %v1683_v61  ;;  %v7804_v54 = vld [vmem:[%s10446_s4 + $0x194] ss:$8 sps:$4 sm:$0xff]   ;;  %v7811_v61 = vld [vmem:[%s10446_s4 + $0x360] ss:$8 sps:$4 sm:$0xff]  }
 0x21c   : > { %v8947_v63 = vpack.c.bf16 %v1692_v60, %v1688_v56  ;;  %v7802_v56 = vld [vmem:[%s10446_s4 + $0x190] ss:$8 sps:$4 sm:$0xff]   ;;  %v7808_v60 = vld [vmem:[%s10446_s4 + $0x1a0] ss:$8 sps:$4 sm:$0xff]  }
 0x21d   : > { %v1697_v0 = vpack.c.bf16 %v1693_v62, %v1689_v58  ;;  %v7810_v58 = vld [vmem:[%s10446_s4 + $0x1a4] ss:$8 sps:$4 sm:$0xff]   ;;  %v7816_v62 = vld [vmem:[%s10446_s4 + $0x1b4] ss:$8 sps:$4 sm:$0xff]  }
 0x233   : > { %v1537_v1 = vpop.f32.mrb[16].mxu0 }
 0x234   : > { %v1539_v3 = vpop.f32.mrb[17].mxu0 }
 0x235   : > { %v1541_v4 = vpop.f32.mrb[18].mxu0 }
 0x236   : > { %v1543_v5 = vpop.f32.mrb[19].mxu0 }
 0x23b   : > { %v1634_v6 = vpop.f32.mrb[20].mxu0 }
 0x23c   : > { %v1686_v7 = vmax.f32 %v1537_v1, %v1634_v6  ;;  %v1636_v8 = vpop.f32.mrb[21].mxu0  ;;  %v7814_v1 = vld [vmem:[%s10446_s4 + $0x1b0] ss:$8 sps:$4 sm:$0xff]  }
 0x23d   : > { %v1687_v9 = vmax.f32 %v1539_v3, %v1636_v8  ;;  %v1638_v10 = vpop.f32.mrb[22].mxu0  ;;  %v7817_v3 = vld [vmem:[%s10446_s4 + $0x370] ss:$8 sps:$4 sm:$0xff]   ;;  %v7824_v8 = vld [vmem:[%s10447_s5 + $0x168] ss:$12 sps:$4 sm:$0xff]  }
 0x23e   : > { %v1690_v11 = vmax.f32 %v1541_v4, %v1638_v10  ;;  %v1640_v14 = vpop.f32.mrb[23].mxu0  ;;  %v7822_v4 = vld [vmem:[%s10447_s5 + $0x154] ss:$12 sps:$4 sm:$0xff]   ;;  %v7823_v6 = vld [vmem:[%s10447_s5 + $0x158] ss:$12 sps:$4 sm:$0xff]  }
 0x23f   : > { %v1691_v15 = vmax.f32 %v1543_v5, %v1640_v14  ;;  %v7820_v5 = vld [vmem:[%s10447_s5 + $0x150] ss:$12 sps:$4 sm:$0xff]  }
 0x240   : > { %v1694_v16 = vpack.c.bf16 %v1690_v11, %v1686_v7  ;;  %v7826_v7 = vld [vmem:[%s10447_s5 + $0x16c] ss:$12 sps:$4 sm:$0xff]   ;;  %v7830_v10 = vld [vmem:[%s10447_s5 + $0x184] ss:$12 sps:$4 sm:$0xff]   ;;  %v7831_v11 = vld [vmem:[%s10447_s5 + $0x188] ss:$12 sps:$4 sm:$0xff]  }
 0x241   : > { %v1695_v17 = vpack.c.bf16 %v1691_v15, %v1687_v9  ;;  %v7827_v9 = vld [vmem:[%s10447_s5 + $0x170] ss:$12 sps:$4 sm:$0xff]   ;;  %v7832_v15 = vld [vmem:[%s10447_s5 + $0x198] ss:$12 sps:$4 sm:$0xff]  }
 0x242   : > { %v7834_v14 = vld [vmem:[%s10447_s5 + $0x19c] ss:$12 sps:$4 sm:$0xff]  }
 0x243   : > { %2070 = vmatprep.mubr.bf16.mxu0 %v1695_v17  ;;  %2493 = vmatprep.mubr.bf16.mxu1 %v1695_v17  ;;  %v7838_v17 = vld [vmem:[%s10447_s5 + $0x1b4] ss:$12 sps:$4 sm:$0xff]  }
 0x244   : > { %2071 = vmatmul.mubr.bf16.vlgmr.msra.gmra.mrb[24].mxu0 %v1694_v16  ;;  %2494 = vmatmul.mubr.bf16.vlgmr.msra.gmra.mrb[16].mxu1 %v1694_v16  ;;  %v7835_v16 = vld [vmem:[%s10447_s5 + $0x1a0] ss:$12 sps:$4 sm:$0xff]  }
 0x245   : > { %2082 = vmatpush1.bf16.msra.mxu0 %v7748_v18  ;;  %2505 = vmatpush1.bf16.msra.mxu1 %v7751_v19  ;;  %v7836_v18 = vld [vmem:[%s10447_s5 + $0x1b0] ss:$12 sps:$4 sm:$0xff]   ;;  %v7839_v19 = vld [vmem:[%s10447_s5 + $0x1b8] ss:$12 sps:$4 sm:$0xff]  }
 0x246   : > { %2083 = vmatprep.subr.bf16.mxu0 %v7756_v20  ;;  %2506 = vmatprep.subr.bf16.mxu1 %v7759_v21  ;;  %v7842_v20 = vld [vmem:[%s10447_s5 + $0x1cc] ss:$12 sps:$4 sm:$0xff]   ;;  %v7840_v21 = vld [vmem:[%s10447_s5 + $0x1c8] ss:$12 sps:$4 sm:$0xff]  }
 0x247   : > { %6508 = vmatprep.mubr.msk.bf16.mxu0 %vm2034_vm6, %v1697_v0  ;;  %6621 = vmatprep.mubr.msk.bf16.mxu1 %vm2034_vm6, %v1697_v0  ;;  %v7819_v0 = vld [vmem:[%s10446_s4 + $0x374] ss:$8 sps:$4 sm:$0xff]  }
 0x249   : > { %2084 = vmatpush1.bf16.msra.mxu0 %v7754_v22  ;;  %2507 = vmatpush1.bf16.msra.mxu1 %v7757_v23  ;;  %v7843_v22 = vld [vmem:[%s10447_s5 + $0x1d0] ss:$12 sps:$4 sm:$0xff]  }
 0x24a   : > { %2085 = vmatprep.subr.bf16.mxu0 %v7762_v24  ;;  %2508 = vmatprep.subr.bf16.mxu1 %v7765_v25  ;;  %v7846_v23 = vld [vmem:[%s10447_s5 + $0x1e4] ss:$12 sps:$4 sm:$0xff]   ;;  %v7844_v24 = vld [vmem:[%s10447_s5 + $0x1e0] ss:$12 sps:$4 sm:$0xff]   ;;  %v7847_v25 = vld [vmem:[%s10447_s5 + $0x1e8] ss:$12 sps:$4 sm:$0xff]  }
 0x24d   : > { %2086 = vmatpush1.bf16.msra.mxu0 %v7760_v26  ;;  %2509 = vmatpush1.bf16.msra.mxu1 %v7763_v29  ;;  %v7850_v26 = vld [vmem:[%s10447_s5 + $0x1fc] ss:$12 sps:$4 sm:$0xff]   ;;  %v7848_v29 = vld [vmem:[%s10447_s5 + $0x1f8] ss:$12 sps:$4 sm:$0xff]  }
 0x24e   : > { %2087 = vmatprep.subr.bf16.mxu0 %v7768_v30  ;;  %2510 = vmatprep.subr.bf16.mxu1 %v7771_v31  ;;  %v7851_v30 = vld [vmem:[%s10447_s5 + $0x200] ss:$12 sps:$4 sm:$0xff]  }
 0x24f   : > { %v7854_v31 = vld [vmem:[%s10447_s5 + $0x214] ss:$12 sps:$4 sm:$0xff]  }
 0x251   : > { %2088 = vmatpush1.bf16.msra.mxu0 %v7766_v32  ;;  %2511 = vmatpush1.bf16.msra.mxu1 %v7769_v33  ;;  %v7852_v32 = vld [vmem:[%s10447_s5 + $0x210] ss:$12 sps:$4 sm:$0xff]   ;;  %v7855_v33 = vld [vmem:[%s10447_s5 + $0x218] ss:$12 sps:$4 sm:$0xff]  }
 0x252   : > { %2089 = vmatprep.subr.bf16.mxu0 %v7774_v34  ;;  %2512 = vmatprep.subr.bf16.mxu1 %v7777_v35  ;;  %v7858_v34 = vld [vmem:[%s10447_s5 + $0x22c] ss:$12 sps:$4 sm:$0xff]   ;;  %v7856_v35 = vld [vmem:[%s10447_s5 + $0x228] ss:$12 sps:$4 sm:$0xff]  }
 0x255   : > { %2090 = vmatpush1.bf16.msra.mxu0 %v7772_v36  ;;  %2513 = vmatpush1.bf16.msra.mxu1 %v7775_v37  ;;  %v7859_v36 = vld [vmem:[%s10447_s5 + $0x230] ss:$12 sps:$4 sm:$0xff]  }
 0x256   : > { %2091 = vmatprep.subr.bf16.mxu0 %v7780_v38  ;;  %2514 = vmatprep.subr.bf16.mxu1 %v7783_v39  ;;  %v7862_v37 = vld [vmem:[%s10447_s5 + $0x244] ss:$12 sps:$4 sm:$0xff]   ;;  %v7860_v38 = vld [vmem:[%s10447_s5 + $0x240] ss:$12 sps:$4 sm:$0xff]   ;;  %v7863_v39 = vld [vmem:[%s10447_s5 + $0x248] ss:$12 sps:$4 sm:$0xff]  }
 0x259   : > { %2092 = vmatpush1.bf16.msra.mxu0 %v7778_v40  ;;  %2515 = vmatpush1.bf16.msra.mxu1 %v7781_v41  ;;  %v7864_v40 = vld [vmem:[%s10447_s5 + $0x258] ss:$12 sps:$4 sm:$0xff]   ;;  %v7866_v41 = vld [vmem:[%s10447_s5 + $0x25c] ss:$12 sps:$4 sm:$0xff]  }
 0x25a   : > { %2093 = vmatprep.subr.bf16.mxu0 %v7786_v42  ;;  %2516 = vmatprep.subr.bf16.mxu1 %v7789_v43  ;;  %v7867_v42 = vld [vmem:[%s10447_s5 + $0x260] ss:$12 sps:$4 sm:$0xff]  }
 0x25b   : > { %v7870_v43 = vld [vmem:[%s10447_s5 + $0x274] ss:$12 sps:$4 sm:$0xff]  }
 0x25d   : > { %2094 = vmatpush1.bf16.msra.mxu0 %v7784_v44  ;;  %2517 = vmatpush1.bf16.msra.mxu1 %v7787_v45  ;;  %v7868_v44 = vld [vmem:[%s10447_s5 + $0x270] ss:$12 sps:$4 sm:$0xff]   ;;  %v7871_v45 = vld [vmem:[%s10447_s5 + $0x278] ss:$12 sps:$4 sm:$0xff]  }
 0x25e   : > { %2095 = vmatprep.subr.bf16.mxu0 %v7792_v46  ;;  %2518 = vmatprep.subr.bf16.mxu1 %v7795_v47  ;;  %v7874_v46 = vld [vmem:[%s10447_s5 + $0x28c] ss:$12 sps:$4 sm:$0xff]   ;;  %v7872_v47 = vld [vmem:[%s10447_s5 + $0x288] ss:$12 sps:$4 sm:$0xff]  }
 0x261   : > { %2096 = vmatpush1.bf16.msra.mxu0 %v7790_v48  ;;  %2519 = vmatpush1.bf16.msra.mxu1 %v7793_v49  ;;  %v7875_v48 = vld [vmem:[%s10447_s5 + $0x290] ss:$12 sps:$4 sm:$0xff]  }
 0x262   : > { %2097 = vmatprep.subr.bf16.mxu0 %v7798_v50  ;;  %2520 = vmatprep.subr.bf16.mxu1 %v7801_v51  ;;  %v7879_v49 = vld [vmem:[%s10447_s5 + $0x4] ss:$12 sps:$4 sm:$0xff]  }
 0x265   : > { %2098 = vmatpush1.bf16.msra.mxu0 %v7796_v52  ;;  %2521 = vmatpush1.bf16.msra.mxu1 %v7799_v53 }
 0x266   : > { %2099 = vmatprep.subr.bf16.mxu0 %v7804_v54  ;;  %2522 = vmatprep.subr.bf16.mxu1 %v7807_v55 }
 0x269   : > { %2100 = vmatpush1.bf16.msra.mxu0 %v7802_v56  ;;  %2523 = vmatpush1.bf16.msra.mxu1 %v7805_v57 }
 0x26a   : > { %2101 = vmatprep.subr.bf16.mxu0 %v7810_v58  ;;  %2524 = vmatprep.subr.bf16.mxu1 %v7813_v59 }
 0x26d   : > { %2102 = vmatpush1.bf16.msra.mxu0 %v7808_v60  ;;  %2525 = vmatpush1.bf16.msra.mxu1 %v7811_v61 }
 0x26e   : > { %2103 = vmatprep.subr.bf16.mxu0 %v7816_v62  ;;  %2526 = vmatprep.subr.bf16.mxu1 %v7819_v0 }
 0x271   : > { %2104 = vmatpush1.bf16.msra.mxu0 %v7814_v1  ;;  %2527 = vmatpush1.bf16.msra.mxu1 %v7817_v3 }
 0x272   : > { %2938 = vmatprep.subr.bf16.mxu0 %v7822_v4  ;;  %2981 = vmatprep.subr.bf16.mxu1 %v8366_v2 }
 0x274   : > { %2114 = vmatmul.mubr.bf16.vlgmr.msra.gmra.mrb[24].mxu0 %v8947_v63  ;;  %2537 = vmatmul.mubr.bf16.vlgmr.msra.gmra.mrb[16].mxu1 %v8947_v63  ;;  %v7828_v63 = vld [vmem:[%s10447_s5 + $0x180] ss:$12 sps:$4 sm:$0xff]  }
 0x275   : > { %2939 = vmatpush1.bf16.msra.mxu0 %v7820_v5  ;;  %2982 = vmatpush1.bf16.msra.mxu1 %v7823_v6 }
 0x276   : > { %2940 = vmatprep.subr.bf16.mxu0 %v7826_v7  ;;  %2983 = vmatprep.subr.bf16.mxu1 %v8366_v2 }
 0x279   : > { %2941 = vmatpush1.bf16.msra.mxu0 %v7824_v8  ;;  %2984 = vmatpush1.bf16.msra.mxu1 %v7827_v9 }
 0x27a   : > { %2942 = vmatprep.subr.bf16.mxu0 %v7830_v10  ;;  %2985 = vmatprep.subr.bf16.mxu1 %v8366_v2 }
 0x27d   : > { %2943 = vmatpush1.bf16.msra.mxu0 %v7828_v63  ;;  %2986 = vmatpush1.bf16.msra.mxu1 %v7831_v11 }
 0x27e   : > { %2944 = vmatprep.subr.bf16.mxu0 %v7834_v14  ;;  %2987 = vmatprep.subr.bf16.mxu1 %v8366_v2  ;;  %v7877_v14 = vld [vmem:[%s10447_s5] ss:$12 sps:$4 sm:$0xff]  }
 0x281   : > { %2945 = vmatpush1.bf16.msra.mxu0 %v7832_v15  ;;  %2988 = vmatpush1.bf16.msra.mxu1 %v7835_v16  ;;  %v7881_v16 = vld [vmem:[%s10447_s5 + $0x8] ss:$12 sps:$4 sm:$0xff]  }
 0x282   : > { %2946 = vmatprep.subr.bf16.mxu0 %v7838_v17  ;;  %2989 = vmatprep.subr.bf16.mxu1 %v8366_v2 }
 0x285   : > { %2947 = vmatpush1.bf16.msra.mxu0 %v7836_v18  ;;  %2990 = vmatpush1.bf16.msra.mxu1 %v7839_v19  ;;  %v7885_v18 = vld [vmem:[%s10447_s5 + $0x1c] ss:$12 sps:$4 sm:$0xff]  }
 0x286   : > { %2948 = vmatprep.subr.bf16.mxu0 %v7842_v20  ;;  %2991 = vmatprep.subr.bf16.mxu1 %v8366_v2  ;;  %v7883_v20 = vld [vmem:[%s10447_s5 + $0x18] ss:$12 sps:$4 sm:$0xff]  }
 0x289   : > { %2949 = vmatpush1.bf16.msra.mxu0 %v7840_v21  ;;  %2992 = vmatpush1.bf16.msra.mxu1 %v7843_v22  ;;  %v7886_v21 = vld [vmem:[%s10447_s5 + $0x20] ss:$12 sps:$4 sm:$0xff]  }
 0x28a   : > { %2950 = vmatprep.subr.bf16.mxu0 %v7846_v23  ;;  %2993 = vmatprep.subr.bf16.mxu1 %v8366_v2  ;;  %v7889_v22 = vld [vmem:[%s10447_s5 + $0x34] ss:$12 sps:$4 sm:$0xff]   ;;  %v7887_v23 = vld [vmem:[%s10447_s5 + $0x30] ss:$12 sps:$4 sm:$0xff]  }
 0x28d   : > { %2951 = vmatpush1.bf16.msra.mxu0 %v7844_v24  ;;  %2994 = vmatpush1.bf16.msra.mxu1 %v7847_v25  ;;  %v7890_v24 = vld [vmem:[%s10447_s5 + $0x38] ss:$12 sps:$4 sm:$0xff]  }
 0x28e   : > { %2952 = vmatprep.subr.bf16.mxu0 %v7850_v26  ;;  %2995 = vmatprep.subr.bf16.mxu1 %v8366_v2  ;;  %v7893_v25 = vld [vmem:[%s10447_s5 + $0x4c] ss:$12 sps:$4 sm:$0xff]   ;;  %v7891_v26 = vld [vmem:[%s10447_s5 + $0x48] ss:$12 sps:$4 sm:$0xff]  }
 0x291   : > { %2953 = vmatpush1.bf16.msra.mxu0 %v7848_v29  ;;  %2996 = vmatpush1.bf16.msra.mxu1 %v7851_v30  ;;  %v7894_v29 = vld [vmem:[%s10447_s5 + $0x50] ss:$12 sps:$4 sm:$0xff]  }
 0x292   : > { %2997 = vmatprep.subr.bf16.mxu1 %v8366_v2  ;;  %2954 = vmatprep.subr.bf16.mxu0 %v7854_v31  ;;  %v7897_v30 = vld [vmem:[%s10447_s5 + $0x64] ss:$12 sps:$4 sm:$0xff]   ;;  %v7895_v31 = vld [vmem:[%s10447_s5 + $0x60] ss:$12 sps:$4 sm:$0xff]  }
 0x295   : > { %2955 = vmatpush1.bf16.msra.mxu0 %v7852_v32  ;;  %2998 = vmatpush1.bf16.msra.mxu1 %v7855_v33  ;;  %v7898_v32 = vld [vmem:[%s10447_s5 + $0x68] ss:$12 sps:$4 sm:$0xff]  }
 0x296   : > { %2999 = vmatprep.subr.bf16.mxu1 %v8366_v2  ;;  %2956 = vmatprep.subr.bf16.mxu0 %v7858_v34  ;;  %v7901_v33 = vld [vmem:[%s10447_s5 + $0x7c] ss:$12 sps:$4 sm:$0xff]   ;;  %v7899_v34 = vld [vmem:[%s10447_s5 + $0x78] ss:$12 sps:$4 sm:$0xff]  }
 0x299   : > { %2957 = vmatpush1.bf16.msra.mxu0 %v7856_v35  ;;  %3000 = vmatpush1.bf16.msra.mxu1 %v7859_v36  ;;  %v7902_v35 = vld [vmem:[%s10447_s5 + $0x80] ss:$12 sps:$4 sm:$0xff]  }
 0x29a   : > { %3001 = vmatprep.subr.bf16.mxu1 %v8366_v2  ;;  %2958 = vmatprep.subr.bf16.mxu0 %v7862_v37  ;;  %v7905_v36 = vld [vmem:[%s10447_s5 + $0x94] ss:$12 sps:$4 sm:$0xff]   ;;  %v7903_v37 = vld [vmem:[%s10447_s5 + $0x90] ss:$12 sps:$4 sm:$0xff]  }
 0x29d   : > { %2959 = vmatpush1.bf16.msra.mxu0 %v7860_v38  ;;  %3002 = vmatpush1.bf16.msra.mxu1 %v7863_v39  ;;  %v7906_v38 = vld [vmem:[%s10447_s5 + $0x98] ss:$12 sps:$4 sm:$0xff]  }
 0x29e   : > { %3003 = vmatprep.subr.bf16.mxu1 %v8366_v2  ;;  %2960 = vmatprep.subr.bf16.mxu0 %v7866_v41  ;;  %v7909_v39 = vld [vmem:[%s10447_s5 + $0xac] ss:$12 sps:$4 sm:$0xff]   ;;  %v7910_v41 = vld [vmem:[%s10447_s5 + $0xb0] ss:$12 sps:$4 sm:$0xff]  }
 0x2a1   : > { %2961 = vmatpush1.bf16.msra.mxu0 %v7864_v40  ;;  %3004 = vmatpush1.bf16.msra.mxu1 %v7867_v42  ;;  %v7907_v40 = vld [vmem:[%s10447_s5 + $0xa8] ss:$12 sps:$4 sm:$0xff]   ;;  %v7913_v42 = vld [vmem:[%s10447_s5 + $0xc4] ss:$12 sps:$4 sm:$0xff]  }
 0x2a2   : > { %2962 = vmatprep.subr.bf16.mxu0 %v7870_v43  ;;  %3005 = vmatprep.subr.bf16.mxu1 %v8366_v2  ;;  %v7911_v43 = vld [vmem:[%s10447_s5 + $0xc0] ss:$12 sps:$4 sm:$0xff]  }
 0x2a5   : > { %2963 = vmatpush1.bf16.msra.mxu0 %v7868_v44  ;;  %3006 = vmatpush1.bf16.msra.mxu1 %v7871_v45  ;;  %v7914_v44 = vld [vmem:[%s10447_s5 + $0xc8] ss:$12 sps:$4 sm:$0xff]  }
 0x2a6   : > { %2964 = vmatprep.subr.bf16.mxu0 %v7874_v46  ;;  %3007 = vmatprep.subr.bf16.mxu1 %v8366_v2  ;;  %v7917_v45 = vld [vmem:[%s10447_s5 + $0xdc] ss:$12 sps:$4 sm:$0xff]   ;;  %v7915_v46 = vld [vmem:[%s10447_s5 + $0xd8] ss:$12 sps:$4 sm:$0xff]  }
 0x2a9   : > { %2965 = vmatpush1.bf16.msra.mxu0 %v7872_v47  ;;  %3008 = vmatpush1.bf16.msra.mxu1 %v7875_v48  ;;  %v7918_v47 = vld [vmem:[%s10447_s5 + $0xe0] ss:$12 sps:$4 sm:$0xff]  }
 0x2aa   : > { %3298 = vmatprep.subr.bf16.mxu1 %v8366_v2  ;;  %3255 = vmatprep.subr.bf16.mxu0 %v7879_v49  ;;  %v7921_v48 = vld [vmem:[%s10447_s5 + $0xf4] ss:$12 sps:$4 sm:$0xff]   ;;  %v7919_v49 = vld [vmem:[%s10447_s5 + $0xf0] ss:$12 sps:$4 sm:$0xff]  }
 0x347   : > { %v2115_v50 = vpop.f32.mrb[24].mxu0  ;;  %v2538_v51 = vpop.f32.mrb[16].mxu1 }
 0x348   : > { %v2547_v52 = vmax.f32 %v2115_v50, %v2538_v51  ;;  %v2117_v53 = vpop.f32.mrb[25].mxu0  ;;  %v2540_v54 = vpop.f32.mrb[17].mxu1  ;;  %v7922_v50 = vld [vmem:[%s10447_s5 + $0xf8] ss:$12 sps:$4 sm:$0xff]  }
 0x349   : > { %v2548_v55 = vmax.f32 %v2117_v53, %v2540_v54  ;;  %v2119_v56 = vpop.f32.mrb[26].mxu0  ;;  %v2542_v57 = vpop.f32.mrb[18].mxu1  ;;  %v7925_v51 = vld [vmem:[%s10447_s5 + $0x10c] ss:$12 sps:$4 sm:$0xff]   ;;  %v7926_v53 = vld [vmem:[%s10447_s5 + $0x110] ss:$12 sps:$4 sm:$0xff]  }
 0x34a   : > { %v2549_v58 = vmax.f32 %v2119_v56, %v2542_v57  ;;  %v2121_v59 = vpop.f32.mrb[27].mxu0  ;;  %v2544_v60 = vpop.f32.mrb[19].mxu1  ;;  %v7929_v54 = vld [vmem:[%s10447_s5 + $0x124] ss:$12 sps:$4 sm:$0xff]   ;;  %v7930_v56 = vld [vmem:[%s10447_s5 + $0x128] ss:$12 sps:$4 sm:$0xff]  }
 0x34b   : > { %v7369_v61 = vpack.c.bf16 %v2548_v55, %v2547_v52  ;;  %v2550_v62 = vmax.f32 %v2121_v59, %v2544_v60  ;;  %v7923_v52 = vld [vmem:[%s10447_s5 + $0x108] ss:$12 sps:$4 sm:$0xff]   ;;  %v7927_v55 = vld [vmem:[%s10447_s5 + $0x120] ss:$12 sps:$4 sm:$0xff]   ;;  %v7938_v60 = vld [vmem:[%s10447_s5 + $0x2a4] ss:$12 sps:$4 sm:$0xff]  }
 0x34c   : > { %v7933_v57 = vld [vmem:[%s10447_s5 + $0x13c] ss:$12 sps:$4 sm:$0xff]   ;;  %v7934_v59 = vld [vmem:[%s10447_s5 + $0x140] ss:$12 sps:$4 sm:$0xff]  }
 0x34d   : > { %2566 = vst.msk [vmem:[#allocation2] sm:$0xff] %vm2565_vm11, %v7369_v61  ;;  %v7370_v0 = vpack.c.bf16 %v2550_v62, %v2549_v58  ;;  %v7931_v58 = vld [vmem:[%s10447_s5 + $0x138] ss:$12 sps:$4 sm:$0xff]  }
 0x34f   : > { %2570 = vst.msk [vmem:[#allocation2 + $0x8] sm:$0x77] %vm2569_vm12, %v7370_v0  ;;  %v7936_v0 = vld [vmem:[%s10447_s5 + $0x2a0] ss:$12 sps:$4 sm:$0xff]  }
 0x354   : > { %v9236_v1 = vld [vmem:[#allocation2] sm:$0xff] }
 0x355   : > { %v9391_v61 = vld [vmem:[#allocation2] sm:$0xee] }
 0x356   : > { %v9238_v3 = vld [vmem:[#allocation2 + $0x8] sm:$0x33] }
 0x357   : > { %v6681_v4 = vcombine.high %v9236_v1, %v9238_v3  ;;  %v6680_v5 = vcombine.low %v9236_v1, %v9238_v3  ;;  %v9250_v17 = vld [vmem:[#allocation2 + $0x8] sm:$0x11]  ;;  %v6829_v62 = vcombine.high %v9391_v61, %v9238_v3 }
 0x358   : > { %v6727_v19 = vcombine.high %v9236_v1, %v9250_v17 }
 0x359   : > { %v2705_v6 = vshll.u32 %v6681_v4, 16  ;;  %v2698_v7 = vshll.u32 %v6680_v5, 16  ;;  %v2703_v8 = vshrl.u32 %v6681_v4, 16  ;;  %v2696_v10 = vshrl.u32 %v6680_v5, 16  ;;  %v7940_v5 = vld [vmem:[%s10447_s5 + $0x2a8] ss:$12 sps:$4 sm:$0xff]  }
 0x35a   : > { %v6726_v4 = vcombine.low %v9236_v1, %v9250_v17  ;;  %v7941_v1 = vld [vmem:[%s10447_s5 + $0x2b8] ss:$12 sps:$4 sm:$0xff]   ;;  %v7953_v17 = vld [vmem:[%s10447_s5 + $0x300] ss:$12 sps:$4 sm:$0xff]  }
 0x35b   : > { %v2707_v9 = vrot.slane %v2705_v6, 1  ;;  %v2700_v63 = vrot.slane %v2698_v7, 1  ;;  %v3403_v6 = vrot.slane %v6829_v62, 1  ;;  %v7943_v7 = vld [vmem:[%s10447_s5 + $0x2bc] ss:$12 sps:$4 sm:$0xff]  }
 0x35c   : > { %v8002_v62 = vld [vmem:[%s10447_s5 + $0x410] ss:$12 sps:$4 sm:$0xff]  }
 0x35d   : > { %v2708_v11 = vor.u32 %v2707_v9, %v2703_v8  ;;  %v2701_v15 = vor.u32 %v2700_v63, %v2696_v10  ;;  %v7944_v8 = vld [vmem:[%s10447_s5 + $0x2c0] ss:$12 sps:$4 sm:$0xff]   ;;  %v7945_v10 = vld [vmem:[%s10447_s5 + $0x2d0] ss:$12 sps:$4 sm:$0xff]   ;;  %v7948_v63 = vld [vmem:[%s10447_s5 + $0x2d8] ss:$12 sps:$4 sm:$0xff]  }
 0x35e   : > { %v7947_v9 = vld [vmem:[%s10447_s5 + $0x2d4] ss:$12 sps:$4 sm:$0xff]  }
 0x35f   : > { %6724 = vmatprep.mubr.msk.bf16.mxu0 %vm2934_vm13, %v2708_v11  ;;  %6725 = vmatprep.mubr.msk.bf16.mxu1 %vm2934_vm13, %v2708_v11  ;;  %v7951_v11 = vld [vmem:[%s10447_s5 + $0x2ec] ss:$12 sps:$4 sm:$0xff]  }
 0x360   : > { %2971 = vmatmul.mubr.bf16.vlgmr.msra.gmra.mrb[28].mxu0 %v2701_v15  ;;  %3014 = vmatmul.mubr.bf16.vlgmr.msra.gmra.mrb[20].mxu1 %v2701_v15  ;;  %v7952_v15 = vld [vmem:[%s10447_s5 + $0x2f0] ss:$12 sps:$4 sm:$0xff]  }
 0x361   : > { %3256 = vmatpush1.bf16.msra.mxu0 %v7877_v14  ;;  %3299 = vmatpush1.bf16.msra.mxu1 %v7881_v16  ;;  %v7949_v14 = vld [vmem:[%s10447_s5 + $0x2e8] ss:$12 sps:$4 sm:$0xff]   ;;  %v7955_v16 = vld [vmem:[%s10447_s5 + $0x304] ss:$12 sps:$4 sm:$0xff]  }
 0x362   : > { %6770 = vmatprep.mubr.msk.bf16.mxu0 %vm2934_vm13, %v6727_v19  ;;  %6771 = vmatprep.mubr.msk.bf16.mxu1 %vm2934_vm13, %v6727_v19  ;;  %v7959_v19 = vld [vmem:[%s10447_s5 + $0x31c] ss:$12 sps:$4 sm:$0xff]  }
 0x363   : > { %3257 = vmatprep.subr.bf16.mxu0 %v7885_v18  ;;  %3300 = vmatprep.subr.bf16.mxu1 %v8366_v2  ;;  %v7956_v18 = vld [vmem:[%s10447_s5 + $0x308] ss:$12 sps:$4 sm:$0xff]  }
 0x365   : > { %3258 = vmatpush1.bf16.msra.mxu0 %v7883_v20  ;;  %3301 = vmatpush1.bf16.msra.mxu1 %v7886_v21  ;;  %v7957_v20 = vld [vmem:[%s10447_s5 + $0x318] ss:$12 sps:$4 sm:$0xff]   ;;  %v7960_v21 = vld [vmem:[%s10447_s5 + $0x320] ss:$12 sps:$4 sm:$0xff]  }
 0x366   : > { %3259 = vmatprep.subr.bf16.mxu0 %v7889_v22  ;;  %3302 = vmatprep.subr.bf16.mxu1 %v8366_v2  ;;  %v7963_v22 = vld [vmem:[%s10447_s5 + $0x334] ss:$12 sps:$4 sm:$0xff]  }
 0x369   : > { %3260 = vmatpush1.bf16.msra.mxu0 %v7887_v23  ;;  %3303 = vmatpush1.bf16.msra.mxu1 %v7890_v24  ;;  %v7961_v23 = vld [vmem:[%s10447_s5 + $0x330] ss:$12 sps:$4 sm:$0xff]   ;;  %v7964_v24 = vld [vmem:[%s10447_s5 + $0x338] ss:$12 sps:$4 sm:$0xff]  }
 0x36a   : > { %3261 = vmatprep.subr.bf16.mxu0 %v7893_v25  ;;  %3304 = vmatprep.subr.bf16.mxu1 %v8366_v2  ;;  %v7967_v25 = vld [vmem:[%s10447_s5 + $0x34c] ss:$12 sps:$4 sm:$0xff]  }
 0x36d   : > { %3262 = vmatpush1.bf16.msra.mxu0 %v7891_v26  ;;  %3305 = vmatpush1.bf16.msra.mxu1 %v7894_v29  ;;  %v7965_v26 = vld [vmem:[%s10447_s5 + $0x348] ss:$12 sps:$4 sm:$0xff]   ;;  %v7968_v29 = vld [vmem:[%s10447_s5 + $0x350] ss:$12 sps:$4 sm:$0xff]  }
 0x36e   : > { %3263 = vmatprep.subr.bf16.mxu0 %v7897_v30  ;;  %3306 = vmatprep.subr.bf16.mxu1 %v8366_v2  ;;  %v7971_v30 = vld [vmem:[%s10447_s5 + $0x364] ss:$12 sps:$4 sm:$0xff]  }
 0x371   : > { %3264 = vmatpush1.bf16.msra.mxu0 %v7895_v31  ;;  %3307 = vmatpush1.bf16.msra.mxu1 %v7898_v32  ;;  %v7969_v31 = vld [vmem:[%s10447_s5 + $0x360] ss:$12 sps:$4 sm:$0xff]   ;;  %v7972_v32 = vld [vmem:[%s10447_s5 + $0x368] ss:$12 sps:$4 sm:$0xff]  }
 0x372   : > { %3265 = vmatprep.subr.bf16.mxu0 %v7901_v33  ;;  %3308 = vmatprep.subr.bf16.mxu1 %v8366_v2  ;;  %v7975_v33 = vld [vmem:[%s10447_s5 + $0x37c] ss:$12 sps:$4 sm:$0xff]  }
 0x375   : > { %3266 = vmatpush1.bf16.msra.mxu0 %v7899_v34  ;;  %3309 = vmatpush1.bf16.msra.mxu1 %v7902_v35  ;;  %v7973_v34 = vld [vmem:[%s10447_s5 + $0x378] ss:$12 sps:$4 sm:$0xff]   ;;  %v7976_v35 = vld [vmem:[%s10447_s5 + $0x380] ss:$12 sps:$4 sm:$0xff]  }
 0x376   : > { %3267 = vmatprep.subr.bf16.mxu0 %v7905_v36  ;;  %3310 = vmatprep.subr.bf16.mxu1 %v8366_v2  ;;  %v7979_v36 = vld [vmem:[%s10447_s5 + $0x394] ss:$12 sps:$4 sm:$0xff]  }
 0x379   : > { %3268 = vmatpush1.bf16.msra.mxu0 %v7903_v37  ;;  %3311 = vmatpush1.bf16.msra.mxu1 %v7906_v38  ;;  %v7977_v37 = vld [vmem:[%s10447_s5 + $0x390] ss:$12 sps:$4 sm:$0xff]   ;;  %v7980_v38 = vld [vmem:[%s10447_s5 + $0x398] ss:$12 sps:$4 sm:$0xff]  }
 0x37a   : > { %3269 = vmatprep.subr.bf16.mxu0 %v7909_v39  ;;  %3312 = vmatprep.subr.bf16.mxu1 %v8366_v2  ;;  %v7983_v39 = vld [vmem:[%s10447_s5 + $0x3ac] ss:$12 sps:$4 sm:$0xff]  }
 0x37d   : > { %3270 = vmatpush1.bf16.msra.mxu0 %v7907_v40  ;;  %3313 = vmatpush1.bf16.msra.mxu1 %v7910_v41  ;;  %v7981_v40 = vld [vmem:[%s10447_s5 + $0x3a8] ss:$12 sps:$4 sm:$0xff]  }
 0x37e   : > { %3271 = vmatprep.subr.bf16.mxu0 %v7913_v42  ;;  %3314 = vmatprep.subr.bf16.mxu1 %v8366_v2  ;;  %v9512_v41 = vld [vmem:[#allocation2 + $0x8] sm:$0x77]  ;;  %v7984_v42 = vld [vmem:[%s10447_s5 + $0x3b0] ss:$12 sps:$4 sm:$0xff]  }
 0x381   : > { %3272 = vmatpush1.bf16.msra.mxu0 %v7911_v43  ;;  %3315 = vmatpush1.bf16.msra.mxu1 %v7914_v44  ;;  %v7987_v43 = vld [vmem:[%s10447_s5 + $0x3c4] ss:$12 sps:$4 sm:$0xff]   ;;  %v6931_v44 = vcombine.high %v9391_v61, %v9512_v41 }
 0x382   : > { %3273 = vmatprep.subr.bf16.mxu0 %v7917_v45  ;;  %3316 = vmatprep.subr.bf16.mxu1 %v8366_v2  ;;  %v7985_v45 = vld [vmem:[%s10447_s5 + $0x3c0] ss:$12 sps:$4 sm:$0xff]  }
 0x385   : > { %3274 = vmatpush1.bf16.msra.mxu0 %v7915_v46  ;;  %3317 = vmatpush1.bf16.msra.mxu1 %v7918_v47  ;;  %v7988_v46 = vld [vmem:[%s10447_s5 + $0x3c8] ss:$12 sps:$4 sm:$0xff]  }
 0x386   : > { %3275 = vmatprep.subr.bf16.mxu0 %v7921_v48  ;;  %3318 = vmatprep.subr.bf16.mxu1 %v8366_v2  ;;  %v7991_v47 = vld [vmem:[%s10447_s5 + $0x3dc] ss:$12 sps:$4 sm:$0xff]   ;;  %v3794_v48 = vshrl.u32 %v6931_v44, 16 }
 0x389   : > { %3276 = vmatpush1.bf16.msra.mxu0 %v7919_v49  ;;  %3319 = vmatpush1.bf16.msra.mxu1 %v7922_v50  ;;  %v3797_v49 = vshll.u32 %v6931_v44, 16  ;;  %v7989_v50 = vld [vmem:[%s10447_s5 + $0x3d8] ss:$12 sps:$4 sm:$0xff]  }
 0x38a   : > { %3277 = vmatprep.subr.bf16.mxu0 %v7925_v51  ;;  %3320 = vmatprep.subr.bf16.mxu1 %v8366_v2  ;;  %v7992_v51 = vld [vmem:[%s10447_s5 + $0x3e0] ss:$12 sps:$4 sm:$0xff]  }
 0x38d   : > { %3278 = vmatpush1.bf16.msra.mxu0 %v7923_v52  ;;  %3321 = vmatpush1.bf16.msra.mxu1 %v7926_v53  ;;  %v6828_v52 = vcombine.low %v9391_v61, %v9238_v3  ;;  %v7996_v53 = vld [vmem:[%s10447_s5 + $0x3f4] ss:$12 sps:$4 sm:$0xff]   ;;  %v7998_v3 = vld [vmem:[%s10447_s5 + $0x3f8] ss:$12 sps:$4 sm:$0xff]  }
 0x38e   : > { %3279 = vmatprep.subr.bf16.mxu0 %v7929_v54  ;;  %3322 = vmatprep.subr.bf16.mxu1 %v8366_v2  ;;  %v3796_v54 = vrot.slane %v3794_v48, 1 }
 0x391   : > { %3280 = vmatpush1.bf16.msra.mxu0 %v7927_v55  ;;  %3323 = vmatpush1.bf16.msra.mxu1 %v7930_v56  ;;  %v3799_v55 = vrot.slane %v3797_v49, 2  ;;  %v7994_v56 = vld [vmem:[%s10447_s5 + $0x3f0] ss:$12 sps:$4 sm:$0xff]   ;;  %v8052_v49 = vld [vmem:[%s10447_s5 + $0x540] ss:$12 sps:$4 sm:$0xff]  }
 0x392   : > { %3281 = vmatprep.subr.bf16.mxu0 %v7933_v57  ;;  %3324 = vmatprep.subr.bf16.mxu1 %v8366_v2  ;;  %v3402_v57 = vrot.slane %v6828_v52, 1  ;;  %v8059_v52 = vld [vmem:[%s10447_s5 + $0x55c] ss:$12 sps:$4 sm:$0xff]  }
 0x395   : > { %3282 = vmatpush1.bf16.msra.mxu0 %v7931_v58  ;;  %3325 = vmatpush1.bf16.msra.mxu1 %v7934_v59  ;;  %v8001_v58 = vld [vmem:[%s10447_s5 + $0x40c] ss:$12 sps:$4 sm:$0xff]   ;;  %v3800_v59 = vor.u32 %v3799_v55, %v3796_v54 }
 0x396   : > { %3632 = vmatprep.subr.bf16.mxu0 %v7938_v60  ;;  %3675 = vmatprep.subr.bf16.mxu1 %v8366_v2  ;;  %v7999_v60 = vld [vmem:[%s10447_s5 + $0x408] ss:$12 sps:$4 sm:$0xff]   ;;  %v8057_v54 = vld [vmem:[%s10447_s5 + $0x558] ss:$12 sps:$4 sm:$0xff]   ;;  %v8060_v55 = vld [vmem:[%s10447_s5 + $0x560] ss:$12 sps:$4 sm:$0xff]  }
 0x398   : > { %3288 = vmatmul.mubr.bf16.vlgmr.msra.gmra.mrb[28].mxu0 %v6726_v4  ;;  %3331 = vmatmul.mubr.bf16.vlgmr.msra.gmra.mrb[24].mxu1 %v6726_v4  ;;  %v8003_v4 = vld [vmem:[%s10447_s5 + $0x420] ss:$12 sps:$4 sm:$0xff]  }
 0x399   : > { %3633 = vmatpush1.bf16.msra.mxu0 %v7936_v0  ;;  %6872 = vmatprep.mubr.msk.bf16.mxu0 %vm2934_vm13, %v3403_v6  ;;  %v8005_v0 = vld [vmem:[%s10447_s5 + $0x424] ss:$12 sps:$4 sm:$0xff]  }
 0x39a   : > { %3676 = vmatpush1.bf16.msra.mxu1 %v7940_v5  ;;  %6873 = vmatprep.mubr.msk.bf16.mxu1 %vm2934_vm13, %v3403_v6  ;;  %v8006_v5 = vld [vmem:[%s10447_s5 + $0x428] ss:$12 sps:$4 sm:$0xff]  }
 0x39b   : > { %3634 = vmatprep.subr.bf16.mxu0 %v7943_v7  ;;  %3677 = vmatprep.subr.bf16.mxu1 %v8366_v2  ;;  %v8009_v6 = vld [vmem:[%s10447_s5 + $0x43c] ss:$12 sps:$4 sm:$0xff]   ;;  %v8007_v7 = vld [vmem:[%s10447_s5 + $0x438] ss:$12 sps:$4 sm:$0xff]  }
 0x39d   : > { %3635 = vmatpush1.bf16.msra.mxu0 %v7941_v1  ;;  %v8010_v1 = vld [vmem:[%s10447_s5 + $0x440] ss:$12 sps:$4 sm:$0xff]  }
 0x39e   : > { %3678 = vmatpush1.bf16.msra.mxu1 %v7944_v8  ;;  %3636 = vmatprep.subr.bf16.mxu0 %v7947_v9  ;;  %v8013_v8 = vld [vmem:[%s10447_s5 + $0x454] ss:$12 sps:$4 sm:$0xff]   ;;  %v8011_v9 = vld [vmem:[%s10447_s5 + $0x450] ss:$12 sps:$4 sm:$0xff]  }
 0x39f   : > { %3679 = vmatprep.subr.bf16.mxu1 %v8366_v2 }
 0x3a1   : > { %3637 = vmatpush1.bf16.msra.mxu0 %v7945_v10  ;;  %v8014_v10 = vld [vmem:[%s10447_s5 + $0x458] ss:$12 sps:$4 sm:$0xff]  }
 0x3a2   : > { %3680 = vmatpush1.bf16.msra.mxu1 %v7948_v63  ;;  %3638 = vmatprep.subr.bf16.mxu0 %v7951_v11  ;;  %v8017_v63 = vld [vmem:[%s10447_s5 + $0x46c] ss:$12 sps:$4 sm:$0xff]   ;;  %v8015_v11 = vld [vmem:[%s10447_s5 + $0x468] ss:$12 sps:$4 sm:$0xff]  }
 0x3a3   : > { %3681 = vmatprep.subr.bf16.mxu1 %v8366_v2 }
 0x3a5   : > { %3639 = vmatpush1.bf16.msra.mxu0 %v7949_v14  ;;  %v8018_v14 = vld [vmem:[%s10447_s5 + $0x470] ss:$12 sps:$4 sm:$0xff]  }
 0x3a6   : > { %3682 = vmatpush1.bf16.msra.mxu1 %v7952_v15  ;;  %3640 = vmatprep.subr.bf16.mxu0 %v7955_v16  ;;  %v8021_v15 = vld [vmem:[%s10447_s5 + $0x484] ss:$12 sps:$4 sm:$0xff]   ;;  %v8019_v16 = vld [vmem:[%s10447_s5 + $0x480] ss:$12 sps:$4 sm:$0xff]  }
 0x3a7   : > { %3683 = vmatprep.subr.bf16.mxu1 %v8366_v2 }
 0x3a9   : > { %3641 = vmatpush1.bf16.msra.mxu0 %v7953_v17  ;;  %v8022_v17 = vld [vmem:[%s10447_s5 + $0x488] ss:$12 sps:$4 sm:$0xff]  }
 0x3aa   : > { %3684 = vmatpush1.bf16.msra.mxu1 %v7956_v18  ;;  %3642 = vmatprep.subr.bf16.mxu0 %v7959_v19  ;;  %v8025_v18 = vld [vmem:[%s10447_s5 + $0x49c] ss:$12 sps:$4 sm:$0xff]   ;;  %v8023_v19 = vld [vmem:[%s10447_s5 + $0x498] ss:$12 sps:$4 sm:$0xff]  }
 0x3ab   : > { %3685 = vmatprep.subr.bf16.mxu1 %v8366_v2 }
 0x3ad   : > { %3643 = vmatpush1.bf16.msra.mxu0 %v7957_v20  ;;  %v8026_v20 = vld [vmem:[%s10447_s5 + $0x4a0] ss:$12 sps:$4 sm:$0xff]  }
 0x3ae   : > { %3686 = vmatpush1.bf16.msra.mxu1 %v7960_v21  ;;  %3644 = vmatprep.subr.bf16.mxu0 %v7963_v22  ;;  %v8029_v21 = vld [vmem:[%s10447_s5 + $0x4b4] ss:$12 sps:$4 sm:$0xff]   ;;  %v8027_v22 = vld [vmem:[%s10447_s5 + $0x4b0] ss:$12 sps:$4 sm:$0xff]  }
 0x3af   : > { %3687 = vmatprep.subr.bf16.mxu1 %v8366_v2 }
 0x3b1   : > { %3645 = vmatpush1.bf16.msra.mxu0 %v7961_v23  ;;  %v8030_v23 = vld [vmem:[%s10447_s5 + $0x4b8] ss:$12 sps:$4 sm:$0xff]  }
 0x3b2   : > { %3688 = vmatpush1.bf16.msra.mxu1 %v7964_v24  ;;  %3646 = vmatprep.subr.bf16.mxu0 %v7967_v25  ;;  %v8033_v24 = vld [vmem:[%s10447_s5 + $0x4cc] ss:$12 sps:$4 sm:$0xff]   ;;  %v8031_v25 = vld [vmem:[%s10447_s5 + $0x4c8] ss:$12 sps:$4 sm:$0xff]  }
 0x3b3   : > { %3689 = vmatprep.subr.bf16.mxu1 %v8366_v2 }
 0x3b5   : > { %3647 = vmatpush1.bf16.msra.mxu0 %v7965_v26  ;;  %v8034_v26 = vld [vmem:[%s10447_s5 + $0x4d0] ss:$12 sps:$4 sm:$0xff]  }
 0x3b6   : > { %3690 = vmatpush1.bf16.msra.mxu1 %v7968_v29  ;;  %3648 = vmatprep.subr.bf16.mxu0 %v7971_v30  ;;  %v8037_v29 = vld [vmem:[%s10447_s5 + $0x4e4] ss:$12 sps:$4 sm:$0xff]   ;;  %v8035_v30 = vld [vmem:[%s10447_s5 + $0x4e0] ss:$12 sps:$4 sm:$0xff]  }
 0x3b7   : > { %3691 = vmatprep.subr.bf16.mxu1 %v8366_v2 }
 0x3b9   : > { %3649 = vmatpush1.bf16.msra.mxu0 %v7969_v31  ;;  %v8038_v31 = vld [vmem:[%s10447_s5 + $0x4e8] ss:$12 sps:$4 sm:$0xff]  }
 0x3ba   : > { %3692 = vmatpush1.bf16.msra.mxu1 %v7972_v32  ;;  %3650 = vmatprep.subr.bf16.mxu0 %v7975_v33  ;;  %v8041_v32 = vld [vmem:[%s10447_s5 + $0x4fc] ss:$12 sps:$4 sm:$0xff]   ;;  %v8039_v33 = vld [vmem:[%s10447_s5 + $0x4f8] ss:$12 sps:$4 sm:$0xff]  }
 0x3bb   : > { %3693 = vmatprep.subr.bf16.mxu1 %v8366_v2 }
 0x3bd   : > { %3651 = vmatpush1.bf16.msra.mxu0 %v7973_v34  ;;  %v8042_v34 = vld [vmem:[%s10447_s5 + $0x500] ss:$12 sps:$4 sm:$0xff]  }
 0x3be   : > { %3694 = vmatpush1.bf16.msra.mxu1 %v7976_v35  ;;  %3652 = vmatprep.subr.bf16.mxu0 %v7979_v36  ;;  %v8045_v35 = vld [vmem:[%s10447_s5 + $0x514] ss:$12 sps:$4 sm:$0xff]   ;;  %v6930_v36 = vcombine.low %v9391_v61, %v9512_v41 }
 0x3bf   : > { %3695 = vmatprep.subr.bf16.mxu1 %v8366_v2  ;;  %v8047_v61 = vld [vmem:[%s10447_s5 + $0x528] ss:$12 sps:$4 sm:$0xff]  }
 0x3c1   : > { %3653 = vmatpush1.bf16.msra.mxu0 %v7977_v37  ;;  %v8043_v37 = vld [vmem:[%s10447_s5 + $0x510] ss:$12 sps:$4 sm:$0xff]  }
 0x3c2   : > { %3696 = vmatpush1.bf16.msra.mxu1 %v7980_v38  ;;  %3654 = vmatprep.subr.bf16.mxu0 %v7983_v39  ;;  %v8046_v38 = vld [vmem:[%s10447_s5 + $0x518] ss:$12 sps:$4 sm:$0xff]  }
 0x3c3   : > { %3697 = vmatprep.subr.bf16.mxu1 %v8366_v2  ;;  %v8049_v39 = vld [vmem:[%s10447_s5 + $0x52c] ss:$12 sps:$4 sm:$0xff]  }
 0x3c5   : > { %3655 = vmatpush1.bf16.msra.mxu0 %v7981_v40  ;;  %v3786_v40 = vshrl.u32 %v6930_v36, 16 }
 0x3c6   : > { %3698 = vmatpush1.bf16.msra.mxu1 %v7984_v42  ;;  %3656 = vmatprep.subr.bf16.mxu0 %v7987_v43  ;;  %v3789_v42 = vshll.u32 %v6930_v36, 16  ;;  %v8050_v43 = vld [vmem:[%s10447_s5 + $0x530] ss:$12 sps:$4 sm:$0xff]   ;;  %v8105_v36 = vld [vmem:[%s10447_s5 + $0x678] ss:$12 sps:$4 sm:$0xff]  }
 0x3c7   : > { %3699 = vmatprep.subr.bf16.mxu1 %v8366_v2  ;;  %v3788_v44 = vrot.slane %v3786_v40, 1 }
 0x3c9   : > { %3657 = vmatpush1.bf16.msra.mxu0 %v7985_v45  ;;  %v3791_v45 = vrot.slane %v3789_v42, 2 }
 0x3ca   : > { %3700 = vmatpush1.bf16.msra.mxu1 %v7988_v46  ;;  %3658 = vmatprep.subr.bf16.mxu0 %v7991_v47  ;;  %v8054_v46 = vld [vmem:[%s10447_s5 + $0x544] ss:$12 sps:$4 sm:$0xff]  }
 0x3cb   : > { %3701 = vmatprep.subr.bf16.mxu1 %v8366_v2  ;;  %v9689_v47 = vld [vmem:[#allocation2] sm:$0xcc] }
 0x3cc   : > { %v7033_v48 = vcombine.high %v9689_v47, %v9512_v41 }
 0x3cd   : > { %3659 = vmatpush1.bf16.msra.mxu0 %v7989_v50  ;;  %v3792_v50 = vor.u32 %v3791_v45, %v3788_v44 }
 0x3ce   : > { %3702 = vmatpush1.bf16.msra.mxu1 %v7992_v51  ;;  %4029 = vmatprep.subr.bf16.mxu0 %v7996_v53  ;;  %v8056_v51 = vld [vmem:[%s10447_s5 + $0x548] ss:$12 sps:$4 sm:$0xff]   ;;  %v4183_v53 = vrot.slane %v7033_v48, 2 }
 0x3cf   : > { %4072 = vmatprep.subr.bf16.mxu1 %v8366_v2 }
 0x3d0   : > { %3665 = vmatmul.mubr.bf16.vlgmr.msra.gmra.mrb[28].mxu0 %v3402_v57 }
 0x3d1   : > { %3708 = vmatmul.mubr.bf16.vlgmr.msra.gmra.mrb[28].mxu1 %v3402_v57  ;;  %4030 = vmatpush1.bf16.msra.mxu0 %v7994_v56  ;;  %v8063_v56 = vld [vmem:[%s10447_s5 + $0x574] ss:$12 sps:$4 sm:$0xff]   ;;  %v8061_v57 = vld [vmem:[%s10447_s5 + $0x570] ss:$12 sps:$4 sm:$0xff]  }
 0x3d2   : > { %6974 = vmatprep.mubr.msk.bf16.mxu0 %vm2934_vm13, %v3800_v59  ;;  %4073 = vmatpush1.bf16.msra.mxu1 %v7998_v3  ;;  %v8064_v3 = vld [vmem:[%s10447_s5 + $0x578] ss:$12 sps:$4 sm:$0xff]  }
 0x3d3   : > { %6975 = vmatprep.mubr.msk.bf16.mxu1 %vm2934_vm13, %v3800_v59  ;;  %4031 = vmatprep.subr.bf16.mxu0 %v8001_v58  ;;  %v8067_v58 = vld [vmem:[%s10447_s5 + $0x58c] ss:$12 sps:$4 sm:$0xff]   ;;  %v8065_v59 = vld [vmem:[%s10447_s5 + $0x588] ss:$12 sps:$4 sm:$0xff]  }
 0x3d4   : > { %4074 = vmatprep.subr.bf16.mxu1 %v8366_v2 }
 0x3d5   : > { %4032 = vmatpush1.bf16.msra.mxu0 %v7999_v60  ;;  %v8068_v60 = vld [vmem:[%s10447_s5 + $0x590] ss:$12 sps:$4 sm:$0xff]  }
 0x3d6   : > { %4075 = vmatpush1.bf16.msra.mxu1 %v8002_v62  ;;  %4033 = vmatprep.subr.bf16.mxu0 %v8005_v0  ;;  %v8071_v62 = vld [vmem:[%s10447_s5 + $0x5a4] ss:$12 sps:$4 sm:$0xff]   ;;  %v8069_v0 = vld [vmem:[%s10447_s5 + $0x5a0] ss:$12 sps:$4 sm:$0xff]  }
 0x3d7   : > { %4076 = vmatprep.subr.bf16.mxu1 %v8366_v2 }
 0x3d9   : > { %4034 = vmatpush1.bf16.msra.mxu0 %v8003_v4  ;;  %v8072_v4 = vld [vmem:[%s10447_s5 + $0x5a8] ss:$12 sps:$4 sm:$0xff]  }
 0x3da   : > { %4077 = vmatpush1.bf16.msra.mxu1 %v8006_v5  ;;  %4035 = vmatprep.subr.bf16.mxu0 %v8009_v6  ;;  %v8075_v5 = vld [vmem:[%s10447_s5 + $0x5bc] ss:$12 sps:$4 sm:$0xff]   ;;  %v8073_v6 = vld [vmem:[%s10447_s5 + $0x5b8] ss:$12 sps:$4 sm:$0xff]  }
 0x3db   : > { %4078 = vmatprep.subr.bf16.mxu1 %v8366_v2 }
 0x3dd   : > { %4036 = vmatpush1.bf16.msra.mxu0 %v8007_v7  ;;  %v8076_v7 = vld [vmem:[%s10447_s5 + $0x5c0] ss:$12 sps:$4 sm:$0xff]  }
 0x3de   : > { %4079 = vmatpush1.bf16.msra.mxu1 %v8010_v1  ;;  %4037 = vmatprep.subr.bf16.mxu0 %v8013_v8  ;;  %v8079_v1 = vld [vmem:[%s10447_s5 + $0x5d4] ss:$12 sps:$4 sm:$0xff]   ;;  %v8077_v8 = vld [vmem:[%s10447_s5 + $0x5d0] ss:$12 sps:$4 sm:$0xff]  }
 0x3df   : > { %4080 = vmatprep.subr.bf16.mxu1 %v8366_v2 }
 0x3e1   : > { %4038 = vmatpush1.bf16.msra.mxu0 %v8011_v9  ;;  %v8080_v9 = vld [vmem:[%s10447_s5 + $0x5d8] ss:$12 sps:$4 sm:$0xff]  }
 0x3e2   : > { %4081 = vmatpush1.bf16.msra.mxu1 %v8014_v10  ;;  %4039 = vmatprep.subr.bf16.mxu0 %v8017_v63  ;;  %v8083_v10 = vld [vmem:[%s10447_s5 + $0x5ec] ss:$12 sps:$4 sm:$0xff]   ;;  %v8081_v63 = vld [vmem:[%s10447_s5 + $0x5e8] ss:$12 sps:$4 sm:$0xff]  }
 0x3e3   : > { %4082 = vmatprep.subr.bf16.mxu1 %v8366_v2 }
 0x3e5   : > { %4040 = vmatpush1.bf16.msra.mxu0 %v8015_v11  ;;  %v8084_v11 = vld [vmem:[%s10447_s5 + $0x5f0] ss:$12 sps:$4 sm:$0xff]  }
 0x3e6   : > { %4083 = vmatpush1.bf16.msra.mxu1 %v8018_v14  ;;  %4041 = vmatprep.subr.bf16.mxu0 %v8021_v15  ;;  %v8087_v14 = vld [vmem:[%s10447_s5 + $0x604] ss:$12 sps:$4 sm:$0xff]   ;;  %v8085_v15 = vld [vmem:[%s10447_s5 + $0x600] ss:$12 sps:$4 sm:$0xff]  }
 0x3e7   : > { %4084 = vmatprep.subr.bf16.mxu1 %v8366_v2 }
 0x3e9   : > { %4042 = vmatpush1.bf16.msra.mxu0 %v8019_v16  ;;  %v8088_v16 = vld [vmem:[%s10447_s5 + $0x608] ss:$12 sps:$4 sm:$0xff]  }
 0x3ea   : > { %4085 = vmatpush1.bf16.msra.mxu1 %v8022_v17  ;;  %4043 = vmatprep.subr.bf16.mxu0 %v8025_v18  ;;  %v8091_v17 = vld [vmem:[%s10447_s5 + $0x61c] ss:$12 sps:$4 sm:$0xff]   ;;  %v8089_v18 = vld [vmem:[%s10447_s5 + $0x618] ss:$12 sps:$4 sm:$0xff]  }
 0x3eb   : > { %4086 = vmatprep.subr.bf16.mxu1 %v8366_v2 }
 0x3ed   : > { %4044 = vmatpush1.bf16.msra.mxu0 %v8023_v19  ;;  %v8092_v19 = vld [vmem:[%s10447_s5 + $0x620] ss:$12 sps:$4 sm:$0xff]  }
 0x3ee   : > { %4087 = vmatpush1.bf16.msra.mxu1 %v8026_v20  ;;  %4045 = vmatprep.subr.bf16.mxu0 %v8029_v21  ;;  %v8095_v20 = vld [vmem:[%s10447_s5 + $0x634] ss:$12 sps:$4 sm:$0xff]   ;;  %v8093_v21 = vld [vmem:[%s10447_s5 + $0x630] ss:$12 sps:$4 sm:$0xff]  }
 0x3ef   : > { %4088 = vmatprep.subr.bf16.mxu1 %v8366_v2 }
 0x3f1   : > { %4046 = vmatpush1.bf16.msra.mxu0 %v8027_v22  ;;  %v8096_v22 = vld [vmem:[%s10447_s5 + $0x638] ss:$12 sps:$4 sm:$0xff]  }
 0x3f2   : > { %4089 = vmatpush1.bf16.msra.mxu1 %v8030_v23  ;;  %4047 = vmatprep.subr.bf16.mxu0 %v8033_v24  ;;  %v8099_v23 = vld [vmem:[%s10447_s5 + $0x64c] ss:$12 sps:$4 sm:$0xff]   ;;  %v8097_v24 = vld [vmem:[%s10447_s5 + $0x648] ss:$12 sps:$4 sm:$0xff]  }
 0x3f3   : > { %4090 = vmatprep.subr.bf16.mxu1 %v8366_v2 }
 0x3f5   : > { %4048 = vmatpush1.bf16.msra.mxu0 %v8031_v25  ;;  %v8100_v25 = vld [vmem:[%s10447_s5 + $0x650] ss:$12 sps:$4 sm:$0xff]  }
 0x3f6   : > { %4091 = vmatpush1.bf16.msra.mxu1 %v8034_v26  ;;  %4049 = vmatprep.subr.bf16.mxu0 %v8037_v29  ;;  %v8103_v26 = vld [vmem:[%s10447_s5 + $0x664] ss:$12 sps:$4 sm:$0xff]  }
 0x3f7   : > { %4092 = vmatprep.subr.bf16.mxu1 %v8366_v2 }
 0x3f9   : > { %4050 = vmatpush1.bf16.msra.mxu0 %v8035_v30 }
 0x3fa   : > { %4093 = vmatpush1.bf16.msra.mxu1 %v8038_v31  ;;  %4051 = vmatprep.subr.bf16.mxu0 %v8041_v32  ;;  %v8101_v32 = vld [vmem:[%s10447_s5 + $0x660] ss:$12 sps:$4 sm:$0xff]  }
 0x3fb   : > { %4094 = vmatprep.subr.bf16.mxu1 %v8366_v2 }
 0x3fd   : > { %4052 = vmatpush1.bf16.msra.mxu0 %v8039_v33 }
 0x3fe   : > { %4095 = vmatpush1.bf16.msra.mxu1 %v8042_v34  ;;  %4053 = vmatprep.subr.bf16.mxu0 %v8045_v35  ;;  %v8104_v34 = vld [vmem:[%s10447_s5 + $0x668] ss:$12 sps:$4 sm:$0xff]  }
 0x3ff   : > { %4096 = vmatprep.subr.bf16.mxu1 %v8366_v2  ;;  %v8107_v35 = vld [vmem:[%s10447_s5 + $0x67c] ss:$12 sps:$4 sm:$0xff]  }
 0x401   : > { %4054 = vmatpush1.bf16.msra.mxu0 %v8043_v37  ;;  %v8108_v37 = vld [vmem:[%s10447_s5 + $0x680] ss:$12 sps:$4 sm:$0xff]  }
 0x402   : > { %4097 = vmatpush1.bf16.msra.mxu1 %v8046_v38  ;;  %4055 = vmatprep.subr.bf16.mxu0 %v8049_v39  ;;  %v7032_v38 = vcombine.low %v9689_v47, %v9512_v41 }
 0x403   : > { %4098 = vmatprep.subr.bf16.mxu1 %v8366_v2 }
 0x404   : > { %v4182_v39 = vrot.slane %v7032_v38, 2  ;;  %v8127_v38 = vld [vmem:[%s10450_s8 + $0x164] ss:$8 sps:$4 sm:$0xff]  }
 0x405   : > { %4056 = vmatpush1.bf16.msra.mxu0 %v8047_v61 }
 0x406   : > { %4099 = vmatpush1.bf16.msra.mxu1 %v8050_v43  ;;  %4412 = vmatprep.subr.bf16.mxu0 %v8054_v46  ;;  %v8367_v46 = vmov 0.0  }
 0x407   : > { %4455 = vmatprep.subr.bf16.mxu1 %v8366_v2 }
 0x408   : > { %4062 = vmatmul.mubr.bf16.vlgmr.msra.gmra.mrb[28].mxu0 %v3792_v50 }
 0x409   : > { %4105 = vmatmul.mubr.bf16.vlgmr.msra.gmra.mrb[32].mxu1 %v3792_v50  ;;  %4413 = vmatpush1.bf16.msra.mxu0 %v8052_v49 }
 0x40a   : > { %7076 = vmatprep.mubr.msk.bf16.mxu0 %vm2934_vm13, %v4183_v53  ;;  %4456 = vmatpush1.bf16.msra.mxu1 %v8056_v51 }
 0x40b   : > { %7077 = vmatprep.mubr.msk.bf16.mxu1 %vm2934_vm13, %v4183_v53  ;;  %4414 = vmatprep.subr.bf16.mxu0 %v8059_v52 }
 0x40c   : > { %4457 = vmatprep.subr.bf16.mxu1 %v8366_v2 }
 0x40d   : > { %4415 = vmatpush1.bf16.msra.mxu0 %v8057_v54 }
 0x40e   : > { %4458 = vmatpush1.bf16.msra.mxu1 %v8060_v55  ;;  %4416 = vmatprep.subr.bf16.mxu0 %v8063_v56 }
 0x40f   : > { %4459 = vmatprep.subr.bf16.mxu1 %v8366_v2 }
 0x411   : > { %4417 = vmatpush1.bf16.msra.mxu0 %v8061_v57 }
 0x412   : > { %4460 = vmatpush1.bf16.msra.mxu1 %v8064_v3  ;;  %4418 = vmatprep.subr.bf16.mxu0 %v8067_v58  ;;  %v4502_v3 = vld [vmem:[%s10448_s6] sm:$0x7] }
 0x413   : > { %4461 = vmatprep.subr.bf16.mxu1 %v8366_v2  ;;  %v4507_v58 = vrot.slane %v4502_v3, %v1421_v12 }
 0x415   : > { %4419 = vmatpush1.bf16.msra.mxu0 %v8065_v59  ;;  %v4511_v59 = vrot.slane %v4502_v3, %v1425_v13 }
 0x416   : > { %4462 = vmatpush1.bf16.msra.mxu1 %v8068_v60  ;;  %4420 = vmatprep.subr.bf16.mxu0 %v8071_v62  ;;  %v4515_v62 = vrot.slane %v4502_v3, %v1429_v28  ;;  %v8157_v3 = vld [vmem:[%s10450_s8 + $0x1b4] ss:$8 sps:$4 sm:$0xff]  }
 0x417   : > { %4463 = vmatprep.subr.bf16.mxu1 %v8366_v2 }
 0x419   : > { %4421 = vmatpush1.bf16.msra.mxu0 %v8069_v0 }
 0x41a   : > { %4464 = vmatpush1.bf16.msra.mxu1 %v8072_v4  ;;  %4422 = vmatprep.subr.bf16.mxu0 %v8075_v5 }
 0x41b   : > { %4465 = vmatprep.subr.bf16.mxu1 %v8366_v2 }
 0x41d   : > { %4423 = vmatpush1.bf16.msra.mxu0 %v8073_v6 }
 0x41e   : > { %4466 = vmatpush1.bf16.msra.mxu1 %v8076_v7  ;;  %4424 = vmatprep.subr.bf16.mxu0 %v8079_v1 }
 0x41f   : > { %4467 = vmatprep.subr.bf16.mxu1 %v8366_v2 }
 0x421   : > { %4425 = vmatpush1.bf16.msra.mxu0 %v8077_v8 }
 0x422   : > { %4468 = vmatpush1.bf16.msra.mxu1 %v8080_v9  ;;  %4426 = vmatprep.subr.bf16.mxu0 %v8083_v10 }
 0x423   : > { %4469 = vmatprep.subr.bf16.mxu1 %v8366_v2 }
 0x425   : > { %4427 = vmatpush1.bf16.msra.mxu0 %v8081_v63 }
 0x426   : > { %4470 = vmatpush1.bf16.msra.mxu1 %v8084_v11  ;;  %4428 = vmatprep.subr.bf16.mxu0 %v8087_v14 }
 0x427   : > { %4471 = vmatprep.subr.bf16.mxu1 %v8366_v2 }
 0x429   : > { %4429 = vmatpush1.bf16.msra.mxu0 %v8085_v15 }
 0x42a   : > { %4472 = vmatpush1.bf16.msra.mxu1 %v8088_v16  ;;  %4430 = vmatprep.subr.bf16.mxu0 %v8091_v17 }
 0x42b   : > { %4473 = vmatprep.subr.bf16.mxu1 %v8366_v2 }
 0x42d   : > { %4431 = vmatpush1.bf16.msra.mxu0 %v8089_v18 }
 0x42e   : > { %4474 = vmatpush1.bf16.msra.mxu1 %v8092_v19  ;;  %4432 = vmatprep.subr.bf16.mxu0 %v8095_v20 }
 0x42f   : > { %4475 = vmatprep.subr.bf16.mxu1 %v8366_v2 }
 0x431   : > { %4433 = vmatpush1.bf16.msra.mxu0 %v8093_v21 }
 0x432   : > { %4476 = vmatpush1.bf16.msra.mxu1 %v8096_v22  ;;  %4434 = vmatprep.subr.bf16.mxu0 %v8099_v23 }
 0x433   : > { %v3015_v29 = vpop.f32.mrb[20].mxu1  ;;  %4477 = vmatprep.subr.bf16.mxu1 %v8366_v2 }
 0x434   : > { %v3017_v30 = vpop.f32.mrb[21].mxu1 }
 0x435   : > { %4435 = vmatpush1.bf16.msra.mxu0 %v8097_v24  ;;  %v3018_v31 = vpop.f32.mrb[22].mxu1  ;;  %v4534_v24 = vld [vmem:[%s10449_s7] sm:$0x7]  ;;  %v7081_v30 = vld [vmem:[%s10449_s7 + $0x4] sm:$0x7] }
 0x436   : > { %4478 = vmatpush1.bf16.msra.mxu1 %v8100_v25  ;;  %v3020_v33 = vpop.f32.mrb[23].mxu1  ;;  %4436 = vmatprep.subr.bf16.mxu0 %v8103_v26  ;;  %v8112_v26 = vld [vmem:[%s10450_s8 + $0x4] ss:$8 sps:$4 sm:$0xff]  }
 0x437   : > { %4479 = vmatprep.subr.bf16.mxu1 %v8366_v2  ;;  %v8113_v33 = vld [vmem:[%s10450_s8 + $0x140] ss:$8 sps:$4 sm:$0xff]  }
 0x439   : > { %4437 = vmatpush1.bf16.msra.mxu0 %v8101_v32  ;;  %v8118_v32 = vld [vmem:[%s10450_s8 + $0x14] ss:$8 sps:$4 sm:$0xff]  }
 0x43a   : > { %4480 = vmatpush1.bf16.msra.mxu1 %v8104_v34  ;;  %4438 = vmatprep.subr.bf16.mxu0 %v8107_v35  ;;  %v8121_v34 = vld [vmem:[%s10450_s8 + $0x154] ss:$8 sps:$4 sm:$0xff]   ;;  %v8116_v35 = vld [vmem:[%s10450_s8 + $0x10] ss:$8 sps:$4 sm:$0xff]  }
 0x43b   : > { %4481 = vmatprep.subr.bf16.mxu1 %v8366_v2 }
 0x43d   : > { %4439 = vmatpush1.bf16.msra.mxu0 %v8105_v36  ;;  %v8124_v36 = vld [vmem:[%s10450_s8 + $0x24] ss:$8 sps:$4 sm:$0xff]  }
 0x43e   : > { %4482 = vmatpush1.bf16.msra.mxu1 %v8108_v37  ;;  %v8119_v37 = vld [vmem:[%s10450_s8 + $0x150] ss:$8 sps:$4 sm:$0xff]  }
 0x43f   : > { %7394 = vmatprep.subr.bf16.mxu1 %v8367_v46 }
 0x440   : > { %4445 = vmatmul.mubr.bf16.vlgmr.msra.gmra.mrb[28].mxu0 %v4182_v39 }
 0x441   : > { %4488 = vmatmul.mubr.bf16.vlgmr.msra.gmra.mrb[36].mxu1 %v4182_v39  ;;  %4581 = vmatprep.mubr.bf16.mxu0 %v8366_v2  ;;  %v8122_v39 = vld [vmem:[%s10450_s8 + $0x20] ss:$8 sps:$4 sm:$0xff]  }
 0x442   : > { %7396 = vmatprep.mubr.msk.bf16.mxu1 %vm8368_vm14, %v8367_v46 }
 0x46b   : > { %v3332_v40 = vpop.f32.mrb[24].mxu1 }
 0x46c   : > { %v3333_v42 = vadd.f32 %v3332_v40, %v3015_v29  ;;  %v3334_v61 = vpop.f32.mrb[25].mxu1  ;;  %v8115_v29 = vld [vmem:[%s10450_s8 + $0x144] ss:$8 sps:$4 sm:$0xff]   ;;  %v8130_v40 = vld [vmem:[%s10450_s8 + $0x34] ss:$8 sps:$4 sm:$0xff]  }
 0x46d   : > { %v3335_v43 = vpop.f32.mrb[26].mxu1  ;;  %v8133_v61 = vld [vmem:[%s10450_s8 + $0x174] ss:$8 sps:$4 sm:$0xff]  }
 0x46e   : > { %v3336_v44 = vadd.f32 %v3335_v43, %v3018_v31  ;;  %v3337_v45 = vpop.f32.mrb[27].mxu1  ;;  %v8110_v31 = vld [vmem:[%s10450_s8] ss:$8 sps:$4 sm:$0xff]   ;;  %v8128_v43 = vld [vmem:[%s10450_s8 + $0x30] ss:$8 sps:$4 sm:$0xff]  }
 0x46f   : > { %v8131_v45 = vld [vmem:[%s10450_s8 + $0x170] ss:$8 sps:$4 sm:$0xff]  }
 0x4a4   : > { %v3709_v41 = vpop.f32.mrb[28].mxu1 }
 0x4a5   : > { %v3718_v47 = vadd.f32 %v3709_v41, %v3333_v42  ;;  %v3711_v48 = vpop.f32.mrb[29].mxu1  ;;  %v8125_v42 = vld [vmem:[%s10450_s8 + $0x160] ss:$8 sps:$4 sm:$0xff]   ;;  %v8139_v41 = vld [vmem:[%s10450_s8 + $0x184] ss:$8 sps:$4 sm:$0xff]  }
 0x4a6   : > { %v3712_v49 = vpop.f32.mrb[30].mxu1  ;;  %v8142_v48 = vld [vmem:[%s10450_s8 + $0x54] ss:$8 sps:$4 sm:$0xff]  }
 0x4a7   : > { %v3721_v50 = vadd.f32 %v3712_v49, %v3336_v44  ;;  %v3714_v51 = vpop.f32.mrb[31].mxu1  ;;  %v8136_v44 = vld [vmem:[%s10450_s8 + $0x44] ss:$8 sps:$4 sm:$0xff]   ;;  %v8137_v49 = vld [vmem:[%s10450_s8 + $0x180] ss:$8 sps:$4 sm:$0xff]  }
 0x4a8   : > { %v8140_v51 = vld [vmem:[%s10450_s8 + $0x50] ss:$8 sps:$4 sm:$0xff]  }
 0x4dc   : > { %v4106_v52 = vpop.f32.mrb[32].mxu1 }
 0x4dd   : > { %v4115_v53 = vadd.f32 %v4106_v52, %v3718_v47  ;;  %v4108_v54 = vpop.f32.mrb[33].mxu1  ;;  %v8134_v47 = vld [vmem:[%s10450_s8 + $0x40] ss:$8 sps:$4 sm:$0xff]   ;;  %v8148_v52 = vld [vmem:[%s10450_s8 + $0x64] ss:$8 sps:$4 sm:$0xff]  }
 0x4de   : > { %v4109_v55 = vpop.f32.mrb[34].mxu1  ;;  %v8151_v54 = vld [vmem:[%s10450_s8 + $0x1a4] ss:$8 sps:$4 sm:$0xff]  }
 0x4df   : > { %v4118_v56 = vadd.f32 %v4109_v55, %v3721_v50  ;;  %v4111_v57 = vpop.f32.mrb[35].mxu1  ;;  %v8145_v50 = vld [vmem:[%s10450_s8 + $0x194] ss:$8 sps:$4 sm:$0xff]   ;;  %v8146_v55 = vld [vmem:[%s10450_s8 + $0x60] ss:$8 sps:$4 sm:$0xff]  }
 0x4e0   : > { %v8149_v57 = vld [vmem:[%s10450_s8 + $0x1a0] ss:$8 sps:$4 sm:$0xff]  }
 0x513   : > { %v4446_v60 = vpop.f32.mrb[28].mxu0 }
 0x514   : > { %v4519_v0 = vadd.f32 %v4507_v58, %v4446_v60  ;;  %v4489_v4 = vpop.f32.mrb[36].mxu1  ;;  %v4448_v5 = vpop.f32.mrb[29].mxu0  ;;  %v8155_v60 = vld [vmem:[%s10450_s8 + $0x1b0] ss:$8 sps:$4 sm:$0xff]  }
 0x515   : > { %v4498_v6 = vadd.f32 %v4489_v4, %v4115_v53  ;;  %v4520_v7 = vadd.f32 %v4511_v59, %v4448_v5  ;;  %v4491_v1 = vpop.f32.mrb[37].mxu1  ;;  %v4450_v8 = vpop.f32.mrb[30].mxu0  ;;  %v8143_v53 = vld [vmem:[%s10450_s8 + $0x190] ss:$8 sps:$4 sm:$0xff]   ;;  %v8166_v4 = vld [vmem:[%s10450_s8 + $0x94] ss:$8 sps:$4 sm:$0xff]  }
 0x516   : > { %v4522_v9 = vadd.f32 %v4507_v58, %v4450_v8  ;;  %v4492_v10 = vpop.f32.mrb[38].mxu1  ;;  %v4452_v63 = vpop.f32.mrb[31].mxu0  ;;  %v4525_v16 = vmax.f32 %v4519_v0, 0.0  ;;  %v8152_v58 = vld [vmem:[%s10450_s8 + $0x70] ss:$8 sps:$4 sm:$0xff]  }
 0x517   : > { %v4521_v11 = vadd.f32 %v4515_v62, %v4498_v6  ;;  %v4501_v14 = vadd.f32 %v4492_v10, %v4118_v56  ;;  %v4523_v12 = vadd.f32 %v4511_v59, %v4452_v63  ;;  %v4494_v15 = vpop.f32.mrb[39].mxu1  ;;  %v4526_v17 = vmax.f32 %v4520_v7, 0.0  ;;  %v8154_v56 = vld [vmem:[%s10450_s8 + $0x74] ss:$8 sps:$4 sm:$0xff]   ;;  %v8160_v59 = vld [vmem:[%s10450_s8 + $0x84] ss:$8 sps:$4 sm:$0xff]  }
 0x518   : > { %v4528_v13 = vmax.f32 %v4522_v9, 0.0  ;;  %v8158_v0 = vld [vmem:[%s10450_s8 + $0x80] ss:$8 sps:$4 sm:$0xff]   ;;  %v8169_v6 = vld [vmem:[%s10450_s8 + $0x1d4] ss:$8 sps:$4 sm:$0xff]  }
 0x519   : > { %v4524_v18 = vadd.f32 %v4515_v62, %v4501_v14  ;;  %v4529_v27 = vmax.f32 %v4523_v12, 0.0  ;;  %v4527_v19 = vmax.f32 %v4521_v11, 0.0  ;;  %v8163_v62 = vld [vmem:[%s10450_s8 + $0x1c4] ss:$8 sps:$4 sm:$0xff]   ;;  %v8161_v5 = vld [vmem:[%s10450_s8 + $0x1c0] ss:$8 sps:$4 sm:$0xff]  }
 0x51a   : > { %v4531_v28 = vpack.c.bf16 %v4528_v13, %v4525_v16  ;;  %v8164_v7 = vld [vmem:[%s10450_s8 + $0x90] ss:$8 sps:$4 sm:$0xff]   ;;  %v8172_v1 = vld [vmem:[%s10450_s8 + $0xa4] ss:$8 sps:$4 sm:$0xff]   ;;  %v8170_v10 = vld [vmem:[%s10450_s8 + $0xa0] ss:$8 sps:$4 sm:$0xff]  }
 0x51b   : > { %v4530_v20 = vmax.f32 %v4524_v18, 0.0  ;;  %v4532_v21 = vpack.c.bf16 %v4529_v27, %v4526_v17  ;;  %v8167_v8 = vld [vmem:[%s10450_s8 + $0x1d0] ss:$8 sps:$4 sm:$0xff]   ;;  %v8175_v9 = vld [vmem:[%s10450_s8 + $0x1e4] ss:$8 sps:$4 sm:$0xff]  }
 0x51c   : > { %v4541_v22 = vsel %vm4539_vm15, %v4531_v28, 0  ;;  %v8178_v63 = vld [vmem:[%s10450_s8 + $0xb4] ss:$8 sps:$4 sm:$0xff]   ;;  %v8173_v11 = vld [vmem:[%s10450_s8 + $0x1e0] ss:$8 sps:$4 sm:$0xff]  }
 0x51d   : > { %v4533_v23 = vpack.c.bf16 %v4530_v20, %v4527_v19  ;;  %7078 = vmatprep.subr.msk.bf16.mxu0 %vm4539_vm15, %v4532_v21  ;;  %v8181_v14 = vld [vmem:[%s10450_s8 + $0x1f4] ss:$8 sps:$4 sm:$0xff]   ;;  %v8176_v12 = vld [vmem:[%s10450_s8 + $0xb0] ss:$8 sps:$4 sm:$0xff]   ;;  %v8184_v15 = vld [vmem:[%s10450_s8 + $0xc4] ss:$8 sps:$4 sm:$0xff]  }
 0x51e   : > { %4550 = vmatpush1.bf16.msra.mxu0 %v4541_v22  ;;  %v8179_v16 = vld [vmem:[%s10450_s8 + $0x1f0] ss:$8 sps:$4 sm:$0xff]   ;;  %v8187_v13 = vld [vmem:[%s10450_s8 + $0x204] ss:$8 sps:$4 sm:$0xff]   ;;  %v8182_v17 = vld [vmem:[%s10450_s8 + $0xc0] ss:$8 sps:$4 sm:$0xff]  }
 0x51f   : > { %v4547_v25 = vsel %vm4539_vm15, %v4533_v23, 0  ;;  %7082 = vmatprep.subr.msk.bf16.mxu0 %vm4539_vm15, %v4532_v21  ;;  %v8185_v18 = vld [vmem:[%s10450_s8 + $0x200] ss:$8 sps:$4 sm:$0xff]   ;;  %v8188_v27 = vld [vmem:[%s10450_s8 + $0xd0] ss:$8 sps:$4 sm:$0xff]  }
 0x520   : > { %7395 = vmatpush3.bf16.msra.mxu1 %v4547_v25  ;;  %v8190_v28 = vld [vmem:[%s10450_s8 + $0xd4] ss:$8 sps:$4 sm:$0xff]   ;;  %v8191_v19 = vld [vmem:[%s10450_s8 + $0x210] ss:$8 sps:$4 sm:$0xff]   ;;  %v8194_v21 = vld [vmem:[%s10450_s8 + $0xe0] ss:$8 sps:$4 sm:$0xff]  }
 0x521   : > { %7079 = vmatmul.mubr.msk.bf16.vlgmr.msra.gmra.mrb[32].mxu0 %vm4535_vm1, %v4534_v24  ;;  %7400 = vmatprep.subr.bf16.mxu1 %v8367_v46  ;;  %v8193_v20 = vld [vmem:[%s10450_s8 + $0x214] ss:$8 sps:$4 sm:$0xff]   ;;  %v8197_v23 = vld [vmem:[%s10450_s8 + $0x220] ss:$8 sps:$4 sm:$0xff]  }
 0x522   : > { %4636 = vmatpush1.bf16.msra.mxu0 %v4541_v22  ;;  %4667 = vmatprep.mubr.bf16.mxu0 %v8366_v2  ;;  %v8196_v22 = vld [vmem:[%s10450_s8 + $0xe4] ss:$8 sps:$4 sm:$0xff]  }
 0x523   : > { %7397 = vmatmul.mubr.msk.bf16.vlgmr.msra.gmra.mrb[40].mxu1 %vm4535_vm1, %v4534_v24  ;;  %4965 = vmatprep.subr.bf16.mxu0 %v8112_v26  ;;  %v8199_v24 = vld [vmem:[%s10450_s8 + $0x224] ss:$8 sps:$4 sm:$0xff]   ;;  %v8202_v26 = vld [vmem:[%s10450_s8 + $0xf4] ss:$8 sps:$4 sm:$0xff]  }
 0x524   : > { %7401 = vmatpush3.bf16.msra.mxu1 %v4547_v25  ;;  %7402 = vmatprep.mubr.msk.bf16.mxu1 %vm8368_vm14, %v8367_v46  ;;  %v8200_v25 = vld [vmem:[%s10450_s8 + $0xf0] ss:$8 sps:$4 sm:$0xff]  }
 0x525   : > { %5288 = vmatprep.subr.bf16.mxu1 %v8115_v29  ;;  %v8203_v29 = vld [vmem:[%s10450_s8 + $0x230] ss:$8 sps:$4 sm:$0xff]  }
 0x529   : > { %7083 = vmatmul.mubr.msk.bf16.vlgmr.msra.gmra.mrb[36].mxu0 %vm4535_vm1, %v7081_v30 }
 0x52a   : > { %4966 = vmatpush1.bf16.msra.mxu0 %v8110_v31  ;;  %v8208_v31 = vld [vmem:[%s10450_s8 + $0x104] ss:$8 sps:$4 sm:$0xff]  }
 0x52b   : > { %7403 = vmatmul.mubr.msk.bf16.vlgmr.msra.gmra.mrb[44].mxu1 %vm4535_vm1, %v7081_v30  ;;  %4967 = vmatprep.subr.bf16.mxu0 %v8118_v32  ;;  %v8205_v30 = vld [vmem:[%s10450_s8 + $0x234] ss:$8 sps:$4 sm:$0xff]   ;;  %v8211_v32 = vld [vmem:[%s10450_s8 + $0x244] ss:$8 sps:$4 sm:$0xff]  }
 0x52c   : > { %5289 = vmatpush1.bf16.msra.mxu1 %v8113_v33 }
 0x52d   : > { %5290 = vmatprep.subr.bf16.mxu1 %v8121_v34 }
 0x52e   : > { %4968 = vmatpush1.bf16.msra.mxu0 %v8116_v35 }
 0x52f   : > { %4969 = vmatprep.subr.bf16.mxu0 %v8124_v36 }
 0x530   : > { %5291 = vmatpush1.bf16.msra.mxu1 %v8119_v37 }
 0x531   : > { %5292 = vmatprep.subr.bf16.mxu1 %v8127_v38 }
 0x532   : > { %4970 = vmatpush1.bf16.msra.mxu0 %v8122_v39 }
 0x533   : > { %4971 = vmatprep.subr.bf16.mxu0 %v8130_v40 }
 0x534   : > { %5293 = vmatpush1.bf16.msra.mxu1 %v8125_v42 }
 0x535   : > { %5294 = vmatprep.subr.bf16.mxu1 %v8133_v61 }
 0x536   : > { %4972 = vmatpush1.bf16.msra.mxu0 %v8128_v43 }
 0x537   : > { %4973 = vmatprep.subr.bf16.mxu0 %v8136_v44 }
 0x538   : > { %5295 = vmatpush1.bf16.msra.mxu1 %v8131_v45 }
 0x539   : > { %5296 = vmatprep.subr.bf16.mxu1 %v8139_v41 }
 0x53a   : > { %4974 = vmatpush1.bf16.msra.mxu0 %v8134_v47 }
 0x53b   : > { %4975 = vmatprep.subr.bf16.mxu0 %v8142_v48 }
 0x53c   : > { %5297 = vmatpush1.bf16.msra.mxu1 %v8137_v49 }
 0x53d   : > { %5298 = vmatprep.subr.bf16.mxu1 %v8145_v50 }
 0x53e   : > { %4976 = vmatpush1.bf16.msra.mxu0 %v8140_v51  ;;  %v8206_v51 = vld [vmem:[%s10450_s8 + $0x100] ss:$8 sps:$4 sm:$0xff]  }
 0x53f   : > { %4977 = vmatprep.subr.bf16.mxu0 %v8148_v52  ;;  %v8209_v52 = vld [vmem:[%s10450_s8 + $0x240] ss:$8 sps:$4 sm:$0xff]  }
 0x540   : > { %5299 = vmatpush1.bf16.msra.mxu1 %v8143_v53 }
 0x541   : > { %5300 = vmatprep.subr.bf16.mxu1 %v8151_v54 }
 0x542   : > { %4978 = vmatpush1.bf16.msra.mxu0 %v8146_v55  ;;  %v8214_v55 = vld [vmem:[%s10450_s8 + $0x114] ss:$8 sps:$4 sm:$0xff]  }
 0x543   : > { %4979 = vmatprep.subr.bf16.mxu0 %v8154_v56  ;;  %v8217_v56 = vld [vmem:[%s10450_s8 + $0x254] ss:$8 sps:$4 sm:$0xff]  }
 0x544   : > { %5301 = vmatpush1.bf16.msra.mxu1 %v8149_v57 }
 0x545   : > { %5302 = vmatprep.subr.bf16.mxu1 %v8157_v3  ;;  %v8212_v3 = vld [vmem:[%s10450_s8 + $0x110] ss:$8 sps:$4 sm:$0xff]  }
 0x546   : > { %4980 = vmatpush1.bf16.msra.mxu0 %v8152_v58  ;;  %v8215_v58 = vld [vmem:[%s10450_s8 + $0x250] ss:$8 sps:$4 sm:$0xff]  }
 0x547   : > { %4981 = vmatprep.subr.bf16.mxu0 %v8160_v59  ;;  %v8220_v59 = vld [vmem:[%s10450_s8 + $0x124] ss:$8 sps:$4 sm:$0xff]  }
 0x548   : > { %5303 = vmatpush1.bf16.msra.mxu1 %v8155_v60  ;;  %v8223_v60 = vld [vmem:[%s10450_s8 + $0x264] ss:$8 sps:$4 sm:$0xff]  }
 0x549   : > { %5304 = vmatprep.subr.bf16.mxu1 %v8163_v62  ;;  %v8218_v62 = vld [vmem:[%s10450_s8 + $0x120] ss:$8 sps:$4 sm:$0xff]  }
 0x54a   : > { %4982 = vmatpush1.bf16.msra.mxu0 %v8158_v0  ;;  %v8221_v0 = vld [vmem:[%s10450_s8 + $0x260] ss:$8 sps:$4 sm:$0xff]  }
 0x54b   : > { %4983 = vmatprep.subr.bf16.mxu0 %v8166_v4  ;;  %v8226_v4 = vld [vmem:[%s10450_s8 + $0x134] ss:$8 sps:$4 sm:$0xff]  }
 0x54c   : > { %5305 = vmatpush1.bf16.msra.mxu1 %v8161_v5  ;;  %v8229_v5 = vld [vmem:[%s10450_s8 + $0x274] ss:$8 sps:$4 sm:$0xff]  }
 0x54d   : > { %5306 = vmatprep.subr.bf16.mxu1 %v8169_v6  ;;  %v8224_v6 = vld [vmem:[%s10450_s8 + $0x130] ss:$8 sps:$4 sm:$0xff]  }
 0x54e   : > { %4984 = vmatpush1.bf16.msra.mxu0 %v8164_v7  ;;  %v8227_v7 = vld [vmem:[%s10450_s8 + $0x270] ss:$8 sps:$4 sm:$0xff]  }
 0x54f   : > { %4985 = vmatprep.subr.bf16.mxu0 %v8172_v1  ;;  %v8230_v1 = vld [vmem:[%s10451_s9] sm:$0xff]  }
 0x550   : > { %5307 = vmatpush1.bf16.msra.mxu1 %v8167_v8  ;;  %v8231_v8 = vld [vmem:[%s10451_s9 + $0x50] sm:$0xff]  }
 0x551   : > { %5308 = vmatprep.subr.bf16.mxu1 %v8175_v9 }
 0x552   : > { %4986 = vmatpush1.bf16.msra.mxu0 %v8170_v10  ;;  %v8232_v10 = vld [vmem:[%s10451_s9 + $0x8] sm:$0xff]  }
 0x553   : > { %4987 = vmatprep.subr.bf16.mxu0 %v8178_v63  ;;  %v8233_v63 = vld [vmem:[%s10451_s9 + $0x58] sm:$0xff]  }
 0x554   : > { %5309 = vmatpush1.bf16.msra.mxu1 %v8173_v11  ;;  %v8234_v11 = vld [vmem:[%s10451_s9 + $0x10] sm:$0xff]  }
 0x555   : > { %5310 = vmatprep.subr.bf16.mxu1 %v8181_v14  ;;  %v8235_v14 = vld [vmem:[%s10451_s9 + $0x60] sm:$0xff]  }
 0x556   : > { %4988 = vmatpush1.bf16.msra.mxu0 %v8176_v12  ;;  %v8236_v12 = vld [vmem:[%s10451_s9 + $0x18] sm:$0xff]  }
 0x557   : > { %4989 = vmatprep.subr.bf16.mxu0 %v8184_v15  ;;  %v8237_v15 = vld [vmem:[%s10451_s9 + $0x68] sm:$0xff]  }
 0x558   : > { %5311 = vmatpush1.bf16.msra.mxu1 %v8179_v16  ;;  %v8238_v16 = vld [vmem:[%s10451_s9 + $0x20] sm:$0xff]  }
 0x559   : > { %5312 = vmatprep.subr.bf16.mxu1 %v8187_v13  ;;  %v8239_v13 = vld [vmem:[%s10451_s9 + $0x70] sm:$0xff]  }
 0x55a   : > { %4990 = vmatpush1.bf16.msra.mxu0 %v8182_v17  ;;  %v8240_v17 = vld [vmem:[%s10451_s9 + $0x28] sm:$0xff]  }
 0x55b   : > { %4991 = vmatprep.subr.bf16.mxu0 %v8190_v28  ;;  %v8243_v28 = vld [vmem:[%s10451_s9 + $0x80] sm:$0xff]  }
 0x55c   : > { %5313 = vmatpush1.bf16.msra.mxu1 %v8185_v18  ;;  %v8241_v18 = vld [vmem:[%s10451_s9 + $0x78] sm:$0xff]  }
 0x55d   : > { %5314 = vmatprep.subr.bf16.mxu1 %v8193_v20  ;;  %v8245_v20 = vld [vmem:[%s10451_s9 + $0x88] sm:$0xff]  }
 0x55e   : > { %4992 = vmatpush1.bf16.msra.mxu0 %v8188_v27  ;;  %v8242_v27 = vld [vmem:[%s10451_s9 + $0x30] sm:$0xff]  }
 0x55f   : > { %4993 = vmatprep.subr.bf16.mxu0 %v8196_v22  ;;  %v8247_v22 = vld [vmem:[%s10451_s9 + $0x90] sm:$0xff]  }
 0x560   : > { %5315 = vmatpush1.bf16.msra.mxu1 %v8191_v19  ;;  %v8244_v19 = vld [vmem:[%s10451_s9 + $0x38] sm:$0xff]  }
 0x561   : > { %5316 = vmatprep.subr.bf16.mxu1 %v8199_v24  ;;  %v8249_v24 = vld [vmem:[%s10451_s9 + $0x98] sm:$0xff]  }
 0x562   : > { %4994 = vmatpush1.bf16.msra.mxu0 %v8194_v21  ;;  %v8246_v21 = vld [vmem:[%s10451_s9 + $0x40] sm:$0xff]  }
 0x563   : > { %4995 = vmatprep.subr.bf16.mxu0 %v8202_v26 }
 0x564   : > { %5317 = vmatpush1.bf16.msra.mxu1 %v8197_v23  ;;  %v8248_v23 = vld [vmem:[%s10451_s9 + $0x48] sm:$0xff]  }
 0x565   : > { %5318 = vmatprep.subr.bf16.mxu1 %v8205_v30 }
 0x566   : > { %4996 = vmatpush1.bf16.msra.mxu0 %v8200_v25 }
 0x567   : > { %5006 = vmatprep.subr.bf16.mxu0 %v8208_v31 }
 0x568   : > { %5319 = vmatpush1.bf16.msra.mxu1 %v8203_v29 }
 0x569   : > { %5329 = vmatprep.subr.bf16.mxu1 %v8211_v32 }
 0x5f4   : > { %v4583_v33 = vpop.f32.mrb[32].mxu0 }
 0x5f5   : > { %v4585_v34 = vpop.f32.mrb[33].mxu0 }
 0x5f6   : > { %v4587_v35 = vpop.f32.mrb[34].mxu0  ;;  %v4624_v36 = vpop.f32.mrb[40].mxu1 }
 0x5f7   : > { %v4588_v37 = vpop.f32.mrb[35].mxu0  ;;  %v7398_v38 = vpop.f32.mrb[41].mxu1 }
 0x5f8   : > { %v4627_v39 = vpop.f32.mrb[42].mxu1 }
 0x5f9   : > { %v7399_v40 = vpop.f32.mrb[43].mxu1 }
 0x5fc   : > { %v4669_v42 = vpop.f32.mrb[36].mxu0 }
 0x5fd   : > { %v4716_v61 = vmax.f32 %v4583_v33, %v4669_v42  ;;  %v4671_v43 = vpop.f32.mrb[37].mxu0 }
 0x5fe   : > { %v4717_v44 = vmax.f32 %v4585_v34, %v4671_v43  ;;  %v4673_v45 = vpop.f32.mrb[38].mxu0  ;;  %v4710_v41 = vpop.f32.mrb[44].mxu1 }
 0x5ff   : > { %v4674_v47 = vpop.f32.mrb[39].mxu0  ;;  %v4718_v48 = vmax.f32 %v4624_v36, %v4710_v41  ;;  %v7404_v49 = vpop.f32.mrb[45].mxu1  ;;  %v4719_v54 = vpack.c.bf16 %v4716_v61, %v4716_v61  ;;  %v5386_v36 = vld [vmem:[#allocation3] sm:$0x77] }
 0x600   : > { %v4720_v50 = vpack.c.bf16 %v4717_v44, %v4717_v44  ;;  %v4713_v53 = vpop.f32.mrb[46].mxu1  ;;  %v8252_v45 = vld [vmem:[%s10451_s9 + $0xf0] sm:$0xff]   ;;  %v8253_v49 = vld [vmem:[%s10451_s9 + $0xa0] sm:$0xff]  }
 0x601   : > { %v7405_v57 = vpop.f32.mrb[47].mxu1  ;;  %v4721_v9 = vpack.c.bf16 %v4718_v48, %v4718_v48  ;;  %v8255_v53 = vld [vmem:[%s10451_s9 + $0xf8] sm:$0xff]  }
 0x602   : > { %4997 = vmatprep.mubr.bf16.mxu0 %v4720_v50  ;;  %5320 = vmatprep.mubr.bf16.mxu1 %v4720_v50  ;;  %v8259_v57 = vld [vmem:[%s10451_s9 + $0x108] sm:$0xff]  }
 0x603   : > { %4998 = vmatmul.mubr.bf16.vlgmr.msra.gmra.mrb[40].mxu0 %v4719_v54  ;;  %5321 = vmatmul.mubr.bf16.vlgmr.msra.gmra.mrb[48].mxu1 %v4719_v54  ;;  %v8256_v54 = vld [vmem:[%s10451_s9 + $0xa8] sm:$0xff]  }
 0x604   : > { %5007 = vmatpush1.bf16.msra.mxu0 %v8206_v51  ;;  %5330 = vmatpush1.bf16.msra.mxu1 %v8209_v52 }
 0x605   : > { %5008 = vmatprep.subr.bf16.mxu0 %v8214_v55  ;;  %5331 = vmatprep.subr.bf16.mxu1 %v8217_v56  ;;  %v8257_v55 = vld [vmem:[%s10451_s9 + $0x100] sm:$0xff]   ;;  %v8258_v56 = vld [vmem:[%s10451_s9 + $0xb0] sm:$0xff]  }
 0x606   : > { %5038 = vmatprep.mubr.bf16.mxu0 %v8366_v2  ;;  %5361 = vmatprep.mubr.bf16.mxu1 %v8366_v2 }
 0x608   : > { %5009 = vmatpush1.bf16.msra.mxu0 %v8212_v3  ;;  %5332 = vmatpush1.bf16.msra.mxu1 %v8215_v58  ;;  %v8260_v3 = vld [vmem:[%s10451_s9 + $0xb8] sm:$0xff]   ;;  %v8261_v58 = vld [vmem:[%s10451_s9 + $0x110] sm:$0xff]  }
 0x609   : > { %5010 = vmatprep.subr.bf16.mxu0 %v8220_v59  ;;  %5333 = vmatprep.subr.bf16.mxu1 %v8223_v60  ;;  %v8262_v59 = vld [vmem:[%s10451_s9 + $0xc0] sm:$0xff]   ;;  %v8263_v60 = vld [vmem:[%s10451_s9 + $0x118] sm:$0xff]  }
 0x60c   : > { %5011 = vmatpush1.bf16.msra.mxu0 %v8218_v62  ;;  %5334 = vmatpush1.bf16.msra.mxu1 %v8221_v0  ;;  %v8264_v62 = vld [vmem:[%s10451_s9 + $0xc8] sm:$0xff]   ;;  %v8265_v0 = vld [vmem:[%s10451_s9 + $0x120] sm:$0xff]  }
 0x60d   : > { %5012 = vmatprep.subr.bf16.mxu0 %v8226_v4  ;;  %5335 = vmatprep.subr.bf16.mxu1 %v8229_v5  ;;  %v8266_v4 = vld [vmem:[%s10451_s9 + $0xd0] sm:$0xff]   ;;  %v8267_v5 = vld [vmem:[%s10451_s9 + $0x128] sm:$0xff]  }
 0x610   : > { %5013 = vmatpush1.bf16.msra.mxu0 %v8224_v6  ;;  %5336 = vmatpush1.bf16.msra.mxu1 %v8227_v7  ;;  %v8268_v6 = vld [vmem:[%s10451_s9 + $0xd8] sm:$0xff]   ;;  %v8269_v7 = vld [vmem:[%s10451_s9 + $0x130] sm:$0xff]  }
 0x611   : > { %5609 = vmatprep.subr.bf16.mxu1 %v8366_v2  ;;  %5506 = vmatprep.subr.bf16.mxu0 %v8366_v2 }
 0x613   : > { %7125 = vmatmul.mubr.msk.bf16.vlgmr.msra.gmra.mrb[40].mxu0 %vm2034_vm6, %v4721_v9  ;;  %7206 = vmatmul.mubr.msk.bf16.vlgmr.msra.gmra.mrb[48].mxu1 %vm2034_vm6, %v4721_v9  ;;  %vm5384_vm6 = vmand %vm5383_vm4, %vm1046_vm3  ;;  %v8271_v9 = vld [vmem:[%s10451_s9 + $0x138] sm:$0xff]  }
 0x614   : > { %5610 = vmatpush1.bf16.msra.mxu1 %v8230_v1  ;;  %5507 = vmatpush1.bf16.msra.mxu0 %v8231_v8  ;;  %vm5385_vm7 = vmor %vm5384_vm6, %vm10188_vm5  ;;  %v8270_v8 = vld [vmem:[%s10451_s9 + $0xe0] sm:$0xff]  }
 0x615   : > { %5611 = vmatprep.subr.bf16.mxu1 %v8366_v2  ;;  %5508 = vmatprep.subr.bf16.mxu0 %v8366_v2 }
 0x618   : > { %5612 = vmatpush1.bf16.msra.mxu1 %v8232_v10  ;;  %5509 = vmatpush1.bf16.msra.mxu0 %v8233_v63 }
 0x619   : > { %5613 = vmatprep.subr.bf16.mxu1 %v8366_v2  ;;  %5510 = vmatprep.subr.bf16.mxu0 %v8366_v2 }
 0x61c   : > { %5614 = vmatpush1.bf16.msra.mxu1 %v8234_v11  ;;  %5511 = vmatpush1.bf16.msra.mxu0 %v8235_v14  ;;  %v8272_v11 = vld [vmem:[%s10451_s9 + $0xe8] sm:$0xff]  }
 0x61d   : > { %5615 = vmatprep.subr.bf16.mxu1 %v8366_v2  ;;  %5512 = vmatprep.subr.bf16.mxu0 %v8366_v2 }
 0x620   : > { %5616 = vmatpush1.bf16.msra.mxu1 %v8236_v12  ;;  %5513 = vmatpush1.bf16.msra.mxu0 %v8237_v15  ;;  %v8274_v15 = vld [vmem:[%s10451_s9 + $0x140] sm:$0xff]  }
 0x621   : > { %5617 = vmatprep.subr.bf16.mxu1 %v8366_v2  ;;  %5514 = vmatprep.subr.bf16.mxu0 %v8366_v2 }
 0x624   : > { %5618 = vmatpush1.bf16.msra.mxu1 %v8238_v16  ;;  %5515 = vmatpush1.bf16.msra.mxu0 %v8239_v13 }
 0x625   : > { %5619 = vmatprep.subr.bf16.mxu1 %v8366_v2  ;;  %5516 = vmatprep.subr.bf16.mxu0 %v8366_v2 }
 0x628   : > { %5620 = vmatpush1.bf16.msra.mxu1 %v8240_v17  ;;  %5517 = vmatpush1.bf16.msra.mxu0 %v8241_v18  ;;  %v8276_v17 = vld [vmem:[%s10451_s9 + $0x148] sm:$0xff]   ;;  %v8277_v18 = vld [vmem:[%s10451_s9 + $0x150] sm:$0xff]  }
 0x629   : > { %5621 = vmatprep.subr.bf16.mxu1 %v8366_v2  ;;  %5518 = vmatprep.subr.bf16.mxu0 %v8366_v2 }
 0x62c   : > { %5622 = vmatpush1.bf16.msra.mxu1 %v8242_v27  ;;  %5519 = vmatpush1.bf16.msra.mxu0 %v8243_v28  ;;  %v8278_v27 = vld [vmem:[%s10451_s9 + $0x158] sm:$0xff]   ;;  %v8279_v28 = vld [vmem:[%s10451_s9 + $0x160] sm:$0xff]  }
 0x62d   : > { %5623 = vmatprep.subr.bf16.mxu1 %v8366_v2  ;;  %5520 = vmatprep.subr.bf16.mxu0 %v8366_v2 }
 0x630   : > { %5624 = vmatpush1.bf16.msra.mxu1 %v8244_v19  ;;  %5521 = vmatpush1.bf16.msra.mxu0 %v8245_v20  ;;  %v8280_v19 = vld [vmem:[%s10451_s9 + $0x168] sm:$0xff]   ;;  %v8281_v20 = vld [vmem:[%s10451_s9 + $0x170] sm:$0xff]  }
 0x631   : > { %5625 = vmatprep.subr.bf16.mxu1 %v8366_v2  ;;  %5522 = vmatprep.subr.bf16.mxu0 %v8366_v2 }
 0x634   : > { %5626 = vmatpush1.bf16.msra.mxu1 %v8246_v21  ;;  %5523 = vmatpush1.bf16.msra.mxu0 %v8247_v22  ;;  %v8282_v21 = vld [vmem:[%s10451_s9 + $0x178] sm:$0xff]   ;;  %v8283_v22 = vld [vmem:[%s10451_s9 + $0x180] sm:$0xff]  }
 0x635   : > { %5627 = vmatprep.subr.bf16.mxu1 %v8366_v2  ;;  %5524 = vmatprep.subr.bf16.mxu0 %v8366_v2 }
 0x638   : > { %5628 = vmatpush1.bf16.msra.mxu1 %v8248_v23  ;;  %5525 = vmatpush1.bf16.msra.mxu0 %v8249_v24  ;;  %v8284_v23 = vld [vmem:[%s10451_s9 + $0x188] sm:$0xff]  }
 0x639   : > { %5876 = vmatprep.subr.bf16.mxu1 %v8366_v2  ;;  %5742 = vmatprep.subr.bf16.mxu0 %v8366_v2 }
 0x6e6   : > { %v5040_v26 = vpop.f32.mrb[40].mxu0  ;;  %v5363_v29 = vpop.f32.mrb[48].mxu1 }
 0x6e7   : > { %v5370_v30 = vmax.f32 %v5040_v26, %v5363_v29  ;;  %v5042_v31 = vpop.f32.mrb[41].mxu0  ;;  %v5365_v32 = vpop.f32.mrb[49].mxu1  ;;  %v8286_v26 = vld [vmem:[%s10453_s11] sm:$0xff]   ;;  %v8287_v29 = vld [vmem:[%s10453_s11 + $0x8] sm:$0xff]  }
 0x6e8   : > { %v5371_v33 = vmax.f32 %v5042_v31, %v5365_v32  ;;  %v5044_v34 = vpop.f32.mrb[42].mxu0  ;;  %v5367_v35 = vpop.f32.mrb[50].mxu1  ;;  %v8290_v31 = vld [vmem:[%s10453_s11 + $0x20] sm:$0xff]   ;;  %v8291_v32 = vld [vmem:[%s10453_s11 + $0x28] sm:$0xff]  }
 0x6e9   : > { %v5045_v37 = vpop.f32.mrb[43].mxu0  ;;  %v5368_v38 = vpop.f32.mrb[51].mxu1  ;;  %v8293_v34 = vld [vmem:[%s10453_s11 + $0x38] sm:$0xff]  }
 0x6ea   : > { %v7371_v39 = vpack.c.bf16 %v5371_v33, %v5370_v30  ;;  %v8289_v30 = vld [vmem:[%s10453_s11 + $0x18] sm:$0xff]   ;;  %v8292_v33 = vld [vmem:[%s10453_s11 + $0x30] sm:$0xff]  }
 0x6ec   : > { %v5387_v40 = vsel %vm5385_vm7, %v7371_v39, %v5386_v36 }
 0x6ed   : > { %5388 = vst [vmem:[#allocation3] sm:$0x77] %v5387_v40 }
 0x6f4   : > { %v5389_v42 = vld [vmem:[#allocation3] sm:$0x11]  ;;  %v5649_v61 = vld [vmem:[#allocation3] sm:$0x22]  ;;  %v5917_v63 = vld [vmem:[#allocation3] sm:$0x44] }
 0x6f5   : > { %v7229_v43 = vcombine.high %v5389_v42, %v5389_v42  ;;  %v7228_v44 = vcombine.low %v5389_v42, %v5389_v42  ;;  %v7273_v41 = vcombine.high %v5649_v61, %v5649_v61  ;;  %v7272_v1 = vcombine.low %v5649_v61, %v5649_v61 }
 0x6f6   : > { %v7337_v14 = vcombine.high %v5917_v63, %v5917_v63  ;;  %v7336_v24 = vcombine.low %v5917_v63, %v5917_v63 }
 0x6f7   : > { %7251 = vmatprep.mubr.msk.bf16.mxu1 %vm581_vm0, %v7229_v43  ;;  %v5440_v47 = vshrl.u32 %v7229_v43, 16  ;;  %v5437_v48 = vshrl.u32 %v7228_v44, 16  ;;  %v5809_v50 = vshrl.u32 %v7273_v41, 16  ;;  %v5677_v51 = vrot.slane %v7273_v41, 1 }
 0x6f8   : > { %5642 = vmatmul.mubr.bf16.vlgmr.msra.gmra.mrb[52].mxu1 %v7228_v44  ;;  %v5805_v10 = vshrl.u32 %v7272_v1, 16  ;;  %v5676_v16 = vrot.slane %v7272_v1, 1  ;;  %v5945_v13 = vrot.slane %v7337_v14, 2  ;;  %v5944_v25 = vrot.slane %v7336_v24, 2  ;;  %v8299_v1 = vld [vmem:[%s10455_s13 + $0x28] sm:$0xff]  }
 0x6f9   : > { %5877 = vmatpush1.bf16.msra.mxu1 %v8252_v45  ;;  %7240 = vmatprep.mubr.msk.bf16.mxu0 %vm581_vm0, %v5440_v47  ;;  %v5811_v52 = vrot.slane %v5809_v50, 1 }
 0x6fa   : > { %5539 = vmatmul.mubr.bf16.vlgmr.msra.gmra.mrb[44].mxu0 %v5437_v48  ;;  %5878 = vmatprep.subr.bf16.mxu1 %v8366_v2  ;;  %v5807_v12 = vrot.slane %v5805_v10, 1  ;;  %v6071_v10 = vld [vmem:[%s10454_s12] sm:$0x1] }
 0x6fb   : > { %5743 = vmatpush1.bf16.msra.mxu0 %v8253_v49  ;;  %7284 = vmatprep.mubr.msk.bf16.mxu0 %vm581_vm0, %v5677_v51 }
 0x6fc   : > { %7315 = vmatprep.mubr.msk.bf16.mxu1 %vm581_vm0, %v5811_v52  ;;  %5744 = vmatprep.subr.bf16.mxu0 %v8366_v2 }
 0x6fd   : > { %5879 = vmatpush1.bf16.msra.mxu1 %v8255_v53 }
 0x6fe   : > { %5880 = vmatprep.subr.bf16.mxu1 %v8366_v2 }
 0x6ff   : > { %5745 = vmatpush1.bf16.msra.mxu0 %v8256_v54 }
 0x700   : > { %5746 = vmatprep.subr.bf16.mxu0 %v8366_v2 }
 0x701   : > { %5881 = vmatpush1.bf16.msra.mxu1 %v8257_v55  ;;  %v6051_v55 = vld [vmem:[%s10452_s10] sm:$0x1] }
 0x702   : > { %5882 = vmatprep.subr.bf16.mxu1 %v8366_v2 }
 0x703   : > { %5747 = vmatpush1.bf16.msra.mxu0 %v8258_v56 }
 0x704   : > { %5748 = vmatprep.subr.bf16.mxu0 %v8366_v2 }
 0x705   : > { %5883 = vmatpush1.bf16.msra.mxu1 %v8259_v57 }
 0x706   : > { %5884 = vmatprep.subr.bf16.mxu1 %v8366_v2 }
 0x707   : > { %5749 = vmatpush1.bf16.msra.mxu0 %v8260_v3 }
 0x708   : > { %5750 = vmatprep.subr.bf16.mxu0 %v8366_v2 }
 0x709   : > { %5885 = vmatpush1.bf16.msra.mxu1 %v8261_v58 }
 0x70a   : > { %5886 = vmatprep.subr.bf16.mxu1 %v8366_v2 }
 0x70b   : > { %5751 = vmatpush1.bf16.msra.mxu0 %v8262_v59 }
 0x70c   : > { %5752 = vmatprep.subr.bf16.mxu0 %v8366_v2 }
 0x70d   : > { %5887 = vmatpush1.bf16.msra.mxu1 %v8263_v60 }
 0x70e   : > { %5888 = vmatprep.subr.bf16.mxu1 %v8366_v2 }
 0x70f   : > { %5753 = vmatpush1.bf16.msra.mxu0 %v8264_v62  ;;  %v8294_v62 = vld [vmem:[%s10455_s13] sm:$0xff]  }
 0x710   : > { %5754 = vmatprep.subr.bf16.mxu0 %v8366_v2 }
 0x711   : > { %5889 = vmatpush1.bf16.msra.mxu1 %v8265_v0 }
 0x712   : > { %5890 = vmatprep.subr.bf16.mxu1 %v8366_v2 }
 0x713   : > { %5755 = vmatpush1.bf16.msra.mxu0 %v8266_v4  ;;  %v8295_v4 = vld [vmem:[%s10455_s13 + $0x8] sm:$0xff]  }
 0x714   : > { %5756 = vmatprep.subr.bf16.mxu0 %v8366_v2 }
 0x715   : > { %5891 = vmatpush1.bf16.msra.mxu1 %v8267_v5  ;;  %v8296_v5 = vld [vmem:[%s10455_s13 + $0x10] sm:$0xff]  }
 0x716   : > { %5892 = vmatprep.subr.bf16.mxu1 %v8366_v2 }
 0x717   : > { %5757 = vmatpush1.bf16.msra.mxu0 %v8268_v6  ;;  %v8297_v6 = vld [vmem:[%s10455_s13 + $0x18] sm:$0xff]  }
 0x718   : > { %5758 = vmatprep.subr.bf16.mxu0 %v8366_v2 }
 0x719   : > { %5893 = vmatpush1.bf16.msra.mxu1 %v8269_v7  ;;  %v8298_v7 = vld [vmem:[%s10455_s13 + $0x20] sm:$0xff]  }
 0x71a   : > { %5894 = vmatprep.subr.bf16.mxu1 %v8366_v2 }
 0x71b   : > { %5759 = vmatpush1.bf16.msra.mxu0 %v8270_v8  ;;  %v8300_v8 = vld [vmem:[%s10455_s13 + $0x30] sm:$0xff]  }
 0x71c   : > { %5760 = vmatprep.subr.bf16.mxu0 %v8366_v2 }
 0x71d   : > { %5895 = vmatpush1.bf16.msra.mxu1 %v8271_v9  ;;  %v8301_v9 = vld [vmem:[%s10455_s13 + $0x38] sm:$0xff]  }
 0x71e   : > { %7406 = vmatprep.subr.bf16.mxu1 %v8367_v46 }
 0x71f   : > { %5761 = vmatpush1.bf16.msra.mxu0 %v8272_v11 }
 0x720   : > { %5909 = vmatmul.mubr.bf16.vlgmr.msra.gmra.mrb[56].mxu1 %v5807_v12  ;;  %6010 = vmatprep.subr.bf16.mxu0 %v8366_v2 }
 0x721   : > { %7422 = vmatprep.mubr.msk.bf16.mxu1 %vm8368_vm14, %v8367_v46  ;;  %7407 = vmatpush3.bf16.msra.mxu1 %v8286_v26 }
 0x722   : > { %5775 = vmatmul.mubr.bf16.vlgmr.msra.gmra.mrb[48].mxu0 %v5676_v16  ;;  %7408 = vmatprep.subr.bf16.mxu1 %v8367_v46 }
 0x723   : > { %6011 = vmatpush1.bf16.msra.mxu0 %v8274_v15  ;;  %7348 = vmatprep.mubr.msk.bf16.mxu0 %vm581_vm0, %v5945_v13 }
 0x724   : > { %6012 = vmatprep.subr.bf16.mxu0 %v8366_v2 }
 0x725   : > { %7409 = vmatpush3.bf16.msra.mxu1 %v8287_v29 }
 0x726   : > { %7410 = vmatprep.subr.bf16.mxu1 %v8367_v46 }
 0x727   : > { %6013 = vmatpush1.bf16.msra.mxu0 %v8276_v17 }
 0x728   : > { %6014 = vmatprep.subr.bf16.mxu0 %v8366_v2 }
 0x72b   : > { %6015 = vmatpush1.bf16.msra.mxu0 %v8277_v18 }
 0x72c   : > { %6016 = vmatprep.subr.bf16.mxu0 %v8366_v2 }
 0x72f   : > { %6017 = vmatpush1.bf16.msra.mxu0 %v8278_v27 }
 0x730   : > { %6018 = vmatprep.subr.bf16.mxu0 %v8366_v2 }
 0x733   : > { %6019 = vmatpush1.bf16.msra.mxu0 %v8279_v28 }
 0x734   : > { %6020 = vmatprep.subr.bf16.mxu0 %v8366_v2 }
 0x737   : > { %6021 = vmatpush1.bf16.msra.mxu0 %v8280_v19 }
 0x738   : > { %6022 = vmatprep.subr.bf16.mxu0 %v8366_v2 }
 0x73b   : > { %6023 = vmatpush1.bf16.msra.mxu0 %v8281_v20 }
 0x73c   : > { %6024 = vmatprep.subr.bf16.mxu0 %v8366_v2 }
 0x73f   : > { %6025 = vmatpush1.bf16.msra.mxu0 %v8282_v21 }
 0x740   : > { %6026 = vmatprep.subr.bf16.mxu0 %v8366_v2 }
 0x743   : > { %6027 = vmatpush1.bf16.msra.mxu0 %v8283_v22 }
 0x744   : > { %6028 = vmatprep.subr.bf16.mxu0 %v8366_v2  ;;  %v8288_v2 = vld [vmem:[%s10453_s11 + $0x10] sm:$0xff]  }
 0x745   : > { %7411 = vmatpush3.bf16.msra.mxu1 %v8288_v2 }
 0x746   : > { %7412 = vmatprep.subr.bf16.mxu1 %v8367_v46 }
 0x747   : > { %6029 = vmatpush1.bf16.msra.mxu0 %v8284_v23 }
 0x749   : > { %7413 = vmatpush3.bf16.msra.mxu1 %v8289_v30 }
 0x74a   : > { %6043 = vmatmul.mubr.bf16.vlgmr.msra.gmra.mrb[52].mxu0 %v5944_v25  ;;  %7414 = vmatprep.subr.bf16.mxu1 %v8367_v46 }
 0x74d   : > { %7415 = vmatpush3.bf16.msra.mxu1 %v8290_v31 }
 0x74e   : > { %7416 = vmatprep.subr.bf16.mxu1 %v8367_v46 }
 0x751   : > { %7417 = vmatpush3.bf16.msra.mxu1 %v8291_v32 }
 0x752   : > { %7418 = vmatprep.subr.bf16.mxu1 %v8367_v46 }
 0x755   : > { %7419 = vmatpush3.bf16.msra.mxu1 %v8292_v33 }
 0x756   : > { %7420 = vmatprep.subr.bf16.mxu1 %v8367_v46 }
 0x759   : > { %7421 = vmatpush3.bf16.msra.mxu1 %v8293_v34 }
 0x75a   : > { %7426 = vmatprep.subr.bf16.mxu1 %v8367_v46 }
 0x7cb   : > { %v5643_v35 = vpop.f32.mrb[52].mxu1 }
 0x7cc   : > { %v5645_v36 = vpop.f32.mrb[53].mxu1 }
 0x7cd   : > { %v5540_v37 = vpop.f32.mrb[44].mxu0  ;;  %v5646_v38 = vpop.f32.mrb[54].mxu1 }
 0x7ce   : > { %v5644_v39 = vadd.f32 %v5643_v35, %v5540_v37  ;;  %v5542_v40 = vpop.f32.mrb[45].mxu0  ;;  %v5647_v42 = vpop.f32.mrb[55].mxu1 }
 0x7cf   : > { %v5543_v61 = vpop.f32.mrb[46].mxu0 }
 0x7d0   : > { %v5544_v43 = vpop.f32.mrb[47].mxu0 }
 0x7f3   : > { %v5910_v44 = vpop.f32.mrb[56].mxu1 }
 0x7f4   : > { %v5912_v45 = vpop.f32.mrb[57].mxu1 }
 0x7f5   : > { %v5776_v41 = vpop.f32.mrb[48].mxu0  ;;  %v5913_v47 = vpop.f32.mrb[58].mxu1 }
 0x7f6   : > { %v5782_v48 = vadd.f32 %v5776_v41, %v5644_v39  ;;  %v5778_v49 = vpop.f32.mrb[49].mxu0  ;;  %v5914_v50 = vpop.f32.mrb[59].mxu1 }
 0x7f7   : > { %v5779_v51 = vpop.f32.mrb[50].mxu0 }
 0x7f8   : > { %v5780_v52 = vpop.f32.mrb[51].mxu0  ;;  %v5916_v53 = vadd.f32 %v5910_v44, %v5782_v48 }
 0x81d   : > { %v6044_v54 = vpop.f32.mrb[52].mxu0 }
 0x81e   : > { %v6050_v56 = vadd.f32 %v6044_v54, %v5916_v53  ;;  %v6046_v57 = vpop.f32.mrb[53].mxu0 }
 0x81f   : > { %v6047_v3 = vpop.f32.mrb[54].mxu0 }
 0x820   : > { %v6052_v58 = vadd.f32 %v6051_v55, %v6050_v56  ;;  %v6048_v59 = vpop.f32.mrb[55].mxu0 }
 0x822   : > { %v6053_v60 = vmax.f32 %v6052_v58, 0.0 }
 0x824   : > { %v6054_v0 = vpack.c.bf16 %v6053_v60, %v6053_v60 }
 0x826   : > { %7423 = vmatmul.mubr.bf16.vlgmr.msra.gmra.mrb[60].mxu1 %v6054_v0 }
 0x827   : > { %7427 = vmatpush3.bf16.msra.mxu1 %v8294_v62  ;;  %7442 = vmatprep.mubr.msk.bf16.mxu1 %vm8368_vm14, %v8367_v46 }
 0x828   : > { %7428 = vmatprep.subr.bf16.mxu1 %v8367_v46 }
 0x82b   : > { %7429 = vmatpush3.bf16.msra.mxu1 %v8295_v4 }
 0x82c   : > { %7430 = vmatprep.subr.bf16.mxu1 %v8367_v46 }
 0x82f   : > { %7431 = vmatpush3.bf16.msra.mxu1 %v8296_v5 }
 0x830   : > { %7432 = vmatprep.subr.bf16.mxu1 %v8367_v46 }
 0x833   : > { %7433 = vmatpush3.bf16.msra.mxu1 %v8297_v6 }
 0x834   : > { %7434 = vmatprep.subr.bf16.mxu1 %v8367_v46 }
 0x837   : > { %7435 = vmatpush3.bf16.msra.mxu1 %v8298_v7 }
 0x838   : > { %7436 = vmatprep.subr.bf16.mxu1 %v8367_v46 }
 0x83b   : > { %7437 = vmatpush3.bf16.msra.mxu1 %v8299_v1 }
 0x83c   : > { %7438 = vmatprep.subr.bf16.mxu1 %v8367_v46 }
 0x83f   : > { %7439 = vmatpush3.bf16.msra.mxu1 %v8300_v8 }
 0x840   : > { %7440 = vmatprep.subr.bf16.mxu1 %v8367_v46  ;;  %v6178_v46 = vld [vmem:[%s10456_s14] sm:$0x1] }
 0x843   : > { %7441 = vmatpush3.bf16.msra.mxu1 %v8301_v9 }
 0x8f9   : > { %v6154_v63 = vpop.f32.mrb[60].mxu1 }
 0x8fa   : > { %v6155_v11 = vadd.f32 %v6154_v63, %v6071_v10  ;;  %v7424_v14 = vpop.f32.mrb[61].mxu1 }
 0x8fb   : > { %v6157_v12 = vpop.f32.mrb[62].mxu1 }
 0x8fc   : > { %v6160_v15 = vmax.f32 %v6155_v11, 0.0  ;;  %v7425_v16 = vpop.f32.mrb[63].mxu1 }
 0x8fe   : > { %v6161_v13 = vpack.c.bf16 %v6160_v15, %v6160_v15 }
 0x900   : > { %7443 = vmatmul.mubr.bf16.vlgmr.msra.gmra.mrb[64].mxu1 %v6161_v13 }
 0x9d3   : > { %v6261_v17 = vpop.f32.mrb[64].mxu1 }
 0x9d4   : > { %v6262_v18 = vadd.f32 %v6261_v17, %v6178_v46  ;;  %v7444_v27 = vpop.f32.mrb[65].mxu1 }
 0x9d5   : > { %v6264_v28 = vpop.f32.mrb[66].mxu1 }
 0x9d6   : > { %6267 = vst [vmem:[%s486_s30] sm:$0x1] %v6262_v18  ;;  %v7445_v19 = vpop.f32.mrb[67].mxu1 }
 0x9d7   : > { %8315 = shalt.err (!%p8312_p3)
}
 0x9d8   : > { %s8316_s18 = scalar_lea.hbm %s10400_s25, 16  ;;  %s8320_s30 = scalar_lea.hbm %s10457_s15, 32 }
 0x9d9   : > { %p8317_p4 = scmp.ne.s32.totalorder %s10400_s25, %s8316_s18  ;;  %p8321_p9 = scmp.lt.u32.totalorder %s10400_s25, %s10457_s15 }
 0x9da   : > { %p8322_p10 = scmp.lt.u32.totalorder %s8320_s30, %s8316_s18  ;;  %p8324_p12 = scmp.lt.u32.totalorder %s8316_s18, %s10400_s25 }
 0x9db   : > { %p8318_p7 = pnand %p8317_p4, %p8488_p5 }
 0x9dc   : > { %p8323_p11 = por %p8322_p10, %p8321_p9 }
 0x9dd   : > { %p8319_p8 = pneg %p8318_p7 }
 0x9de   : > { %p8325_p13 = por %p8324_p12, %p8323_p11 }
 0x9e0   : > { %p8326_p0 = pnand %p8325_p13, %p8319_p8 }
 0x9e2   : > { %8329 = shalt.err (!%p8326_p0)
}
 0x9e3   : > { %7542 = dma.vmem_to_hbm [thread:$0]  (%p8488_p5), %s10402_s16, 16, %s10400_s25, %s6269_s26  }
 0x9e4 PF: > { %s10474_s22 = sld [smem:[#allocation9_spill]]  ;;  %s10475_s20 = sld [smem:[#allocation7_spill]] }
 0x9ea   : > { %p7548_p1 = scmp.ge.s32.totalorder %s10474_s22, 2  ;;  %s6293_s21 = sand.u32 1, %s10475_s20  }
 0x9eb   : > { %s6294_s27 = scalar_lea.sflag [#allocation5], %s6293_s21 }
 0x9ec   : > { %p7545_p2 = pnand %p7548_p1, %p8492_p6 }
 0x9ee   : > { %8347 = dma.done.wait (!%p7545_p2), %s6294_s27, 16  }
 0x9ef   : > { %8349 = vsyncadd (!%p7545_p2), %s6294_s27, 4294967280  ;;  %s10477_s21 = sld [smem:[#allocation10_spill]]  ;;  %s10478_s29 = sld [smem:[#allocation8_spill]] }
 0x9f0   : > { %s10479_s20 = sld [smem:[#allocation11_spill]]  ;;  %s10480_s18 = smov %s8356_s19 }
 0x9f5   : > { %p25_p3 = scmp.ge.s32.totalorder %s10477_s21, 4   ;;  %s10481_s19 = smov %s10478_s29 }
 0x9f7   :  { %27 = sbr.rel (!%p25_p3) target bundleno = 3 (0x3), region = 131 }
 0x9fe   :  { %6298 = vsyncpa [#allocation5], 1 }
 0x9ff   :  { %6300 = vsyncpa [#allocation5 + $0x1], 1 }

</bundles_post_ra>
